<compile_context>
chip_gen: v6e
topology: v6e:2x2x1
jax: 0.10.0
libtpu: 0.0.40
codegen_flags: <defaults>
</compile_context>

<pallas_src>
import functools

import jax
import jax.numpy as jnp
from jax.experimental import pallas as pl
from jax.experimental.pallas import tpu as pltpu

MEAN = 0.1307
SIGMA = 0.3081


def _pad_to(n, m):
    return ((n + m - 1) // m) * m


# ---------------------------------------------------------------------------
# Fused kernel:
#   AbstractInput + AbstractNormalize + AbstractAffine(conv) + ReLU
#   + AbstractAffine(Linear) + ReLU + AbstractOutput
# Grid: (num_conv_tiles,) over the conv output-feature axis ("arbitrary":
# the head at the last step consumes the accumulated bounds scratch).
# ---------------------------------------------------------------------------
def _deeppoly_fused_kernel(eps_ref, x_ref, wc_ref, bc_ref, w1t_ref, b1_ref,
                           wot_ref, bo_ref, lb_ref, ub_ref, bnd_ref,
                           *, mean, sigma):
    j = pl.program_id(0)
    bp = x_ref.shape[0]          # padded batch (sublanes)
    tile = wc_ref.shape[1]       # conv output-feature tile (lanes)

    # --- AbstractInput + AbstractNormalize (center/radius form) -------------
    x = x_ref[...]                                   # (Bp, Kp)
    eps = eps_ref[...]                               # (Bp, 1) runtime epsilons
    lb_in = jnp.clip(x - eps, 0.0, 1.0)
    ub_in = jnp.clip(x + eps, 0.0, 1.0)
    c0 = ((lb_in + ub_in) * 0.5 - mean) / sigma      # normalized center
    r0 = (ub_in - lb_in) * (0.5 / sigma)             # normalized radius

    # --- Conv-as-affine + ReLU on this output-feature tile ------------------
    wc = wc_ref[...]                                 # (Kp, tile)
    yc = jnp.dot(c0, wc, preferred_element_type=jnp.float32) + bc_ref[...]
    yr = jnp.dot(r0, jnp.abs(wc), preferred_element_type=jnp.float32)
    lb1 = jnp.maximum(yc - yr, 0.0)                  # fused ReLU
    ub1 = jnp.maximum(yc + yr, 0.0)

    off = pl.multiple_of(j * tile, 128)
    bnd_ref[pl.ds(0, bp), pl.ds(off, tile)] = lb1        # rows [0, Bp)   = lb
    bnd_ref[pl.ds(bp, bp), pl.ds(off, tile)] = ub1       # rows [Bp, 2Bp) = ub

    # --- Head (Linear + ReLU + AbstractOutput) on the last grid step --------
    @pl.when(j == pl.num_programs(0) - 1)
    def _():
        bnd = bnd_ref[...]                           # (2Bp, M1p)
        lb_h = bnd[0:bp, :]
        ub_h = bnd[bp:2 * bp, :]
        c1 = (lb_h + ub_h) * 0.5
        r1 = (ub_h - lb_h) * 0.5

        w1t = w1t_ref[...]                           # (M1p, M2p)
        yc1 = jnp.dot(c1, w1t, preferred_element_type=jnp.float32) + b1_ref[...]
        yr1 = jnp.dot(r1, jnp.abs(w1t), preferred_element_type=jnp.float32)
        lb2 = jnp.maximum(yc1 - yr1, 0.0)
        ub2 = jnp.maximum(yc1 + yr1, 0.0)

        c2 = (lb2 + ub2) * 0.5
        r2 = (ub2 - lb2) * 0.5
        wot = wot_ref[...]                           # (M2p, M3p)
        yc2 = jnp.dot(c2, wot, preferred_element_type=jnp.float32) + bo_ref[...]
        yr2 = jnp.dot(r2, jnp.abs(wot), preferred_element_type=jnp.float32)

        lb_ref[...] = yc2 - yr2                      # full-block unmasked stores
        ub_ref[...] = yc2 + yr2


# ---------------------------------------------------------------------------
# One-time network abstraction: Conv2d -> dense affine (returned directly in
# (K, M) kernel layout), AbstractOutput rows, zero-padding to lane multiples.
# Called ONCE per weight set; the per-(x, eps) path never redoes this work.
# ---------------------------------------------------------------------------
def conv_to_affine(w, b, in_shape, stride, padding):
    C, H, Wd = in_shape
    n = C * H * Wd
    eye = jnp.eye(n, dtype=jnp.float32).reshape(n, C, H, Wd)
    out = jax.lax.conv_general_dilated(
        eye, jnp.asarray(w, jnp.float32), window_strides=(stride, stride),
        padding=[(padding, padding), (padding, padding)],
        dimension_numbers=("NCHW", "OIHW", "NCHW"))
    out_shape = out.shape[1:]                        # (Cout, Ho, Wo)
    wt = out.reshape(n, -1)                          # (K, M), kernel layout
    bvec = jnp.broadcast_to(jnp.asarray(b, jnp.float32)[:, None, None],
                            out_shape).reshape(-1)
    return wt, bvec, out_shape


def _choose_tile(Kp, M1, vmem_weight_budget_bytes):
    # ~3x per tile: double-buffered wt block + the materialized |wt| temp.
    cap = (vmem_weight_budget_bytes // (3 * 4 * Kp)) // 128 * 128
    cap = max(int(cap), 128)
    return int(min(cap, _pad_to(M1, 128)))


def prepare_network(params, in_shape, true_label,
                    tile_m=None, vmem_weight_budget_bytes=8 << 20):
    (conv_w, conv_b, conv_stride, conv_pad,
     lin1_w, lin1_b, lin2_w, lin2_b) = params

    wc_t, bc, _ = conv_to_affine(conv_w, conv_b, in_shape,
                                 stride=conv_stride, padding=conv_pad)  # (K, M1)
    K, M1 = wc_t.shape

    # AbstractOutput: one row per wrong class j: W[true] - W[j]
    lin2_w = jnp.asarray(lin2_w, jnp.float32)
    lin2_b = jnp.asarray(lin2_b, jnp.float32)
    n_cls = lin2_w.shape[0]
    other = jnp.array([j for j in range(n_cls) if j != int(true_label)], jnp.int32)
    w_out = lin2_w[true_label][None, :] - lin2_w[other]                 # (M3, M2)
    b_out = lin2_b[true_label] - lin2_b[other]                          # (M3,)

    w1_t = jnp.asarray(lin1_w, jnp.float32).T                           # (M1, M2)
    wo_t = w_out.T                                                      # (M2, M3)
    M2 = w1_t.shape[1]
    M3 = wo_t.shape[1]

    Kp = _pad_to(K, 128)
    tile = (int(tile_m) if tile_m is not None
            else _choose_tile(Kp, M1, vmem_weight_budget_bytes))
    tile = _pad_to(min(tile, _pad_to(M1, 128)), 128)
    M1p = _pad_to(M1, tile)
    M2p = _pad_to(M2, 128)
    M3p = _pad_to(M3, 128)

    wc_p = jnp.zeros((Kp, M1p), jnp.float32).at[:K, :M1].set(wc_t)
    bc_p = jnp.zeros((1, M1p), jnp.float32).at[0, :M1].set(bc)
    w1t_p = jnp.zeros((M1p, M2p), jnp.float32).at[:M1, :M2].set(w1_t)
    b1_p = jnp.zeros((1, M2p), jnp.float32).at[0, :M2].set(
        jnp.asarray(lin1_b, jnp.float32))
    wot_p = jnp.zeros((M2p, M3p), jnp.float32).at[:M2, :M3].set(wo_t)
    bo_p = jnp.zeros((1, M3p), jnp.float32).at[0, :M3].set(b_out)

    return dict(wc_p=wc_p, bc_p=bc_p, w1t_p=w1t_p, b1_p=b1_p,
                wot_p=wot_p, bo_p=bo_p, tile_m=tile,
                n_out=int(M3), in_features=int(K))


# ---------------------------------------------------------------------------
# Per-(x, eps) forward: pads the batch into sublanes, launches the fused
# kernel once.  x: (B, C, H, W) or (C, H, W);  eps: scalar or (B,).
# ---------------------------------------------------------------------------
def make_deeppoly_forward(prepared, mean=MEAN, sigma=SIGMA):
    wc_p, bc_p = prepared["wc_p"], prepared["bc_p"]
    w1t_p, b1_p = prepared["w1t_p"], prepared["b1_p"]
    wot_p, bo_p = prepared["wot_p"], prepared["bo_p"]
    tile = prepared["tile_m"]
    n_out = prepared["n_out"]
    K = prepared["in_features"]

    Kp, M1p = wc_p.shape
    M2p = w1t_p.shape[1]
    M3p = wot_p.shape[1]
    grid = M1p // tile

    kernel = functools.partial(_deeppoly_fused_kernel,
                               mean=float(mean), sigma=float(sigma))

    @jax.jit
    def forward(x, eps):
        x = jnp.asarray(x, jnp.float32)
        if x.ndim == 3:
            x = x[None]
        B = x.shape[0]
        x2 = x.reshape(B, -1)                        # (B, K)
        eps_v = jnp.broadcast_to(jnp.asarray(eps, jnp.float32).reshape(-1), (B,))

        Bp = _pad_to(B, 8)
        x_p = jnp.zeros((Bp, Kp), jnp.float32).at[:B, :K].set(x2)
        eps_p = jnp.zeros((Bp, 1), jnp.float32).at[:B, 0].set(eps_v)

        lb_p, ub_p = pl.pallas_call(
            kernel,
            out_shape=(jax.ShapeDtypeStruct((Bp, M3p), jnp.float32),
                       jax.ShapeDtypeStruct((Bp, M3p), jnp.float32)),
            grid=(grid,),
            in_specs=[pl.BlockSpec((Bp, 1), lambda j: (0, 0)),       # eps
                      pl.BlockSpec((Bp, Kp), lambda j: (0, 0)),      # x
                      pl.BlockSpec((Kp, tile), lambda j: (0, j)),    # conv W^T
                      pl.BlockSpec((1, tile), lambda j: (0, j)),     # conv b
                      pl.BlockSpec((M1p, M2p), lambda j: (0, 0)),    # lin1 W^T
                      pl.BlockSpec((1, M2p), lambda j: (0, 0)),      # lin1 b
                      pl.BlockSpec((M2p, M3p), lambda j: (0, 0)),    # out W^T
                      pl.BlockSpec((1, M3p), lambda j: (0, 0))],     # out b
            out_specs=(pl.BlockSpec((Bp, M3p), lambda j: (0, 0)),
                       pl.BlockSpec((Bp, M3p), lambda j: (0, 0))),
            scratch_shapes=[pltpu.VMEM((2 * Bp, M1p), jnp.float32)],
            compiler_params=pltpu.CompilerParams(
                dimension_semantics=("arbitrary",)),
        )(eps_p, x_p, wc_p, bc_p, w1t_p, b1_p, wot_p, bo_p)

        return lb_p[:B, :n_out], ub_p[:B, :n_out]

    return forward


# ---------------------------------------------------------------------------
# Plain-JAX reference (classic W+/W- interval propagation) for validation.
# ---------------------------------------------------------------------------
def reference_forward(x, eps, true_label, params):
    (conv_w, conv_b, conv_stride, conv_pad,
     lin1_w, lin1_b, lin2_w, lin2_b) = params
    C, H, Wd = x.shape
    wc_t, bc, _ = conv_to_affine(conv_w, conv_b, (C, H, Wd),
                                 stride=conv_stride, padding=conv_pad)
    Wc = wc_t.T
    n_cls = lin2_w.shape[0]
    other = jnp.array([j for j in range(n_cls) if j != int(true_label)], jnp.int32)
    Wo = lin2_w[true_label][None, :] - lin2_w[other]
    bo = lin2_b[true_label] - lin2_b[other]

    xf = x.reshape(-1).astype(jnp.float32)
    lb = (jnp.clip(xf - eps, 0.0, 1.0) - MEAN) / SIGMA
    ub = (jnp.clip(xf + eps, 0.0, 1.0) - MEAN) / SIGMA

    def aff(lb, ub, W, b, relu):
        Wp = jnp.maximum(W, 0.0)
        Wn = jnp.minimum(W, 0.0)
        l = Wp @ lb + Wn @ ub + b
        u = Wp @ ub + Wn @ lb + b
        if relu:
            l, u = jnp.maximum(l, 0.0), jnp.maximum(u, 0.0)
        return l, u

    lb, ub = aff(lb, ub, Wc, bc, True)
    lb, ub = aff(lb, ub, lin1_w.astype(jnp.float32), lin1_b.astype(jnp.float32), True)
    lb, ub = aff(lb, ub, Wo.astype(jnp.float32), bo.astype(jnp.float32), False)
    return lb, ub


if __name__ == "__main__":
    key = jax.random.PRNGKey(0)
    k1, k2, k3, k4, k5, k6, k7 = jax.random.split(key, 7)

    # MNIST-like setup: 1x16x16 image, conv(1->16, k3, s2, p1) -> 16x8x8=1024,
    # Linear(1024->64), ReLU, Linear(64->10), true_label = 3.
    C, H, Wd = 1, 16, 16
    true_label = 3

    conv_w = 0.3 * jax.random.normal(k2, (16, 1, 3, 3), dtype=jnp.float32)
    conv_b = 0.1 * jax.random.normal(k3, (16,), dtype=jnp.float32)
    lin1_w = 0.2 * jax.random.normal(k4, (64, 1024), dtype=jnp.float32)
    lin1_b = 0.1 * jax.random.normal(k5, (64,), dtype=jnp.float32)
    lin2_w = 0.2 * jax.random.normal(k6, (10, 64), dtype=jnp.float32)
    lin2_b = 0.1 * jax.random.normal(k7, (10,), dtype=jnp.float32)
    params = (conv_w, conv_b, 2, 1, lin1_w, lin1_b, lin2_w, lin2_b)

    # Two batched verification queries (own eps each) -> one fused launch.
    x = jax.random.uniform(k1, (2, C, H, Wd), dtype=jnp.float32)
    eps = jnp.array([0.05, 0.1], jnp.float32)

    prepared = prepare_network(params, (C, H, Wd), true_label)   # one-time work
    forward = make_deeppoly_forward(prepared)

    lb, ub = forward(x, eps)
    jax.block_until_ready((lb, ub))
    assert lb.shape == (2, 9) and ub.shape == (2, 9)

    # eps is a runtime input: a second sweep step reuses the compiled kernel.
    eps2 = jnp.array([0.02, 0.08], jnp.float32)
    lb2, ub2 = forward(x, eps2)
    jax.block_until_ready((lb2, ub2))

    def check(lb_k, ub_k, eps_vec):
        for i in range(x.shape[0]):
            lb_r, ub_r = reference_forward(x[i], float(eps_vec[i]),
                                           true_label, params)
            assert bool(jnp.all(lb_k[i] <= ub_k[i] + 1e-4)), "lb > ub"
            scale = max(1.0, float(jnp.max(jnp.abs(jnp.concatenate([lb_r, ub_r])))))
            err = float(jnp.max(jnp.maximum(jnp.abs(lb_k[i] - lb_r),
                                            jnp.abs(ub_k[i] - ub_r))))
            assert err <= 2e-2 * scale, f"mismatch vs reference: err={err}, scale={scale}"

    check(lb, ub, eps)
    check(lb2, ub2, eps2)

    print("KERNEL_OK")
</pallas_src>

<mosaic_0001>
module attributes {stable_mosaic.version = 11 : i64} {
  func.func @_deeppoly_fused_kernel(%arg0: i32, %arg1: memref<8x1xf32, #tpu.memory_space<vmem>>, %arg2: memref<8x256xf32, #tpu.memory_space<vmem>>, %arg3: memref<256x1024xf32, #tpu.memory_space<vmem>>, %arg4: memref<1x1024xf32, #tpu.memory_space<vmem>>, %arg5: memref<1024x128xf32, #tpu.memory_space<vmem>>, %arg6: memref<1x128xf32, #tpu.memory_space<vmem>>, %arg7: memref<128x128xf32, #tpu.memory_space<vmem>>, %arg8: memref<1x128xf32, #tpu.memory_space<vmem>>, %arg9: memref<8x128xf32, #tpu.memory_space<vmem>>, %arg10: memref<8x128xf32, #tpu.memory_space<vmem>>, %arg11: memref<16x1024xf32, #tpu.memory_space<vmem>>) attributes {dimension_semantics = [#tpu.dimension_semantics<arbitrary>], iteration_bounds = array<i64: 1>, scalar_prefetch = 0 : i64, scratch_operands = 1 : i64, tpu.core_type = #tpu.core_type<tc>, window_params = [{pipeline_mode = #tpu.pipeline_mode<synchronous>, transform_indices = @transform_0, window_bounds = array<i64: 8, 1>}, {pipeline_mode = #tpu.pipeline_mode<synchronous>, transform_indices = @transform_1, window_bounds = array<i64: 8, 256>}, {transform_indices = @transform_2, window_bounds = array<i64: 256, 1024>}, {transform_indices = @transform_3, window_bounds = array<i64: 1, 1024>}, {pipeline_mode = #tpu.pipeline_mode<synchronous>, transform_indices = @transform_4, window_bounds = array<i64: 1024, 128>}, {pipeline_mode = #tpu.pipeline_mode<synchronous>, transform_indices = @transform_5, window_bounds = array<i64: 1, 128>}, {pipeline_mode = #tpu.pipeline_mode<synchronous>, transform_indices = @transform_6, window_bounds = array<i64: 128, 128>}, {pipeline_mode = #tpu.pipeline_mode<synchronous>, transform_indices = @transform_7, window_bounds = array<i64: 1, 128>}, {pipeline_mode = #tpu.pipeline_mode<synchronous>, transform_indices = @transform_8, window_bounds = array<i64: 8, 128>}, {pipeline_mode = #tpu.pipeline_mode<synchronous>, transform_indices = @transform_9, window_bounds = array<i64: 8, 128>}]} {
    %c0 = arith.constant 0 : index
    %c0_0 = arith.constant 0 : index
    %0 = vector.load %arg2[%c0, %c0_0] : memref<8x256xf32, #tpu.memory_space<vmem>>, vector<8x256xf32>
    %c0_1 = arith.constant 0 : index
    %c0_2 = arith.constant 0 : index
    %1 = vector.load %arg1[%c0_1, %c0_2] : memref<8x1xf32, #tpu.memory_space<vmem>>, vector<8x1xf32>
    %2 = vector.broadcast %1 : vector<8x1xf32> to vector<8x256xf32>
    %3 = arith.subf %0, %2 : vector<8x256xf32>
    %cst = arith.constant 0.000000e+00 : f32
    %cst_3 = arith.constant 1.000000e+00 : f32
    %4 = vector.broadcast %cst : f32 to vector<8x256xf32>
    %5 = arith.maximumf %4, %3 : vector<8x256xf32>
    %6 = vector.broadcast %cst_3 : f32 to vector<8x256xf32>
    %7 = arith.minimumf %6, %5 : vector<8x256xf32>
    %8 = vector.broadcast %1 : vector<8x1xf32> to vector<8x256xf32>
    %9 = arith.addf %0, %8 : vector<8x256xf32>
    %cst_4 = arith.constant 0.000000e+00 : f32
    %cst_5 = arith.constant 1.000000e+00 : f32
    %10 = vector.broadcast %cst_4 : f32 to vector<8x256xf32>
    %11 = arith.maximumf %10, %9 : vector<8x256xf32>
    %12 = vector.broadcast %cst_5 : f32 to vector<8x256xf32>
    %13 = arith.minimumf %12, %11 : vector<8x256xf32>
    %14 = arith.addf %7, %13 : vector<8x256xf32>
    %cst_6 = arith.constant 5.000000e-01 : f32
    %15 = vector.broadcast %cst_6 : f32 to vector<8x256xf32>
    %16 = arith.mulf %14, %15 : vector<8x256xf32>
    %cst_7 = arith.constant 1.307000e-01 : f32
    %17 = vector.broadcast %cst_7 : f32 to vector<8x256xf32>
    %18 = arith.subf %16, %17 : vector<8x256xf32>
    %cst_8 = arith.constant 3.081000e-01 : f32
    %19 = vector.broadcast %cst_8 : f32 to vector<8x256xf32>
    %20 = arith.divf %18, %19 : vector<8x256xf32>
    %21 = arith.subf %13, %7 : vector<8x256xf32>
    %cst_9 = arith.constant 1.6228497 : f32
    %22 = vector.broadcast %cst_9 : f32 to vector<8x256xf32>
    %23 = arith.mulf %21, %22 : vector<8x256xf32>
    %c0_10 = arith.constant 0 : index
    %c0_11 = arith.constant 0 : index
    %24 = vector.load %arg3[%c0_10, %c0_11] : memref<256x1024xf32, #tpu.memory_space<vmem>>, vector<256x1024xf32>
    %cst_12 = arith.constant dense<0.000000e+00> : vector<8x1024xf32>
    %25 = tpu.matmul %20, %24, %cst_12 {dimension_numbers = #tpu.dot_dimension_numbers<[1], [0], [0], [1], [0, 0, 1, 1], [], []>} : vector<8x256xf32>, vector<256x1024xf32>, vector<8x1024xf32> -> vector<8x1024xf32>
    %c0_13 = arith.constant 0 : index
    %c0_14 = arith.constant 0 : index
    %26 = vector.load %arg4[%c0_13, %c0_14] : memref<1x1024xf32, #tpu.memory_space<vmem>>, vector<1x1024xf32>
    %27 = vector.broadcast %26 : vector<1x1024xf32> to vector<8x1024xf32>
    %28 = arith.addf %25, %27 : vector<8x1024xf32>
    %29 = math.absf %24 : vector<256x1024xf32>
    %cst_15 = arith.constant dense<0.000000e+00> : vector<8x1024xf32>
    %30 = tpu.matmul %23, %29, %cst_15 {dimension_numbers = #tpu.dot_dimension_numbers<[1], [0], [0], [1], [0, 0, 1, 1], [], []>} : vector<8x256xf32>, vector<256x1024xf32>, vector<8x1024xf32> -> vector<8x1024xf32>
    %31 = arith.subf %28, %30 : vector<8x1024xf32>
    %cst_16 = arith.constant 0.000000e+00 : f32
    %32 = vector.broadcast %cst_16 : f32 to vector<8x1024xf32>
    %33 = arith.maximumf %31, %32 : vector<8x1024xf32>
    %34 = arith.addf %28, %30 : vector<8x1024xf32>
    %cst_17 = arith.constant 0.000000e+00 : f32
    %35 = vector.broadcast %cst_17 : f32 to vector<8x1024xf32>
    %36 = arith.maximumf %34, %35 : vector<8x1024xf32>
    %c1024_i32 = arith.constant 1024 : i32
    %37 = arith.muli %arg0, %c1024_i32 : i32
    %38 = tpu.assume_multiple %37, 128 : i32
    %c0_18 = arith.constant 0 : index
    %39 = arith.index_cast %38 : i32 to index
    %40 = vector.load %arg11[%c0_18, %39] : memref<16x1024xf32, #tpu.memory_space<vmem>>, vector<8x1024xf32>
    tpu.vector_store %arg11[%c0_18, %39], %33 {strides = array<i32>} : memref<16x1024xf32, #tpu.memory_space<vmem>>, vector<8x1024xf32>,
    %c8 = arith.constant 8 : index
    %41 = arith.index_cast %38 : i32 to index
    %42 = vector.load %arg11[%c8, %41] : memref<16x1024xf32, #tpu.memory_space<vmem>>, vector<8x1024xf32>
    tpu.vector_store %arg11[%c8, %41], %36 {strides = array<i32>} : memref<16x1024xf32, #tpu.memory_space<vmem>>, vector<8x1024xf32>,
    %c0_i32 = arith.constant 0 : i32
    %43 = arith.cmpi eq, %arg0, %c0_i32 : i32
    %44 = arith.extui %43 : i1 to i32
    %c0_i32_19 = arith.constant 0 : i32
    %45 = arith.cmpi ne, %44, %c0_i32_19 : i32
    scf.if %45 {
      %c0_20 = arith.constant 0 : index
      %c0_21 = arith.constant 0 : index
      %46 = vector.load %arg11[%c0_20, %c0_21] : memref<16x1024xf32, #tpu.memory_space<vmem>>, vector<16x1024xf32>
      %47 = vector.extract_strided_slice %46 {offsets = [0, 0], sizes = [8, 1024], strides = [1, 1]} : vector<16x1024xf32> to vector<8x1024xf32>
      %48 = vector.extract_strided_slice %46 {offsets = [8, 0], sizes = [8, 1024], strides = [1, 1]} : vector<16x1024xf32> to vector<8x1024xf32>
      %49 = arith.addf %47, %48 : vector<8x1024xf32>
      %cst_22 = arith.constant 5.000000e-01 : f32
      %50 = vector.broadcast %cst_22 : f32 to vector<8x1024xf32>
      %51 = arith.mulf %49, %50 : vector<8x1024xf32>
      %52 = arith.subf %48, %47 : vector<8x1024xf32>
      %cst_23 = arith.constant 5.000000e-01 : f32
      %53 = vector.broadcast %cst_23 : f32 to vector<8x1024xf32>
      %54 = arith.mulf %52, %53 : vector<8x1024xf32>
      %c0_24 = arith.constant 0 : index
      %c0_25 = arith.constant 0 : index
      %55 = vector.load %arg5[%c0_24, %c0_25] : memref<1024x128xf32, #tpu.memory_space<vmem>>, vector<1024x128xf32>
      %cst_26 = arith.constant dense<0.000000e+00> : vector<8x128xf32>
      %56 = tpu.matmul %51, %55, %cst_26 {dimension_numbers = #tpu.dot_dimension_numbers<[1], [0], [0], [1], [0, 0, 1, 1], [], []>} : vector<8x1024xf32>, vector<1024x128xf32>, vector<8x128xf32> -> vector<8x128xf32>
      %c0_27 = arith.constant 0 : index
      %c0_28 = arith.constant 0 : index
      %57 = vector.load %arg6[%c0_27, %c0_28] : memref<1x128xf32, #tpu.memory_space<vmem>>, vector<1x128xf32>
      %58 = vector.broadcast %57 : vector<1x128xf32> to vector<8x128xf32>
      %59 = arith.addf %56, %58 : vector<8x128xf32>
      %60 = math.absf %55 : vector<1024x128xf32>
      %cst_29 = arith.constant dense<0.000000e+00> : vector<8x128xf32>
      %61 = tpu.matmul %54, %60, %cst_29 {dimension_numbers = #tpu.dot_dimension_numbers<[1], [0], [0], [1], [0, 0, 1, 1], [], []>} : vector<8x1024xf32>, vector<1024x128xf32>, vector<8x128xf32> -> vector<8x128xf32>
      %62 = arith.subf %59, %61 : vector<8x128xf32>
      %cst_30 = arith.constant 0.000000e+00 : f32
      %63 = vector.broadcast %cst_30 : f32 to vector<8x128xf32>
      %64 = arith.maximumf %62, %63 : vector<8x128xf32>
      %65 = arith.addf %59, %61 : vector<8x128xf32>
      %cst_31 = arith.constant 0.000000e+00 : f32
      %66 = vector.broadcast %cst_31 : f32 to vector<8x128xf32>
      %67 = arith.maximumf %65, %66 : vector<8x128xf32>
      %68 = arith.addf %64, %67 : vector<8x128xf32>
      %cst_32 = arith.constant 5.000000e-01 : f32
      %69 = vector.broadcast %cst_32 : f32 to vector<8x128xf32>
      %70 = arith.mulf %68, %69 : vector<8x128xf32>
      %71 = arith.subf %67, %64 : vector<8x128xf32>
      %cst_33 = arith.constant 5.000000e-01 : f32
      %72 = vector.broadcast %cst_33 : f32 to vector<8x128xf32>
      %73 = arith.mulf %71, %72 : vector<8x128xf32>
      %c0_34 = arith.constant 0 : index
      %c0_35 = arith.constant 0 : index
      %74 = vector.load %arg7[%c0_34, %c0_35] : memref<128x128xf32, #tpu.memory_space<vmem>>, vector<128x128xf32>
      %cst_36 = arith.constant dense<0.000000e+00> : vector<8x128xf32>
      %75 = tpu.matmul %70, %74, %cst_36 {dimension_numbers = #tpu.dot_dimension_numbers<[1], [0], [0], [1], [0, 0, 1, 1], [], []>} : vector<8x128xf32>, vector<128x128xf32>, vector<8x128xf32> -> vector<8x128xf32>
      %c0_37 = arith.constant 0 : index
      %c0_38 = arith.constant 0 : index
      %76 = vector.load %arg8[%c0_37, %c0_38] : memref<1x128xf32, #tpu.memory_space<vmem>>, vector<1x128xf32>
      %77 = vector.broadcast %76 : vector<1x128xf32> to vector<8x128xf32>
      %78 = arith.addf %75, %77 : vector<8x128xf32>
      %79 = math.absf %74 : vector<128x128xf32>
      %cst_39 = arith.constant dense<0.000000e+00> : vector<8x128xf32>
      %80 = tpu.matmul %73, %79, %cst_39 {dimension_numbers = #tpu.dot_dimension_numbers<[1], [0], [0], [1], [0, 0, 1, 1], [], []>} : vector<8x128xf32>, vector<128x128xf32>, vector<8x128xf32> -> vector<8x128xf32>
      %81 = arith.subf %78, %80 : vector<8x128xf32>
      %c0_40 = arith.constant 0 : index
      %c0_41 = arith.constant 0 : index
      %82 = vector.load %arg9[%c0_40, %c0_41] : memref<8x128xf32, #tpu.memory_space<vmem>>, vector<8x128xf32>
      tpu.vector_store %arg9[%c0_40, %c0_41], %81 {strides = array<i32>} : memref<8x128xf32, #tpu.memory_space<vmem>>, vector<8x128xf32>,
      %83 = arith.addf %78, %80 : vector<8x128xf32>
      %c0_42 = arith.constant 0 : index
      %c0_43 = arith.constant 0 : index
      %84 = vector.load %arg10[%c0_42, %c0_43] : memref<8x128xf32, #tpu.memory_space<vmem>>, vector<8x128xf32>
      tpu.vector_store %arg10[%c0_42, %c0_43], %83 {strides = array<i32>} : memref<8x128xf32, #tpu.memory_space<vmem>>, vector<8x128xf32>,
    } else {
    }
    return
  }
  func.func @transform_0(%arg0: i32) -> (i32, i32) {
    %c0_i32 = arith.constant 0 : i32
    %c0_i32_0 = arith.constant 0 : i32
    %c0_i32_1 = arith.constant 0 : i32
    return %c0_i32, %c0_i32_0 : i32, i32
  }
  func.func @transform_1(%arg0: i32) -> (i32, i32) {
    %c0_i32 = arith.constant 0 : i32
    %c0_i32_0 = arith.constant 0 : i32
    %c0_i32_1 = arith.constant 0 : i32
    return %c0_i32, %c0_i32_0 : i32, i32
  }
  func.func @transform_2(%arg0: i32) -> (i32, i32) {
    %c0_i32 = arith.constant 0 : i32
    %c0_i32_0 = arith.constant 0 : i32
    return %c0_i32, %arg0 : i32, i32
  }
  func.func @transform_3(%arg0: i32) -> (i32, i32) {
    %c0_i32 = arith.constant 0 : i32
    %c0_i32_0 = arith.constant 0 : i32
    return %c0_i32, %arg0 : i32, i32
  }
  func.func @transform_4(%arg0: i32) -> (i32, i32) {
    %c0_i32 = arith.constant 0 : i32
    %c0_i32_0 = arith.constant 0 : i32
    %c0_i32_1 = arith.constant 0 : i32
    return %c0_i32, %c0_i32_0 : i32, i32
  }
  func.func @transform_5(%arg0: i32) -> (i32, i32) {
    %c0_i32 = arith.constant 0 : i32
    %c0_i32_0 = arith.constant 0 : i32
    %c0_i32_1 = arith.constant 0 : i32
    return %c0_i32, %c0_i32_0 : i32, i32
  }
  func.func @transform_6(%arg0: i32) -> (i32, i32) {
    %c0_i32 = arith.constant 0 : i32
    %c0_i32_0 = arith.constant 0 : i32
    %c0_i32_1 = arith.constant 0 : i32
    return %c0_i32, %c0_i32_0 : i32, i32
  }
  func.func @transform_7(%arg0: i32) -> (i32, i32) {
    %c0_i32 = arith.constant 0 : i32
    %c0_i32_0 = arith.constant 0 : i32
    %c0_i32_1 = arith.constant 0 : i32
    return %c0_i32, %c0_i32_0 : i32, i32
  }
  func.func @transform_8(%arg0: i32) -> (i32, i32) {
    %c0_i32 = arith.constant 0 : i32
    %c0_i32_0 = arith.constant 0 : i32
    %c0_i32_1 = arith.constant 0 : i32
    return %c0_i32, %c0_i32_0 : i32, i32
  }
  func.func @transform_9(%arg0: i32) -> (i32, i32) {
    %c0_i32 = arith.constant 0 : i32
    %c0_i32_0 = arith.constant 0 : i32
    %c0_i32_1 = arith.constant 0 : i32
    return %c0_i32, %c0_i32_0 : i32, i32
  }
}

</mosaic_0001>

<bundles_post_ra>
// kernel: forward.1
= control target key start
LH: loop header
LB: loop body
LE: loop exit
PB: predicated region body
PF: predicated region fallthrough
CT: control target
= control target key end

     0   :  { %15 = vsyncpa [#allocation4], 0  ;;  %s3812_s0 = inlined_call_operand.vmem [shape: f32[8,1], index: 0, kind: input, shape index: {}]   ;;  %s3813_s1 = inlined_call_operand.vmem [shape: f32[8,256], index: 1, kind: input, shape index: {}]   ;;  %s3814_s2 = inlined_call_operand.hbm [shape: f32[256,1024], index: 2, kind: input, shape index: {}]   ;;  %s3815_s3 = inlined_call_operand.vmem [shape: f32[1,1024], index: 3, kind: input, shape index: {}]   ;;  %s3816_s4 = inlined_call_operand.hbm [shape: f32[1024,128], index: 4, kind: input, shape index: {}]   ;;  %s3817_s5 = inlined_call_operand.vmem [shape: f32[1,128], index: 5, kind: input, shape index: {}]   ;;  %s3818_s6 = inlined_call_operand.hbm [shape: f32[128,128], index: 6, kind: input, shape index: {}]   ;;  %s3819_s7 = inlined_call_operand.vmem [shape: f32[1,128], index: 7, kind: input, shape index: {}]   ;;  %s3820_s8 = inlined_call_operand.vmem [shape: f32[8,128], index: 8, kind: output, shape index: {0}]   ;;  %s3821_s9 = inlined_call_operand.vmem [shape: f32[8,128], index: 9, kind: output, shape index: {1}]  }
   0x1   :  { %16 = vsyncpa [#allocation6], 0  ;;  %s3077_s30 = smov [#allocation5]  }
   0x2   :  { %s40_s10 = sshll.u32 %s3077_s30, 4  ;;  %s41_s10 = int_to_ptr.vmem [resolvable:$true] %s40_s10 }
   0x3   :  { %s3021_s11 = scalar_lea.vmem %s41_s10, 16384  ;;  %p3026_p1 = scmp.lt.s32.totalorder %s41_s10, %s41_s10 }
   0x4   :  { %p3022_p0 = scmp.ne.s32.totalorder %s41_s10, %s3021_s11  ;;  %p3027_p2 = scmp.lt.s32.totalorder %s3021_s11, %s3021_s11 }
   0x6   :  { %p3028_p3 = por %p3027_p2, %p3026_p1 }
   0x8   :  { %p3029_p4 = pnand %p3028_p3, %p3022_p0 }
   0xa   :  { %3032 = shalt.err (!%p3029_p4)
}
   0xb   :  { %s3078_s12 = smov 128   ;;  %s3079_s13 = smov 8  }
   0xc   :  { %46 = dma.hbm_to_vmem [thread:$0]  %s3816_s4, 16384, %s41_s10, [#allocation6], %s3078_s12, %s3078_s12, %s3079_s13  }
   0xd   :  { %s3080_s16 = smov [#allocation3]  }
   0xe   :  { %s26_s17 = sshll.u32 %s3080_s16, 4  ;;  %s27_s17 = int_to_ptr.vmem [resolvable:$true] %s26_s17 }
   0xf   :  { %s3041_s18 = scalar_lea.vmem %s27_s17, 32768  ;;  %p3046_p6 = scmp.lt.s32.totalorder %s27_s17, %s27_s17 }
  0x10   :  { %p3042_p5 = scmp.ne.s32.totalorder %s27_s17, %s3041_s18  ;;  %p3047_p7 = scmp.lt.s32.totalorder %s3041_s18, %s3041_s18 }
  0x12   :  { %p3048_p8 = por %p3047_p7, %p3046_p6 }
  0x14   :  { %p3049_p9 = pnand %p3048_p8, %p3042_p5 }
  0x16   :  { %3052 = shalt.err (!%p3049_p9)
}
  0x17   :  { %s3081_s19 = smov 1024   ;;  %s3082_s20 = smov 64  }
  0x18   :  { %32 = dma.hbm_to_vmem [thread:$0]  %s3814_s2, 32768, %s27_s17, [#allocation4], %s3081_s19, %s3081_s19, %s3082_s20  }
  0x19   :  { %s3083_s23 = smov [#allocation7]  }
  0x1a   :  { %s54_s24 = sshll.u32 %s3083_s23, 4  ;;  %s55_s24 = int_to_ptr.vmem [resolvable:$true] %s54_s24 }
  0x1b   :  { %s3061_s4 = scalar_lea.vmem %s55_s24, 2048  ;;  %p3066_p11 = scmp.lt.s32.totalorder %s55_s24, %s55_s24 }
  0x1c   :  { %p3062_p10 = scmp.ne.s32.totalorder %s55_s24, %s3061_s4  ;;  %p3067_p12 = scmp.lt.s32.totalorder %s3061_s4, %s3061_s4 }
  0x1e   :  { %p3068_p13 = por %p3067_p12, %p3066_p11 }
  0x20   :  { %p3069_p0 = pnand %p3068_p13, %p3062_p10 }
  0x22   :  { %3072 = shalt.err (!%p3069_p0)
}
  0x23   :  { %60 = dma.hbm_to_vmem [thread:$0]  %s3818_s6, 2048, %s55_s24, [#allocation6], %s3078_s12, %s3078_s12, %s3079_s13  }
  0x24   :  { %3073 = dma.done.wait [#allocation4], 32768  }
  0x25   :  { %3074 = vsyncadd [#allocation4], 4294934528 }
  0x26   :  { %3075 = dma.done.wait [#allocation6], 18432  }
  0x27   :  { %3076 = vsyncadd [#allocation6], 4294948864  ;;  %v3084_v0 = vmov 0   ;;  %v74_v1 = vld [vmem:[%s3812_s0] sm:$0xff]  ;;  %v226_v2 = vld [vmem:[#allocation3 + $0x3c8] sm:$0xff]  ;;  %vm3086_vm0 = vmmov 0  }
  0x28   :  { %2756 = vset.pattern.permute.xlu0 %v3084_v0  ;;  %v228_v3 = vld [vmem:[#allocation3 + $0x3d8] sm:$0xff]  ;;  %403 = vmatprep.subr.mxu0 %v226_v2  ;;  %v225_v4 = vld [vmem:[#allocation3 + $0x3c0] sm:$0xff]  ;;  %v227_v5 = vld [vmem:[#allocation3 + $0x3d0] sm:$0xff] }
  0x29   :  { %77 = vperm.xlu0 %2756, %v74_v1   ;;  %474 = vmatprep.subr.mxu1 %v228_v3  ;;  %v218_v6 = vld [vmem:[#allocation3 + $0x388] sm:$0xff]  ;;  %v220_v7 = vld [vmem:[#allocation3 + $0x398] sm:$0xff]  ;;  %v217_v8 = vld [vmem:[#allocation3 + $0x380] sm:$0xff] }
  0x2a   :  { %404 = vmatpush1.msra.mxu0 %v225_v4  ;;  %475 = vmatpush1.msra.mxu1 %v227_v5  ;;  %v219_v9 = vld [vmem:[#allocation3 + $0x390] sm:$0xff]  ;;  %v210_v10 = vld [vmem:[#allocation3 + $0x348] sm:$0xff]  ;;  %v212_v11 = vld [vmem:[#allocation3 + $0x358] sm:$0xff] }
  0x2b   :  { %405 = vmatprep.subr.mxu0 %v218_v6  ;;  %476 = vmatprep.subr.mxu1 %v220_v7  ;;  %v209_v12 = vld [vmem:[#allocation3 + $0x340] sm:$0xff]  ;;  %v211_v13 = vld [vmem:[#allocation3 + $0x350] sm:$0xff]  ;;  %v202_v14 = vld [vmem:[#allocation3 + $0x308] sm:$0xff] }
  0x2c   :  { %406 = vmatpush1.msra.mxu0 %v217_v8  ;;  %477 = vmatpush1.msra.mxu1 %v219_v9  ;;  %v204_v15 = vld [vmem:[#allocation3 + $0x318] sm:$0xff]  ;;  %v201_v16 = vld [vmem:[#allocation3 + $0x300] sm:$0xff]  ;;  %v203_v17 = vld [vmem:[#allocation3 + $0x310] sm:$0xff] }
  0x2d   :  { %407 = vmatprep.subr.mxu0 %v210_v10  ;;  %478 = vmatprep.subr.mxu1 %v212_v11  ;;  %v194_v18 = vld [vmem:[#allocation3 + $0x2c8] sm:$0xff]  ;;  %v196_v19 = vld [vmem:[#allocation3 + $0x2d8] sm:$0xff]  ;;  %v193_v20 = vld [vmem:[#allocation3 + $0x2c0] sm:$0xff] }
  0x2e   :  { %408 = vmatpush1.msra.mxu0 %v209_v12  ;;  %479 = vmatpush1.msra.mxu1 %v211_v13  ;;  %v195_v21 = vld [vmem:[#allocation3 + $0x2d0] sm:$0xff]  ;;  %v186_v22 = vld [vmem:[#allocation3 + $0x288] sm:$0xff]  ;;  %v188_v23 = vld [vmem:[#allocation3 + $0x298] sm:$0xff] }
  0x2f   :  { %409 = vmatprep.subr.mxu0 %v202_v14  ;;  %480 = vmatprep.subr.mxu1 %v204_v15  ;;  %v185_v24 = vld [vmem:[#allocation3 + $0x280] sm:$0xff]  ;;  %v187_v25 = vld [vmem:[#allocation3 + $0x290] sm:$0xff]  ;;  %v178_v26 = vld [vmem:[#allocation3 + $0x248] sm:$0xff] }
  0x30   :  { %410 = vmatpush1.msra.mxu0 %v201_v16  ;;  %481 = vmatpush1.msra.mxu1 %v203_v17  ;;  %v180_v27 = vld [vmem:[#allocation3 + $0x258] sm:$0xff]  ;;  %v177_v28 = vld [vmem:[#allocation3 + $0x240] sm:$0xff]  ;;  %v179_v29 = vld [vmem:[#allocation3 + $0x250] sm:$0xff] }
  0x31   :  { %411 = vmatprep.subr.mxu0 %v194_v18  ;;  %482 = vmatprep.subr.mxu1 %v196_v19  ;;  %v170_v30 = vld [vmem:[#allocation3 + $0x208] sm:$0xff]  ;;  %v172_v31 = vld [vmem:[#allocation3 + $0x218] sm:$0xff]  ;;  %v169_v32 = vld [vmem:[#allocation3 + $0x200] sm:$0xff] }
  0x32   :  { %412 = vmatpush1.msra.mxu0 %v193_v20  ;;  %483 = vmatpush1.msra.mxu1 %v195_v21  ;;  %v171_v33 = vld [vmem:[#allocation3 + $0x210] sm:$0xff]  ;;  %v162_v34 = vld [vmem:[#allocation3 + $0x1c8] sm:$0xff]  ;;  %v164_v35 = vld [vmem:[#allocation3 + $0x1d8] sm:$0xff] }
  0x33   :  { %413 = vmatprep.subr.mxu0 %v186_v22  ;;  %484 = vmatprep.subr.mxu1 %v188_v23  ;;  %v161_v36 = vld [vmem:[#allocation3 + $0x1c0] sm:$0xff]  ;;  %v163_v37 = vld [vmem:[#allocation3 + $0x1d0] sm:$0xff]  ;;  %v154_v38 = vld [vmem:[#allocation3 + $0x188] sm:$0xff] }
  0x34   :  { %414 = vmatpush1.msra.mxu0 %v185_v24  ;;  %485 = vmatpush1.msra.mxu1 %v187_v25  ;;  %v156_v39 = vld [vmem:[#allocation3 + $0x198] sm:$0xff]  ;;  %v153_v40 = vld [vmem:[#allocation3 + $0x180] sm:$0xff]  ;;  %v155_v41 = vld [vmem:[#allocation3 + $0x190] sm:$0xff] }
  0x35   :  { %415 = vmatprep.subr.mxu0 %v178_v26  ;;  %486 = vmatprep.subr.mxu1 %v180_v27  ;;  %v146_v42 = vld [vmem:[#allocation3 + $0x148] sm:$0xff]  ;;  %v148_v43 = vld [vmem:[#allocation3 + $0x158] sm:$0xff]  ;;  %v145_v44 = vld [vmem:[#allocation3 + $0x140] sm:$0xff] }
  0x36   :  { %416 = vmatpush1.msra.mxu0 %v177_v28  ;;  %487 = vmatpush1.msra.mxu1 %v179_v29  ;;  %v147_v45 = vld [vmem:[#allocation3 + $0x150] sm:$0xff]  ;;  %v138_v46 = vld [vmem:[#allocation3 + $0x108] sm:$0xff]  ;;  %v140_v47 = vld [vmem:[#allocation3 + $0x118] sm:$0xff] }
  0x37   :  { %417 = vmatprep.subr.mxu0 %v170_v30  ;;  %488 = vmatprep.subr.mxu1 %v172_v31  ;;  %v137_v48 = vld [vmem:[#allocation3 + $0x100] sm:$0xff]  ;;  %v139_v49 = vld [vmem:[#allocation3 + $0x110] sm:$0xff]  ;;  %v130_v50 = vld [vmem:[#allocation3 + $0xc8] sm:$0xff] }
  0x38   :  { %418 = vmatpush1.msra.mxu0 %v169_v32  ;;  %489 = vmatpush1.msra.mxu1 %v171_v33  ;;  %v132_v51 = vld [vmem:[#allocation3 + $0xd8] sm:$0xff]  ;;  %v129_v52 = vld [vmem:[#allocation3 + $0xc0] sm:$0xff]  ;;  %v131_v53 = vld [vmem:[#allocation3 + $0xd0] sm:$0xff] }
  0x39   :  { %419 = vmatprep.subr.mxu0 %v162_v34  ;;  %490 = vmatprep.subr.mxu1 %v164_v35  ;;  %v122_v54 = vld [vmem:[#allocation3 + $0x88] sm:$0xff]  ;;  %v124_v55 = vld [vmem:[#allocation3 + $0x98] sm:$0xff]  ;;  %v121_v56 = vld [vmem:[#allocation3 + $0x80] sm:$0xff] }
  0x3a   :  { %420 = vmatpush1.msra.mxu0 %v161_v36  ;;  %491 = vmatpush1.msra.mxu1 %v163_v37  ;;  %v123_v57 = vld [vmem:[#allocation3 + $0x90] sm:$0xff]  ;;  %v114_v58 = vld [vmem:[#allocation3 + $0x48] sm:$0xff]  ;;  %v116_v59 = vld [vmem:[#allocation3 + $0x58] sm:$0xff] }
  0x3b   :  { %421 = vmatprep.subr.mxu0 %v154_v38  ;;  %492 = vmatprep.subr.mxu1 %v156_v39  ;;  %v113_v60 = vld [vmem:[#allocation3 + $0x40] sm:$0xff]  ;;  %v115_v61 = vld [vmem:[#allocation3 + $0x50] sm:$0xff]  ;;  %v106_v62 = vld [vmem:[#allocation3 + $0x8] sm:$0xff] }
  0x3c   :  { %422 = vmatpush1.msra.mxu0 %v153_v40  ;;  %493 = vmatpush1.msra.mxu1 %v155_v41  ;;  %v108_v63 = vld [vmem:[#allocation3 + $0x18] sm:$0xff]  ;;  %v105_v0 = vld [vmem:[#allocation3] sm:$0xff]  ;;  %v107_v1 = vld [vmem:[#allocation3 + $0x10] sm:$0xff] }
  0x3d   :  { %423 = vmatprep.subr.mxu0 %v146_v42  ;;  %494 = vmatprep.subr.mxu1 %v148_v43  ;;  %v354_v2 = vld [vmem:[#allocation3 + $0x7c8] sm:$0xff]  ;;  %v356_v3 = vld [vmem:[#allocation3 + $0x7d8] sm:$0xff]  ;;  %v353_v4 = vld [vmem:[#allocation3 + $0x7c0] sm:$0xff] }
  0x3e   :  { %424 = vmatpush1.msra.mxu0 %v145_v44  ;;  %495 = vmatpush1.msra.mxu1 %v147_v45  ;;  %v355_v5 = vld [vmem:[#allocation3 + $0x7d0] sm:$0xff]  ;;  %v346_v6 = vld [vmem:[#allocation3 + $0x788] sm:$0xff]  ;;  %v348_v7 = vld [vmem:[#allocation3 + $0x798] sm:$0xff] }
  0x3f   :  { %425 = vmatprep.subr.mxu0 %v138_v46  ;;  %496 = vmatprep.subr.mxu1 %v140_v47  ;;  %v345_v8 = vld [vmem:[#allocation3 + $0x780] sm:$0xff]  ;;  %v347_v9 = vld [vmem:[#allocation3 + $0x790] sm:$0xff]  ;;  %v338_v10 = vld [vmem:[#allocation3 + $0x748] sm:$0xff] }
  0x40   :  { %426 = vmatpush1.msra.mxu0 %v137_v48  ;;  %497 = vmatpush1.msra.mxu1 %v139_v49  ;;  %v340_v11 = vld [vmem:[#allocation3 + $0x758] sm:$0xff]  ;;  %v337_v12 = vld [vmem:[#allocation3 + $0x740] sm:$0xff]  ;;  %v339_v13 = vld [vmem:[#allocation3 + $0x750] sm:$0xff] }
  0x41   :  { %427 = vmatprep.subr.mxu0 %v130_v50  ;;  %498 = vmatprep.subr.mxu1 %v132_v51  ;;  %v330_v14 = vld [vmem:[#allocation3 + $0x708] sm:$0xff]  ;;  %v332_v15 = vld [vmem:[#allocation3 + $0x718] sm:$0xff]  ;;  %v329_v16 = vld [vmem:[#allocation3 + $0x700] sm:$0xff] }
  0x42   :  { %428 = vmatpush1.msra.mxu0 %v129_v52  ;;  %499 = vmatpush1.msra.mxu1 %v131_v53  ;;  %v331_v17 = vld [vmem:[#allocation3 + $0x710] sm:$0xff]  ;;  %v322_v18 = vld [vmem:[#allocation3 + $0x6c8] sm:$0xff]  ;;  %v324_v19 = vld [vmem:[#allocation3 + $0x6d8] sm:$0xff] }
  0x43   :  { %429 = vmatprep.subr.mxu0 %v122_v54  ;;  %500 = vmatprep.subr.mxu1 %v124_v55  ;;  %v321_v20 = vld [vmem:[#allocation3 + $0x6c0] sm:$0xff]  ;;  %v323_v21 = vld [vmem:[#allocation3 + $0x6d0] sm:$0xff]  ;;  %v314_v22 = vld [vmem:[#allocation3 + $0x688] sm:$0xff] }
  0x44   :  { %430 = vmatpush1.msra.mxu0 %v121_v56  ;;  %501 = vmatpush1.msra.mxu1 %v123_v57  ;;  %v316_v23 = vld [vmem:[#allocation3 + $0x698] sm:$0xff]  ;;  %v313_v24 = vld [vmem:[#allocation3 + $0x680] sm:$0xff]  ;;  %v315_v25 = vld [vmem:[#allocation3 + $0x690] sm:$0xff] }
  0x45   :  { %431 = vmatprep.subr.mxu0 %v114_v58  ;;  %502 = vmatprep.subr.mxu1 %v116_v59  ;;  %v306_v26 = vld [vmem:[#allocation3 + $0x648] sm:$0xff]  ;;  %v308_v27 = vld [vmem:[#allocation3 + $0x658] sm:$0xff]  ;;  %v305_v28 = vld [vmem:[#allocation3 + $0x640] sm:$0xff] }
  0x46   :  { %432 = vmatpush1.msra.mxu0 %v113_v60  ;;  %503 = vmatpush1.msra.mxu1 %v115_v61  ;;  %v307_v29 = vld [vmem:[#allocation3 + $0x650] sm:$0xff]  ;;  %v298_v30 = vld [vmem:[#allocation3 + $0x608] sm:$0xff]  ;;  %v300_v31 = vld [vmem:[#allocation3 + $0x618] sm:$0xff] }
  0x47   :  { %433 = vmatprep.subr.mxu0 %v106_v62  ;;  %504 = vmatprep.subr.mxu1 %v108_v63  ;;  %v297_v32 = vld [vmem:[#allocation3 + $0x600] sm:$0xff]  ;;  %v299_v33 = vld [vmem:[#allocation3 + $0x610] sm:$0xff]  ;;  %v290_v34 = vld [vmem:[#allocation3 + $0x5c8] sm:$0xff] }
  0x48   :  { %434 = vmatpush1.msra.mxu0 %v105_v0  ;;  %505 = vmatpush1.msra.mxu1 %v107_v1  ;;  %v292_v35 = vld [vmem:[#allocation3 + $0x5d8] sm:$0xff]  ;;  %v289_v36 = vld [vmem:[#allocation3 + $0x5c0] sm:$0xff]  ;;  %v291_v37 = vld [vmem:[#allocation3 + $0x5d0] sm:$0xff] }
  0x49   :  { %435 = vmatprep.subr.mxu0 %v354_v2  ;;  %506 = vmatprep.subr.mxu1 %v356_v3  ;;  %v282_v38 = vld [vmem:[#allocation3 + $0x588] sm:$0xff]  ;;  %v284_v39 = vld [vmem:[#allocation3 + $0x598] sm:$0xff]  ;;  %v281_v40 = vld [vmem:[#allocation3 + $0x580] sm:$0xff] }
  0x4a   :  { %436 = vmatpush2.msra.mxu0 %v353_v4  ;;  %507 = vmatpush2.msra.mxu1 %v355_v5  ;;  %v283_v41 = vld [vmem:[#allocation3 + $0x590] sm:$0xff]  ;;  %v274_v42 = vld [vmem:[#allocation3 + $0x548] sm:$0xff]  ;;  %v276_v43 = vld [vmem:[#allocation3 + $0x558] sm:$0xff] }
  0x4b   :  { %437 = vmatprep.subr.mxu0 %v346_v6  ;;  %508 = vmatprep.subr.mxu1 %v348_v7  ;;  %v273_v44 = vld [vmem:[#allocation3 + $0x540] sm:$0xff]  ;;  %v275_v45 = vld [vmem:[#allocation3 + $0x550] sm:$0xff]  ;;  %v266_v46 = vld [vmem:[#allocation3 + $0x508] sm:$0xff] }
  0x4c   :  { %438 = vmatpush2.msra.mxu0 %v345_v8  ;;  %509 = vmatpush2.msra.mxu1 %v347_v9  ;;  %v268_v47 = vld [vmem:[#allocation3 + $0x518] sm:$0xff]  ;;  %v265_v48 = vld [vmem:[#allocation3 + $0x500] sm:$0xff]  ;;  %v267_v49 = vld [vmem:[#allocation3 + $0x510] sm:$0xff] }
  0x4d   :  { %439 = vmatprep.subr.mxu0 %v338_v10  ;;  %510 = vmatprep.subr.mxu1 %v340_v11  ;;  %v258_v50 = vld [vmem:[#allocation3 + $0x4c8] sm:$0xff]  ;;  %v260_v51 = vld [vmem:[#allocation3 + $0x4d8] sm:$0xff]  ;;  %v257_v52 = vld [vmem:[#allocation3 + $0x4c0] sm:$0xff] }
  0x4e   :  { %440 = vmatpush2.msra.mxu0 %v337_v12  ;;  %511 = vmatpush2.msra.mxu1 %v339_v13  ;;  %v259_v53 = vld [vmem:[#allocation3 + $0x4d0] sm:$0xff]  ;;  %v250_v54 = vld [vmem:[#allocation3 + $0x488] sm:$0xff]  ;;  %v252_v55 = vld [vmem:[#allocation3 + $0x498] sm:$0xff] }
  0x4f   :  { %441 = vmatprep.subr.mxu0 %v330_v14  ;;  %512 = vmatprep.subr.mxu1 %v332_v15  ;;  %v249_v56 = vld [vmem:[#allocation3 + $0x480] sm:$0xff]  ;;  %v251_v57 = vld [vmem:[#allocation3 + $0x490] sm:$0xff]  ;;  %v242_v58 = vld [vmem:[#allocation3 + $0x448] sm:$0xff] }
  0x50   :  { %442 = vmatpush2.msra.mxu0 %v329_v16  ;;  %513 = vmatpush2.msra.mxu1 %v331_v17  ;;  %v244_v59 = vld [vmem:[#allocation3 + $0x458] sm:$0xff]  ;;  %v241_v60 = vld [vmem:[#allocation3 + $0x440] sm:$0xff]  ;;  %v243_v61 = vld [vmem:[#allocation3 + $0x450] sm:$0xff] }
  0x51   :  { %443 = vmatprep.subr.mxu0 %v322_v18  ;;  %514 = vmatprep.subr.mxu1 %v324_v19  ;;  %v234_v62 = vld [vmem:[#allocation3 + $0x408] sm:$0xff]  ;;  %v236_v63 = vld [vmem:[#allocation3 + $0x418] sm:$0xff]  ;;  %v233_v0 = vld [vmem:[#allocation3 + $0x400] sm:$0xff] }
  0x52   :  { %444 = vmatpush2.msra.mxu0 %v321_v20  ;;  %515 = vmatpush2.msra.mxu1 %v323_v21  ;;  %v235_v1 = vld [vmem:[#allocation3 + $0x410] sm:$0xff]  ;;  %v230_v2 = vld [vmem:[#allocation3 + $0x3e8] sm:$0xff]  ;;  %v232_v3 = vld [vmem:[#allocation3 + $0x3f8] sm:$0xff] }
  0x53   :  { %445 = vmatprep.subr.mxu0 %v314_v22  ;;  %516 = vmatprep.subr.mxu1 %v316_v23  ;;  %v72_v4 = vld [vmem:[%s3813_s1] sm:$0xff]  ;;  %v73_v5 = vld [vmem:[%s3813_s1 + $0x8] sm:$0xff] }
  0x54   :  { %446 = vmatpush2.msra.mxu0 %v313_v24  ;;  %517 = vmatpush2.msra.mxu1 %v315_v25 }
  0x55   :  { %447 = vmatprep.subr.mxu0 %v306_v26  ;;  %518 = vmatprep.subr.mxu1 %v308_v27 }
  0x56   :  { %448 = vmatpush2.msra.mxu0 %v305_v28  ;;  %519 = vmatpush2.msra.mxu1 %v307_v29  ;;  %v229_v29 = vld [vmem:[#allocation3 + $0x3e0] sm:$0xff] }
  0x57   :  { %449 = vmatprep.subr.mxu0 %v298_v30  ;;  %520 = vmatprep.subr.mxu1 %v300_v31  ;;  %v231_v30 = vld [vmem:[#allocation3 + $0x3f0] sm:$0xff]  ;;  %v222_v31 = vld [vmem:[#allocation3 + $0x3a8] sm:$0xff] }
  0x58   :  { %450 = vmatpush2.msra.mxu0 %v297_v32  ;;  %521 = vmatpush2.msra.mxu1 %v299_v33  ;;  %v224_v32 = vld [vmem:[#allocation3 + $0x3b8] sm:$0xff]  ;;  %v221_v33 = vld [vmem:[#allocation3 + $0x3a0] sm:$0xff] }
  0x59   :  { %451 = vmatprep.subr.mxu0 %v290_v34  ;;  %522 = vmatprep.subr.mxu1 %v292_v35  ;;  %v223_v34 = vld [vmem:[#allocation3 + $0x3b0] sm:$0xff]  ;;  %v214_v35 = vld [vmem:[#allocation3 + $0x368] sm:$0xff] }
  0x5a   :  { %452 = vmatpush2.msra.mxu0 %v289_v36  ;;  %523 = vmatpush2.msra.mxu1 %v291_v37  ;;  %v216_v36 = vld [vmem:[#allocation3 + $0x378] sm:$0xff]  ;;  %v213_v37 = vld [vmem:[#allocation3 + $0x360] sm:$0xff] }
  0x5b   :  { %453 = vmatprep.subr.mxu0 %v282_v38  ;;  %524 = vmatprep.subr.mxu1 %v284_v39  ;;  %v215_v38 = vld [vmem:[#allocation3 + $0x370] sm:$0xff]  ;;  %v206_v39 = vld [vmem:[#allocation3 + $0x328] sm:$0xff] }
  0x5c   :  { %454 = vmatpush2.msra.mxu0 %v281_v40  ;;  %525 = vmatpush2.msra.mxu1 %v283_v41  ;;  %v208_v40 = vld [vmem:[#allocation3 + $0x338] sm:$0xff]  ;;  %v205_v41 = vld [vmem:[#allocation3 + $0x320] sm:$0xff] }
  0x5d   :  { %455 = vmatprep.subr.mxu0 %v274_v42  ;;  %526 = vmatprep.subr.mxu1 %v276_v43  ;;  %v207_v42 = vld [vmem:[#allocation3 + $0x330] sm:$0xff]  ;;  %v198_v43 = vld [vmem:[#allocation3 + $0x2e8] sm:$0xff] }
  0x5e   :  { %456 = vmatpush2.msra.mxu0 %v273_v44  ;;  %527 = vmatpush2.msra.mxu1 %v275_v45  ;;  %v200_v44 = vld [vmem:[#allocation3 + $0x2f8] sm:$0xff]  ;;  %v197_v45 = vld [vmem:[#allocation3 + $0x2e0] sm:$0xff] }
  0x5f   :  { %457 = vmatprep.subr.mxu0 %v266_v46  ;;  %528 = vmatprep.subr.mxu1 %v268_v47  ;;  %v199_v46 = vld [vmem:[#allocation3 + $0x2f0] sm:$0xff]  ;;  %v190_v47 = vld [vmem:[#allocation3 + $0x2a8] sm:$0xff] }
  0x60   :  { %458 = vmatpush2.msra.mxu0 %v265_v48  ;;  %529 = vmatpush2.msra.mxu1 %v267_v49  ;;  %v192_v48 = vld [vmem:[#allocation3 + $0x2b8] sm:$0xff]  ;;  %v189_v49 = vld [vmem:[#allocation3 + $0x2a0] sm:$0xff] }
  0x61   :  { %459 = vmatprep.subr.mxu0 %v258_v50  ;;  %530 = vmatprep.subr.mxu1 %v260_v51  ;;  %v191_v50 = vld [vmem:[#allocation3 + $0x2b0] sm:$0xff]  ;;  %v182_v51 = vld [vmem:[#allocation3 + $0x268] sm:$0xff] }
  0x62   :  { %460 = vmatpush2.msra.mxu0 %v257_v52  ;;  %531 = vmatpush2.msra.mxu1 %v259_v53  ;;  %v184_v52 = vld [vmem:[#allocation3 + $0x278] sm:$0xff]  ;;  %v181_v53 = vld [vmem:[#allocation3 + $0x260] sm:$0xff] }
  0x63   :  { %461 = vmatprep.subr.mxu0 %v250_v54  ;;  %532 = vmatprep.subr.mxu1 %v252_v55  ;;  %v183_v54 = vld [vmem:[#allocation3 + $0x270] sm:$0xff]  ;;  %v174_v55 = vld [vmem:[#allocation3 + $0x228] sm:$0xff] }
  0x64   :  { %462 = vmatpush2.msra.mxu0 %v249_v56  ;;  %533 = vmatpush2.msra.mxu1 %v251_v57  ;;  %v176_v56 = vld [vmem:[#allocation3 + $0x238] sm:$0xff]  ;;  %v173_v57 = vld [vmem:[#allocation3 + $0x220] sm:$0xff] }
  0x65   :  { %463 = vmatprep.subr.mxu0 %v242_v58  ;;  %534 = vmatprep.subr.mxu1 %v244_v59  ;;  %v175_v58 = vld [vmem:[#allocation3 + $0x230] sm:$0xff]  ;;  %v166_v59 = vld [vmem:[#allocation3 + $0x1e8] sm:$0xff] }
  0x66   :  { %464 = vmatpush2.msra.mxu0 %v241_v60  ;;  %535 = vmatpush2.msra.mxu1 %v243_v61  ;;  %v168_v60 = vld [vmem:[#allocation3 + $0x1f8] sm:$0xff]  ;;  %v165_v61 = vld [vmem:[#allocation3 + $0x1e0] sm:$0xff] }
  0x67   :  { %465 = vmatprep.subr.mxu0 %v234_v62  ;;  %536 = vmatprep.subr.mxu1 %v236_v63  ;;  %v167_v62 = vld [vmem:[#allocation3 + $0x1f0] sm:$0xff]  ;;  %v158_v63 = vld [vmem:[#allocation3 + $0x1a8] sm:$0xff] }
  0x68   :  { %466 = vmatpush2.msra.mxu0 %v233_v0  ;;  %537 = vmatpush2.msra.mxu1 %v235_v1  ;;  %v160_v0 = vld [vmem:[#allocation3 + $0x1b8] sm:$0xff]  ;;  %v157_v1 = vld [vmem:[#allocation3 + $0x1a0] sm:$0xff] }
  0x69   :  { %545 = vmatprep.subr.mxu0 %v230_v2  ;;  %616 = vmatprep.subr.mxu1 %v232_v3  ;;  %v159_v2 = vld [vmem:[#allocation3 + $0x1b0] sm:$0xff]  ;;  %v150_v3 = vld [vmem:[#allocation3 + $0x168] sm:$0xff] }
  0xa4   :  { %v78_v6 = vpop.permute.xlu0 %77 }
  0xa5   :  { %v80_v7 = vsub.f32 %v72_v4, %v78_v6  ;;  %v81_v8 = vsub.f32 %v73_v5, %v78_v6  ;;  %v86_v9 = vadd.f32 %v78_v6, %v72_v4  ;;  %v87_v10 = vadd.f32 %v78_v6, %v73_v5  ;;  %v152_v4 = vld [vmem:[#allocation3 + $0x178] sm:$0xff]  ;;  %v149_v5 = vld [vmem:[#allocation3 + $0x160] sm:$0xff]  ;;  %v151_v6 = vld [vmem:[#allocation3 + $0x170] sm:$0xff] }
  0xa7   :  { %v82_v11 = vmax.f32 %v80_v7, 0.0  ;;  %v83_v12 = vmax.f32 %v81_v8, 0.0  ;;  %v88_v13 = vmax.f32 %v86_v9, 0.0  ;;  %v89_v14 = vmax.f32 %v87_v10, 0.0  ;;  %v142_v7 = vld [vmem:[#allocation3 + $0x128] sm:$0xff]  ;;  %v144_v8 = vld [vmem:[#allocation3 + $0x138] sm:$0xff] }
  0xa8   :  { %v141_v9 = vld [vmem:[#allocation3 + $0x120] sm:$0xff]  ;;  %v143_v10 = vld [vmem:[#allocation3 + $0x130] sm:$0xff] }
  0xa9   :  { %v84_v15 = vmin.f32 %v82_v11, 1.0  ;;  %v85_v16 = vmin.f32 %v83_v12, 1.0  ;;  %v90_v17 = vmin.f32 %v88_v13, 1.0  ;;  %v91_v18 = vmin.f32 %v89_v14, 1.0  ;;  %v134_v11 = vld [vmem:[#allocation3 + $0xe8] sm:$0xff]  ;;  %v136_v12 = vld [vmem:[#allocation3 + $0xf8] sm:$0xff] }
  0xaa   :  { %v133_v13 = vld [vmem:[#allocation3 + $0xe0] sm:$0xff]  ;;  %v135_v14 = vld [vmem:[#allocation3 + $0xf0] sm:$0xff] }
  0xab   :  { %v92_v19 = vadd.f32 %v90_v17, %v84_v15  ;;  %v93_v20 = vadd.f32 %v91_v18, %v85_v16  ;;  %v3155_v21 = vsub.f32 %v90_v17, %v84_v15  ;;  %v3157_v22 = vsub.f32 %v91_v18, %v85_v16  ;;  %v126_v15 = vld [vmem:[#allocation3 + $0xa8] sm:$0xff]  ;;  %v128_v16 = vld [vmem:[#allocation3 + $0xb8] sm:$0xff]  ;;  %v125_v17 = vld [vmem:[#allocation3 + $0xa0] sm:$0xff] }
  0xac   :  { %v127_v18 = vld [vmem:[#allocation3 + $0xb0] sm:$0xff] }
  0xad   :  { %v94_v23 = vmul.f32 0.5, %v92_v19  ;;  %v95_v24 = vmul.f32 0.5, %v93_v20  ;;  %v118_v19 = vld [vmem:[#allocation3 + $0x68] sm:$0xff]  ;;  %v120_v20 = vld [vmem:[#allocation3 + $0x78] sm:$0xff] }
  0xaf   :  { %v2358_v25 = vadd.f32 -0.1307, %v94_v23  ;;  %v2359_v26 = vadd.f32 -0.1307, %v95_v24  ;;  %v117_v23 = vld [vmem:[#allocation3 + $0x60] sm:$0xff]  ;;  %v119_v24 = vld [vmem:[#allocation3 + $0x70] sm:$0xff] }
  0xb1   :  { %v100_v27 = vmul.f32 3.2456996, %v2359_v26  ;;  %v3159_v28 = vmul.f32 3.2456996, %v2358_v25  ;;  %v110_v25 = vld [vmem:[#allocation3 + $0x28] sm:$0xff]  ;;  %v112_v26 = vld [vmem:[#allocation3 + $0x38] sm:$0xff] }
  0xb3   :  { %467 = vmatprep.mubr.f32.mxu0 %v100_v27  ;;  %538 = vmatprep.mubr.f32.mxu1 %v100_v27 }
  0xb4   :  { %468 = vmatmul.mubr.f32.vlgmr.msra.gmra.mxu0 %v3159_v28  ;;  %539 = vmatmul.mubr.f32.vlgmr.msra.gmra.mxu1 %v3159_v28 }
  0xb5   :  { %546 = vmatpush1.msra.mxu0 %v229_v29  ;;  %617 = vmatpush1.msra.mxu1 %v231_v30  ;;  %v111_v29 = vld [vmem:[#allocation3 + $0x30] sm:$0xff]  ;;  %v358_v30 = vld [vmem:[#allocation3 + $0x7e8] sm:$0xff] }
  0xb6   :  { %547 = vmatprep.subr.mxu0 %v222_v31  ;;  %609 = vmatprep.mubr.f32.mxu0 %v100_v27  ;;  %v360_v31 = vld [vmem:[#allocation3 + $0x7f8] sm:$0xff] }
  0xb7   :  { %618 = vmatprep.subr.mxu1 %v224_v32  ;;  %680 = vmatprep.mubr.f32.mxu1 %v100_v27  ;;  %v109_v27 = vld [vmem:[#allocation3 + $0x20] sm:$0xff] }
  0xb8   :  { %548 = vmatpush1.msra.mxu0 %v221_v33  ;;  %619 = vmatpush1.msra.mxu1 %v223_v34  ;;  %v357_v32 = vld [vmem:[#allocation3 + $0x7e0] sm:$0xff]  ;;  %v359_v33 = vld [vmem:[#allocation3 + $0x7f0] sm:$0xff]  ;;  %v350_v34 = vld [vmem:[#allocation3 + $0x7a8] sm:$0xff] }
  0xb9   :  { %549 = vmatprep.subr.mxu0 %v214_v35  ;;  %620 = vmatprep.subr.mxu1 %v216_v36  ;;  %v352_v35 = vld [vmem:[#allocation3 + $0x7b8] sm:$0xff]  ;;  %v349_v36 = vld [vmem:[#allocation3 + $0x7a0] sm:$0xff] }
  0xba   :  { %550 = vmatpush1.msra.mxu0 %v213_v37  ;;  %621 = vmatpush1.msra.mxu1 %v215_v38  ;;  %v351_v37 = vld [vmem:[#allocation3 + $0x7b0] sm:$0xff]  ;;  %v342_v38 = vld [vmem:[#allocation3 + $0x768] sm:$0xff] }
  0xbb   :  { %551 = vmatprep.subr.mxu0 %v206_v39  ;;  %622 = vmatprep.subr.mxu1 %v208_v40  ;;  %v344_v39 = vld [vmem:[#allocation3 + $0x778] sm:$0xff]  ;;  %v341_v40 = vld [vmem:[#allocation3 + $0x760] sm:$0xff] }
  0xbc   :  { %552 = vmatpush1.msra.mxu0 %v205_v41  ;;  %623 = vmatpush1.msra.mxu1 %v207_v42  ;;  %v343_v41 = vld [vmem:[#allocation3 + $0x770] sm:$0xff]  ;;  %v334_v42 = vld [vmem:[#allocation3 + $0x728] sm:$0xff] }
  0xbd   :  { %553 = vmatprep.subr.mxu0 %v198_v43  ;;  %624 = vmatprep.subr.mxu1 %v200_v44  ;;  %v336_v43 = vld [vmem:[#allocation3 + $0x738] sm:$0xff]  ;;  %v333_v44 = vld [vmem:[#allocation3 + $0x720] sm:$0xff] }
  0xbe   :  { %554 = vmatpush1.msra.mxu0 %v197_v45  ;;  %625 = vmatpush1.msra.mxu1 %v199_v46  ;;  %v335_v45 = vld [vmem:[#allocation3 + $0x730] sm:$0xff]  ;;  %v326_v46 = vld [vmem:[#allocation3 + $0x6e8] sm:$0xff] }
  0xbf   :  { %555 = vmatprep.subr.mxu0 %v190_v47  ;;  %626 = vmatprep.subr.mxu1 %v192_v48  ;;  %v328_v47 = vld [vmem:[#allocation3 + $0x6f8] sm:$0xff]  ;;  %v325_v48 = vld [vmem:[#allocation3 + $0x6e0] sm:$0xff] }
  0xc0   :  { %556 = vmatpush1.msra.mxu0 %v189_v49  ;;  %627 = vmatpush1.msra.mxu1 %v191_v50  ;;  %v327_v49 = vld [vmem:[#allocation3 + $0x6f0] sm:$0xff]  ;;  %v318_v50 = vld [vmem:[#allocation3 + $0x6a8] sm:$0xff] }
  0xc1   :  { %557 = vmatprep.subr.mxu0 %v182_v51  ;;  %628 = vmatprep.subr.mxu1 %v184_v52  ;;  %v320_v51 = vld [vmem:[#allocation3 + $0x6b8] sm:$0xff]  ;;  %v317_v52 = vld [vmem:[#allocation3 + $0x6a0] sm:$0xff] }
  0xc2   :  { %558 = vmatpush1.msra.mxu0 %v181_v53  ;;  %629 = vmatpush1.msra.mxu1 %v183_v54  ;;  %v319_v53 = vld [vmem:[#allocation3 + $0x6b0] sm:$0xff]  ;;  %v310_v54 = vld [vmem:[#allocation3 + $0x668] sm:$0xff] }
  0xc3   :  { %559 = vmatprep.subr.mxu0 %v174_v55  ;;  %630 = vmatprep.subr.mxu1 %v176_v56  ;;  %v312_v55 = vld [vmem:[#allocation3 + $0x678] sm:$0xff]  ;;  %v309_v56 = vld [vmem:[#allocation3 + $0x660] sm:$0xff] }
  0xc4   :  { %560 = vmatpush1.msra.mxu0 %v173_v57  ;;  %631 = vmatpush1.msra.mxu1 %v175_v58  ;;  %v311_v57 = vld [vmem:[#allocation3 + $0x670] sm:$0xff]  ;;  %v302_v58 = vld [vmem:[#allocation3 + $0x628] sm:$0xff] }
  0xc5   :  { %561 = vmatprep.subr.mxu0 %v166_v59  ;;  %632 = vmatprep.subr.mxu1 %v168_v60  ;;  %v304_v59 = vld [vmem:[#allocation3 + $0x638] sm:$0xff]  ;;  %v301_v60 = vld [vmem:[#allocation3 + $0x620] sm:$0xff] }
  0xc6   :  { %562 = vmatpush1.msra.mxu0 %v165_v61  ;;  %633 = vmatpush1.msra.mxu1 %v167_v62  ;;  %v303_v61 = vld [vmem:[#allocation3 + $0x630] sm:$0xff]  ;;  %v294_v62 = vld [vmem:[#allocation3 + $0x5e8] sm:$0xff] }
  0xc7   :  { %563 = vmatprep.subr.mxu0 %v158_v63  ;;  %634 = vmatprep.subr.mxu1 %v160_v0  ;;  %v296_v63 = vld [vmem:[#allocation3 + $0x5f8] sm:$0xff]  ;;  %v293_v0 = vld [vmem:[#allocation3 + $0x5e0] sm:$0xff] }
  0xc8   :  { %564 = vmatpush1.msra.mxu0 %v157_v1  ;;  %635 = vmatpush1.msra.mxu1 %v159_v2  ;;  %v295_v1 = vld [vmem:[#allocation3 + $0x5f0] sm:$0xff]  ;;  %v286_v2 = vld [vmem:[#allocation3 + $0x5a8] sm:$0xff] }
  0xc9   :  { %565 = vmatprep.subr.mxu0 %v150_v3  ;;  %636 = vmatprep.subr.mxu1 %v152_v4  ;;  %v288_v3 = vld [vmem:[#allocation3 + $0x5b8] sm:$0xff]  ;;  %v285_v4 = vld [vmem:[#allocation3 + $0x5a0] sm:$0xff] }
  0xca   :  { %566 = vmatpush1.msra.mxu0 %v149_v5  ;;  %637 = vmatpush1.msra.mxu1 %v151_v6  ;;  %v287_v5 = vld [vmem:[#allocation3 + $0x5b0] sm:$0xff]  ;;  %v278_v6 = vld [vmem:[#allocation3 + $0x568] sm:$0xff] }
  0xcb   :  { %567 = vmatprep.subr.mxu0 %v142_v7  ;;  %638 = vmatprep.subr.mxu1 %v144_v8  ;;  %v280_v7 = vld [vmem:[#allocation3 + $0x578] sm:$0xff]  ;;  %v277_v8 = vld [vmem:[#allocation3 + $0x560] sm:$0xff] }
  0xcc   :  { %568 = vmatpush1.msra.mxu0 %v141_v9  ;;  %639 = vmatpush1.msra.mxu1 %v143_v10  ;;  %v279_v9 = vld [vmem:[#allocation3 + $0x570] sm:$0xff]  ;;  %v270_v10 = vld [vmem:[#allocation3 + $0x528] sm:$0xff] }
  0xcd   :  { %569 = vmatprep.subr.mxu0 %v134_v11  ;;  %640 = vmatprep.subr.mxu1 %v136_v12  ;;  %v272_v11 = vld [vmem:[#allocation3 + $0x538] sm:$0xff]  ;;  %v269_v12 = vld [vmem:[#allocation3 + $0x520] sm:$0xff] }
  0xce   :  { %570 = vmatpush1.msra.mxu0 %v133_v13  ;;  %641 = vmatpush1.msra.mxu1 %v135_v14  ;;  %v271_v13 = vld [vmem:[#allocation3 + $0x530] sm:$0xff]  ;;  %v262_v14 = vld [vmem:[#allocation3 + $0x4e8] sm:$0xff] }
  0xcf   :  { %571 = vmatprep.subr.mxu0 %v126_v15  ;;  %642 = vmatprep.subr.mxu1 %v128_v16  ;;  %v264_v15 = vld [vmem:[#allocation3 + $0x4f8] sm:$0xff]  ;;  %v261_v16 = vld [vmem:[#allocation3 + $0x4e0] sm:$0xff] }
  0xd0   :  { %572 = vmatpush1.msra.mxu0 %v125_v17  ;;  %643 = vmatpush1.msra.mxu1 %v127_v18  ;;  %v263_v17 = vld [vmem:[#allocation3 + $0x4f0] sm:$0xff]  ;;  %v254_v18 = vld [vmem:[#allocation3 + $0x4a8] sm:$0xff] }
  0xd1   :  { %573 = vmatprep.subr.mxu0 %v118_v19  ;;  %644 = vmatprep.subr.mxu1 %v120_v20  ;;  %v256_v19 = vld [vmem:[#allocation3 + $0x4b8] sm:$0xff]  ;;  %v253_v20 = vld [vmem:[#allocation3 + $0x4a0] sm:$0xff] }
  0xd2   :  { %574 = vmatpush1.msra.mxu0 %v117_v23  ;;  %645 = vmatpush1.msra.mxu1 %v119_v24  ;;  %v255_v23 = vld [vmem:[#allocation3 + $0x4b0] sm:$0xff]  ;;  %v246_v24 = vld [vmem:[#allocation3 + $0x468] sm:$0xff] }
  0xd3   :  { %575 = vmatprep.subr.mxu0 %v110_v25  ;;  %646 = vmatprep.subr.mxu1 %v112_v26  ;;  %v248_v25 = vld [vmem:[#allocation3 + $0x478] sm:$0xff]  ;;  %v245_v26 = vld [vmem:[#allocation3 + $0x460] sm:$0xff] }
  0xd4   :  { %576 = vmatpush1.msra.mxu0 %v109_v27  ;;  %647 = vmatpush1.msra.mxu1 %v111_v29  ;;  %v247_v27 = vld [vmem:[#allocation3 + $0x470] sm:$0xff]  ;;  %v238_v29 = vld [vmem:[#allocation3 + $0x428] sm:$0xff] }
  0xd5   :  { %577 = vmatprep.subr.mxu0 %v358_v30  ;;  %648 = vmatprep.subr.mxu1 %v360_v31  ;;  %v240_v30 = vld [vmem:[#allocation3 + $0x438] sm:$0xff]  ;;  %v237_v31 = vld [vmem:[#allocation3 + $0x420] sm:$0xff] }
  0xd6   :  { %578 = vmatpush2.msra.mxu0 %v357_v32  ;;  %649 = vmatpush2.msra.mxu1 %v359_v33  ;;  %v239_v32 = vld [vmem:[#allocation3 + $0x430] sm:$0xff]  ;;  %v2757_v33 = vld [vmem:[#allocation3 + $0x3c8] sm:$0xff] }
  0xd7   :  { %579 = vmatprep.subr.mxu0 %v350_v34  ;;  %650 = vmatprep.subr.mxu1 %v352_v35  ;;  %v808_v34 = vand.u32 2147483647, %v2757_v33  ;;  %v2758_v35 = vld [vmem:[#allocation3 + $0x3d8] sm:$0xff]  ;;  %v2788_v33 = vld [vmem:[#allocation3 + $0x210] sm:$0xff] }
  0xd8   :  { %580 = vmatpush2.msra.mxu0 %v349_v36  ;;  %651 = vmatpush2.msra.mxu1 %v351_v37  ;;  %v810_v36 = vand.u32 2147483647, %v2758_v35  ;;  %v2759_v37 = vld [vmem:[#allocation3 + $0x3c0] sm:$0xff]  ;;  %v2789_v35 = vld [vmem:[#allocation3 + $0x1c8] sm:$0xff] }
  0xd9   :  { %581 = vmatprep.subr.mxu0 %v342_v38  ;;  %652 = vmatprep.subr.mxu1 %v344_v39  ;;  %v807_v38 = vand.u32 2147483647, %v2759_v37  ;;  %v2760_v39 = vld [vmem:[#allocation3 + $0x3d0] sm:$0xff]  ;;  %v2790_v37 = vld [vmem:[#allocation3 + $0x1d8] sm:$0xff] }
  0xda   :  { %582 = vmatpush2.msra.mxu0 %v341_v40  ;;  %653 = vmatpush2.msra.mxu1 %v343_v41  ;;  %v809_v40 = vand.u32 2147483647, %v2760_v39  ;;  %v2761_v41 = vld [vmem:[#allocation3 + $0x388] sm:$0xff]  ;;  %v2791_v39 = vld [vmem:[#allocation3 + $0x1c0] sm:$0xff] }
  0xdb   :  { %583 = vmatprep.subr.mxu0 %v334_v42  ;;  %654 = vmatprep.subr.mxu1 %v336_v43  ;;  %v800_v42 = vand.u32 2147483647, %v2761_v41  ;;  %v2762_v43 = vld [vmem:[#allocation3 + $0x398] sm:$0xff]  ;;  %v2792_v41 = vld [vmem:[#allocation3 + $0x1d0] sm:$0xff] }
  0xdc   :  { %584 = vmatpush2.msra.mxu0 %v333_v44  ;;  %655 = vmatpush2.msra.mxu1 %v335_v45  ;;  %v802_v44 = vand.u32 2147483647, %v2762_v43  ;;  %v3164_v45 = vmul.f32 1.6228497, %v3157_v22  ;;  %v2793_v43 = vld [vmem:[#allocation3 + $0x188] sm:$0xff] }
  0xdd   :  { %585 = vmatprep.subr.mxu0 %v326_v46  ;;  %656 = vmatprep.subr.mxu1 %v328_v47  ;;  %v2763_v46 = vld [vmem:[#allocation3 + $0x380] sm:$0xff] }
  0xde   :  { %586 = vmatpush2.msra.mxu0 %v325_v48  ;;  %657 = vmatpush2.msra.mxu1 %v327_v49  ;;  %v799_v47 = vand.u32 2147483647, %v2763_v46  ;;  %v2764_v48 = vld [vmem:[#allocation3 + $0x390] sm:$0xff]  ;;  %v2794_v46 = vld [vmem:[#allocation3 + $0x198] sm:$0xff] }
  0xdf   :  { %587 = vmatprep.subr.mxu0 %v318_v50  ;;  %658 = vmatprep.subr.mxu1 %v320_v51  ;;  %v801_v49 = vand.u32 2147483647, %v2764_v48  ;;  %v2765_v50 = vld [vmem:[#allocation3 + $0x348] sm:$0xff]  ;;  %v2795_v48 = vld [vmem:[#allocation3 + $0x180] sm:$0xff] }
  0xe0   :  { %588 = vmatpush2.msra.mxu0 %v317_v52  ;;  %659 = vmatpush2.msra.mxu1 %v319_v53  ;;  %v792_v51 = vand.u32 2147483647, %v2765_v50  ;;  %v2766_v52 = vld [vmem:[#allocation3 + $0x358] sm:$0xff]  ;;  %v2796_v50 = vld [vmem:[#allocation3 + $0x190] sm:$0xff] }
  0xe1   :  { %589 = vmatprep.subr.mxu0 %v310_v54  ;;  %660 = vmatprep.subr.mxu1 %v312_v55  ;;  %v794_v53 = vand.u32 2147483647, %v2766_v52  ;;  %v2767_v54 = vld [vmem:[#allocation3 + $0x340] sm:$0xff]  ;;  %v2768_v55 = vld [vmem:[#allocation3 + $0x350] sm:$0xff]  ;;  %v2797_v52 = vld [vmem:[#allocation3 + $0x148] sm:$0xff] }
  0xe2   :  { %590 = vmatpush2.msra.mxu0 %v309_v56  ;;  %661 = vmatpush2.msra.mxu1 %v311_v57  ;;  %v791_v22 = vand.u32 2147483647, %v2767_v54  ;;  %v793_v56 = vand.u32 2147483647, %v2768_v55  ;;  %v2798_v54 = vld [vmem:[#allocation3 + $0x158] sm:$0xff]  ;;  %v2799_v55 = vld [vmem:[#allocation3 + $0x140] sm:$0xff] }
  0xe3   :  { %591 = vmatprep.subr.mxu0 %v302_v58  ;;  %662 = vmatprep.subr.mxu1 %v304_v59  ;;  %v2770_v58 = vld [vmem:[#allocation3 + $0x318] sm:$0xff] }
  0xe4   :  { %592 = vmatpush2.msra.mxu0 %v301_v60  ;;  %663 = vmatpush2.msra.mxu1 %v303_v61  ;;  %v786_v59 = vand.u32 2147483647, %v2770_v58  ;;  %v2771_v60 = vld [vmem:[#allocation3 + $0x300] sm:$0xff]  ;;  %v2801_v58 = vld [vmem:[#allocation3 + $0x108] sm:$0xff] }
  0xe5   :  { %593 = vmatprep.subr.mxu0 %v294_v62  ;;  %664 = vmatprep.subr.mxu1 %v296_v63  ;;  %v783_v61 = vand.u32 2147483647, %v2771_v60  ;;  %v2772_v62 = vld [vmem:[#allocation3 + $0x310] sm:$0xff]  ;;  %v2802_v60 = vld [vmem:[#allocation3 + $0x118] sm:$0xff] }
  0xe6   :  { %594 = vmatpush2.msra.mxu0 %v293_v0  ;;  %665 = vmatpush2.msra.mxu1 %v295_v1  ;;  %v785_v63 = vand.u32 2147483647, %v2772_v62  ;;  %v2773_v0 = vld [vmem:[#allocation3 + $0x2c8] sm:$0xff]  ;;  %v2803_v62 = vld [vmem:[#allocation3 + $0x100] sm:$0xff] }
  0xe7   :  { %595 = vmatprep.subr.mxu0 %v286_v2  ;;  %666 = vmatprep.subr.mxu1 %v288_v3  ;;  %v776_v1 = vand.u32 2147483647, %v2773_v0  ;;  %v2774_v2 = vld [vmem:[#allocation3 + $0x2d8] sm:$0xff]  ;;  %v2804_v0 = vld [vmem:[#allocation3 + $0x110] sm:$0xff] }
  0xe8   :  { %596 = vmatpush2.msra.mxu0 %v285_v4  ;;  %667 = vmatpush2.msra.mxu1 %v287_v5  ;;  %v778_v3 = vand.u32 2147483647, %v2774_v2  ;;  %v2775_v4 = vld [vmem:[#allocation3 + $0x2c0] sm:$0xff]  ;;  %v2805_v2 = vld [vmem:[#allocation3 + $0xc8] sm:$0xff] }
  0xe9   :  { %597 = vmatprep.subr.mxu0 %v278_v6  ;;  %668 = vmatprep.subr.mxu1 %v280_v7  ;;  %v775_v5 = vand.u32 2147483647, %v2775_v4  ;;  %v2776_v6 = vld [vmem:[#allocation3 + $0x2d0] sm:$0xff]  ;;  %v2806_v4 = vld [vmem:[#allocation3 + $0xd8] sm:$0xff] }
  0xea   :  { %598 = vmatpush2.msra.mxu0 %v277_v8  ;;  %669 = vmatpush2.msra.mxu1 %v279_v9  ;;  %v777_v7 = vand.u32 2147483647, %v2776_v6  ;;  %v2777_v8 = vld [vmem:[#allocation3 + $0x288] sm:$0xff]  ;;  %v2807_v6 = vld [vmem:[#allocation3 + $0xc0] sm:$0xff] }
  0xeb   :  { %599 = vmatprep.subr.mxu0 %v270_v10  ;;  %670 = vmatprep.subr.mxu1 %v272_v11  ;;  %v768_v9 = vand.u32 2147483647, %v2777_v8  ;;  %v2778_v10 = vld [vmem:[#allocation3 + $0x298] sm:$0xff]  ;;  %v2808_v8 = vld [vmem:[#allocation3 + $0xd0] sm:$0xff] }
  0xec   :  { %600 = vmatpush2.msra.mxu0 %v269_v12  ;;  %671 = vmatpush2.msra.mxu1 %v271_v13  ;;  %v770_v11 = vand.u32 2147483647, %v2778_v10  ;;  %v2779_v12 = vld [vmem:[#allocation3 + $0x280] sm:$0xff]  ;;  %v2809_v10 = vld [vmem:[#allocation3 + $0x88] sm:$0xff] }
  0xed   :  { %601 = vmatprep.subr.mxu0 %v262_v14  ;;  %672 = vmatprep.subr.mxu1 %v264_v15  ;;  %v767_v13 = vand.u32 2147483647, %v2779_v12  ;;  %v2780_v14 = vld [vmem:[#allocation3 + $0x290] sm:$0xff]  ;;  %v2810_v12 = vld [vmem:[#allocation3 + $0x98] sm:$0xff] }
  0xee   :  { %602 = vmatpush2.msra.mxu0 %v261_v16  ;;  %673 = vmatpush2.msra.mxu1 %v263_v17  ;;  %v769_v15 = vand.u32 2147483647, %v2780_v14  ;;  %v2781_v16 = vld [vmem:[#allocation3 + $0x248] sm:$0xff]  ;;  %v2811_v14 = vld [vmem:[#allocation3 + $0x80] sm:$0xff] }
  0xef   :  { %603 = vmatprep.subr.mxu0 %v254_v18  ;;  %674 = vmatprep.subr.mxu1 %v256_v19  ;;  %v760_v17 = vand.u32 2147483647, %v2781_v16  ;;  %v2782_v18 = vld [vmem:[#allocation3 + $0x258] sm:$0xff]  ;;  %v2812_v16 = vld [vmem:[#allocation3 + $0x90] sm:$0xff] }
  0xf0   :  { %604 = vmatpush2.msra.mxu0 %v253_v20  ;;  %675 = vmatpush2.msra.mxu1 %v255_v23  ;;  %v762_v19 = vand.u32 2147483647, %v2782_v18  ;;  %v2783_v20 = vld [vmem:[#allocation3 + $0x240] sm:$0xff]  ;;  %v2813_v18 = vld [vmem:[#allocation3 + $0x48] sm:$0xff] }
  0xf1   :  { %605 = vmatprep.subr.mxu0 %v246_v24  ;;  %676 = vmatprep.subr.mxu1 %v248_v25  ;;  %v759_v23 = vand.u32 2147483647, %v2783_v20  ;;  %v2784_v24 = vld [vmem:[#allocation3 + $0x250] sm:$0xff]  ;;  %v2814_v20 = vld [vmem:[#allocation3 + $0x58] sm:$0xff] }
  0xf2   :  { %606 = vmatpush2.msra.mxu0 %v245_v26  ;;  %677 = vmatpush2.msra.mxu1 %v247_v27  ;;  %v761_v25 = vand.u32 2147483647, %v2784_v24  ;;  %v2785_v26 = vld [vmem:[#allocation3 + $0x208] sm:$0xff]  ;;  %v2815_v24 = vld [vmem:[#allocation3 + $0x40] sm:$0xff] }
  0xf3   :  { %607 = vmatprep.subr.mxu0 %v238_v29  ;;  %678 = vmatprep.subr.mxu1 %v240_v30  ;;  %v752_v27 = vand.u32 2147483647, %v2785_v26  ;;  %v2786_v29 = vld [vmem:[#allocation3 + $0x218] sm:$0xff]  ;;  %v2816_v26 = vld [vmem:[#allocation3 + $0x50] sm:$0xff] }
  0xf4   :  { %608 = vmatpush2.msra.mxu0 %v237_v31  ;;  %679 = vmatpush2.msra.mxu1 %v239_v32  ;;  %v754_v30 = vand.u32 2147483647, %v2786_v29  ;;  %v2787_v31 = vld [vmem:[#allocation3 + $0x200] sm:$0xff]  ;;  %v2817_v29 = vld [vmem:[#allocation3 + $0x8] sm:$0xff] }
  0xf5   :  { %610 = vmatmul.mubr.f32.vlgmr.msra.gmra.mxu0 %v3159_v28  ;;  %681 = vmatmul.mubr.f32.vlgmr.msra.gmra.mxu1 %v3159_v28  ;;  %v2769_v28 = vld [vmem:[#allocation3 + $0x308] sm:$0xff]  ;;  %v751_v32 = vand.u32 2147483647, %v2787_v31  ;;  %v2818_v31 = vld [vmem:[#allocation3 + $0x18] sm:$0xff] }
  0xf6   :  { %943 = vmatprep.subr.mxu0 %v808_v34  ;;  %1014 = vmatprep.subr.mxu1 %v810_v36  ;;  %v784_v57 = vand.u32 2147483647, %v2769_v28  ;;  %v753_v34 = vand.u32 2147483647, %v2788_v33  ;;  %v744_v36 = vand.u32 2147483647, %v2789_v35 }
  0xf7   :  { %944 = vmatpush1.msra.mxu0 %v807_v38  ;;  %1007 = vmatprep.mubr.f32.mxu0 %v3164_v45  ;;  %v746_v38 = vand.u32 2147483647, %v2790_v37  ;;  %v2800_v28 = vld [vmem:[#allocation3 + $0x150] sm:$0xff]  ;;  %v2819_v33 = vld [vmem:[#allocation3] sm:$0xff]  ;;  %v2821_v37 = vld [vmem:[#allocation3 + $0x7c8] sm:$0xff] }
  0xf8   :  { %1015 = vmatpush1.msra.mxu1 %v809_v40  ;;  %1078 = vmatprep.mubr.f32.mxu1 %v3164_v45  ;;  %v743_v40 = vand.u32 2147483647, %v2791_v39  ;;  %v2820_v35 = vld [vmem:[#allocation3 + $0x10] sm:$0xff]  ;;  %v2822_v39 = vld [vmem:[#allocation3 + $0x7d8] sm:$0xff] }
  0xf9   :  { %945 = vmatprep.subr.mxu0 %v800_v42  ;;  %1016 = vmatprep.subr.mxu1 %v802_v44  ;;  %v745_v42 = vand.u32 2147483647, %v2792_v41  ;;  %v736_v44 = vand.u32 2147483647, %v2793_v43  ;;  %v2823_v41 = vld [vmem:[#allocation3 + $0x7c0] sm:$0xff]  ;;  %v2824_v43 = vld [vmem:[#allocation3 + $0x7d0] sm:$0xff] }
  0xfa   :  { %946 = vmatpush1.msra.mxu0 %v799_v47  ;;  %1017 = vmatpush1.msra.mxu1 %v801_v49  ;;  %v738_v47 = vand.u32 2147483647, %v2794_v46  ;;  %v735_v49 = vand.u32 2147483647, %v2795_v48  ;;  %v2825_v46 = vld [vmem:[#allocation3 + $0x788] sm:$0xff]  ;;  %v2826_v48 = vld [vmem:[#allocation3 + $0x798] sm:$0xff] }
  0xfb   :  { %947 = vmatprep.subr.mxu0 %v792_v51  ;;  %1018 = vmatprep.subr.mxu1 %v794_v53  ;;  %v737_v51 = vand.u32 2147483647, %v2796_v50  ;;  %v728_v53 = vand.u32 2147483647, %v2797_v52  ;;  %v2827_v50 = vld [vmem:[#allocation3 + $0x780] sm:$0xff]  ;;  %v2828_v52 = vld [vmem:[#allocation3 + $0x790] sm:$0xff] }
  0xfc   :  { %948 = vmatpush1.msra.mxu0 %v791_v22  ;;  %1019 = vmatpush1.msra.mxu1 %v793_v56  ;;  %v730_v22 = vand.u32 2147483647, %v2798_v54  ;;  %v727_v56 = vand.u32 2147483647, %v2799_v55  ;;  %v2829_v54 = vld [vmem:[#allocation3 + $0x748] sm:$0xff]  ;;  %v2830_v55 = vld [vmem:[#allocation3 + $0x758] sm:$0xff] }
  0xfd   :  { %949 = vmatprep.subr.mxu0 %v784_v57  ;;  %1020 = vmatprep.subr.mxu1 %v786_v59  ;;  %v729_v57 = vand.u32 2147483647, %v2800_v28  ;;  %v720_v59 = vand.u32 2147483647, %v2801_v58  ;;  %v2831_v28 = vld [vmem:[#allocation3 + $0x740] sm:$0xff]  ;;  %v2832_v58 = vld [vmem:[#allocation3 + $0x750] sm:$0xff] }
  0xfe   :  { %950 = vmatpush1.msra.mxu0 %v783_v61  ;;  %1021 = vmatpush1.msra.mxu1 %v785_v63  ;;  %v722_v61 = vand.u32 2147483647, %v2802_v60  ;;  %v719_v63 = vand.u32 2147483647, %v2803_v62  ;;  %v2833_v60 = vld [vmem:[#allocation3 + $0x708] sm:$0xff]  ;;  %v2834_v62 = vld [vmem:[#allocation3 + $0x718] sm:$0xff] }
  0xff   :  { %951 = vmatprep.subr.mxu0 %v776_v1  ;;  %1022 = vmatprep.subr.mxu1 %v778_v3  ;;  %v721_v1 = vand.u32 2147483647, %v2804_v0  ;;  %v712_v3 = vand.u32 2147483647, %v2805_v2  ;;  %v2835_v0 = vld [vmem:[#allocation3 + $0x700] sm:$0xff]  ;;  %v2836_v2 = vld [vmem:[#allocation3 + $0x710] sm:$0xff] }
 0x100   :  { %952 = vmatpush1.msra.mxu0 %v775_v5  ;;  %1023 = vmatpush1.msra.mxu1 %v777_v7  ;;  %v714_v5 = vand.u32 2147483647, %v2806_v4  ;;  %v711_v7 = vand.u32 2147483647, %v2807_v6  ;;  %v2837_v4 = vld [vmem:[#allocation3 + $0x6c8] sm:$0xff]  ;;  %v2838_v6 = vld [vmem:[#allocation3 + $0x6d8] sm:$0xff] }
 0x101   :  { %953 = vmatprep.subr.mxu0 %v768_v9  ;;  %1024 = vmatprep.subr.mxu1 %v770_v11  ;;  %v713_v9 = vand.u32 2147483647, %v2808_v8  ;;  %v704_v11 = vand.u32 2147483647, %v2809_v10  ;;  %v2839_v8 = vld [vmem:[#allocation3 + $0x6c0] sm:$0xff]  ;;  %v2840_v10 = vld [vmem:[#allocation3 + $0x6d0] sm:$0xff] }
 0x102   :  { %954 = vmatpush1.msra.mxu0 %v767_v13  ;;  %1025 = vmatpush1.msra.mxu1 %v769_v15  ;;  %v706_v13 = vand.u32 2147483647, %v2810_v12  ;;  %v703_v15 = vand.u32 2147483647, %v2811_v14  ;;  %v2841_v12 = vld [vmem:[#allocation3 + $0x688] sm:$0xff]  ;;  %v2842_v14 = vld [vmem:[#allocation3 + $0x698] sm:$0xff] }
 0x103   :  { %955 = vmatprep.subr.mxu0 %v760_v17  ;;  %1026 = vmatprep.subr.mxu1 %v762_v19  ;;  %v705_v17 = vand.u32 2147483647, %v2812_v16  ;;  %v696_v19 = vand.u32 2147483647, %v2813_v18  ;;  %v2843_v16 = vld [vmem:[#allocation3 + $0x680] sm:$0xff]  ;;  %v2844_v18 = vld [vmem:[#allocation3 + $0x690] sm:$0xff] }
 0x104   :  { %956 = vmatpush1.msra.mxu0 %v759_v23  ;;  %1027 = vmatpush1.msra.mxu1 %v761_v25  ;;  %v698_v23 = vand.u32 2147483647, %v2814_v20  ;;  %v695_v25 = vand.u32 2147483647, %v2815_v24  ;;  %v2845_v20 = vld [vmem:[#allocation3 + $0x648] sm:$0xff]  ;;  %v2846_v24 = vld [vmem:[#allocation3 + $0x658] sm:$0xff] }
 0x105   :  { %957 = vmatprep.subr.mxu0 %v752_v27  ;;  %1028 = vmatprep.subr.mxu1 %v754_v30  ;;  %v697_v27 = vand.u32 2147483647, %v2816_v26  ;;  %v688_v30 = vand.u32 2147483647, %v2817_v29  ;;  %v2847_v26 = vld [vmem:[#allocation3 + $0x640] sm:$0xff]  ;;  %v2848_v29 = vld [vmem:[#allocation3 + $0x650] sm:$0xff] }
 0x106   :  { %958 = vmatpush1.msra.mxu0 %v751_v32  ;;  %1029 = vmatpush1.msra.mxu1 %v753_v34  ;;  %v690_v32 = vand.u32 2147483647, %v2818_v31  ;;  %v687_v34 = vand.u32 2147483647, %v2819_v33  ;;  %v2849_v31 = vld [vmem:[#allocation3 + $0x608] sm:$0xff]  ;;  %v2850_v33 = vld [vmem:[#allocation3 + $0x618] sm:$0xff] }
 0x107   :  { %959 = vmatprep.subr.mxu0 %v744_v36  ;;  %1030 = vmatprep.subr.mxu1 %v746_v38  ;;  %v689_v36 = vand.u32 2147483647, %v2820_v35  ;;  %v936_v38 = vand.u32 2147483647, %v2821_v37  ;;  %v2851_v35 = vld [vmem:[#allocation3 + $0x600] sm:$0xff]  ;;  %v2852_v37 = vld [vmem:[#allocation3 + $0x610] sm:$0xff] }
 0x108   :  { %960 = vmatpush1.msra.mxu0 %v743_v40  ;;  %1031 = vmatpush1.msra.mxu1 %v745_v42  ;;  %v938_v40 = vand.u32 2147483647, %v2822_v39  ;;  %v935_v42 = vand.u32 2147483647, %v2823_v41  ;;  %v2853_v39 = vld [vmem:[#allocation3 + $0x5c8] sm:$0xff]  ;;  %v2854_v41 = vld [vmem:[#allocation3 + $0x5d8] sm:$0xff] }
 0x109   :  { %961 = vmatprep.subr.mxu0 %v736_v44  ;;  %1032 = vmatprep.subr.mxu1 %v738_v47  ;;  %v937_v44 = vand.u32 2147483647, %v2824_v43  ;;  %v928_v47 = vand.u32 2147483647, %v2825_v46  ;;  %v2855_v43 = vld [vmem:[#allocation3 + $0x5c0] sm:$0xff]  ;;  %v2856_v46 = vld [vmem:[#allocation3 + $0x5d0] sm:$0xff] }
 0x10a   :  { %962 = vmatpush1.msra.mxu0 %v735_v49  ;;  %1033 = vmatpush1.msra.mxu1 %v737_v51  ;;  %v930_v49 = vand.u32 2147483647, %v2826_v48  ;;  %v927_v51 = vand.u32 2147483647, %v2827_v50  ;;  %v2857_v48 = vld [vmem:[#allocation3 + $0x588] sm:$0xff]  ;;  %v2858_v50 = vld [vmem:[#allocation3 + $0x598] sm:$0xff] }
 0x10b   :  { %963 = vmatprep.subr.mxu0 %v728_v53  ;;  %1034 = vmatprep.subr.mxu1 %v730_v22  ;;  %v929_v53 = vand.u32 2147483647, %v2828_v52  ;;  %v920_v22 = vand.u32 2147483647, %v2829_v54  ;;  %v2859_v52 = vld [vmem:[#allocation3 + $0x580] sm:$0xff]  ;;  %v2860_v54 = vld [vmem:[#allocation3 + $0x590] sm:$0xff] }
 0x10c   :  { %964 = vmatpush1.msra.mxu0 %v727_v56  ;;  %1035 = vmatpush1.msra.mxu1 %v729_v57  ;;  %v922_v56 = vand.u32 2147483647, %v2830_v55  ;;  %v919_v57 = vand.u32 2147483647, %v2831_v28  ;;  %v2861_v55 = vld [vmem:[#allocation3 + $0x548] sm:$0xff]  ;;  %v2862_v28 = vld [vmem:[#allocation3 + $0x558] sm:$0xff] }
 0x10d   :  { %965 = vmatprep.subr.mxu0 %v720_v59  ;;  %1036 = vmatprep.subr.mxu1 %v722_v61  ;;  %v921_v59 = vand.u32 2147483647, %v2832_v58  ;;  %v912_v61 = vand.u32 2147483647, %v2833_v60  ;;  %v2863_v58 = vld [vmem:[#allocation3 + $0x540] sm:$0xff]  ;;  %v2864_v60 = vld [vmem:[#allocation3 + $0x550] sm:$0xff] }
 0x10e   :  { %966 = vmatpush1.msra.mxu0 %v719_v63  ;;  %1037 = vmatpush1.msra.mxu1 %v721_v1  ;;  %v914_v63 = vand.u32 2147483647, %v2834_v62  ;;  %v911_v1 = vand.u32 2147483647, %v2835_v0  ;;  %v2865_v62 = vld [vmem:[#allocation3 + $0x508] sm:$0xff]  ;;  %v2866_v0 = vld [vmem:[#allocation3 + $0x518] sm:$0xff] }
 0x10f   :  { %967 = vmatprep.subr.mxu0 %v712_v3  ;;  %1038 = vmatprep.subr.mxu1 %v714_v5  ;;  %v913_v3 = vand.u32 2147483647, %v2836_v2  ;;  %v904_v5 = vand.u32 2147483647, %v2837_v4  ;;  %v2867_v2 = vld [vmem:[#allocation3 + $0x500] sm:$0xff]  ;;  %v2868_v4 = vld [vmem:[#allocation3 + $0x510] sm:$0xff] }
 0x110   :  { %968 = vmatpush1.msra.mxu0 %v711_v7  ;;  %1039 = vmatpush1.msra.mxu1 %v713_v9  ;;  %v906_v7 = vand.u32 2147483647, %v2838_v6  ;;  %v903_v9 = vand.u32 2147483647, %v2839_v8  ;;  %v2869_v6 = vld [vmem:[#allocation3 + $0x4c8] sm:$0xff]  ;;  %v2870_v8 = vld [vmem:[#allocation3 + $0x4d8] sm:$0xff] }
 0x111   :  { %969 = vmatprep.subr.mxu0 %v704_v11  ;;  %1040 = vmatprep.subr.mxu1 %v706_v13  ;;  %v905_v11 = vand.u32 2147483647, %v2840_v10  ;;  %v896_v13 = vand.u32 2147483647, %v2841_v12  ;;  %v2871_v10 = vld [vmem:[#allocation3 + $0x4c0] sm:$0xff]  ;;  %v2872_v12 = vld [vmem:[#allocation3 + $0x4d0] sm:$0xff] }
 0x112   :  { %970 = vmatpush1.msra.mxu0 %v703_v15  ;;  %1041 = vmatpush1.msra.mxu1 %v705_v17  ;;  %v898_v15 = vand.u32 2147483647, %v2842_v14  ;;  %v895_v17 = vand.u32 2147483647, %v2843_v16  ;;  %v2873_v14 = vld [vmem:[#allocation3 + $0x488] sm:$0xff]  ;;  %v2874_v16 = vld [vmem:[#allocation3 + $0x498] sm:$0xff] }
 0x113   :  { %971 = vmatprep.subr.mxu0 %v696_v19  ;;  %1042 = vmatprep.subr.mxu1 %v698_v23  ;;  %v897_v19 = vand.u32 2147483647, %v2844_v18  ;;  %v888_v23 = vand.u32 2147483647, %v2845_v20  ;;  %v2875_v18 = vld [vmem:[#allocation3 + $0x480] sm:$0xff]  ;;  %v2876_v20 = vld [vmem:[#allocation3 + $0x490] sm:$0xff] }
 0x114   :  { %972 = vmatpush1.msra.mxu0 %v695_v25  ;;  %1043 = vmatpush1.msra.mxu1 %v697_v27  ;;  %v890_v25 = vand.u32 2147483647, %v2846_v24  ;;  %v887_v27 = vand.u32 2147483647, %v2847_v26  ;;  %v2877_v24 = vld [vmem:[#allocation3 + $0x448] sm:$0xff]  ;;  %v2878_v26 = vld [vmem:[#allocation3 + $0x458] sm:$0xff] }
 0x115   :  { %973 = vmatprep.subr.mxu0 %v688_v30  ;;  %1044 = vmatprep.subr.mxu1 %v690_v32  ;;  %v889_v30 = vand.u32 2147483647, %v2848_v29  ;;  %v880_v32 = vand.u32 2147483647, %v2849_v31  ;;  %v2879_v29 = vld [vmem:[#allocation3 + $0x440] sm:$0xff]  ;;  %v2880_v31 = vld [vmem:[#allocation3 + $0x450] sm:$0xff] }
 0x116   :  { %974 = vmatpush1.msra.mxu0 %v687_v34  ;;  %1045 = vmatpush1.msra.mxu1 %v689_v36  ;;  %v882_v34 = vand.u32 2147483647, %v2850_v33  ;;  %v879_v36 = vand.u32 2147483647, %v2851_v35  ;;  %v2881_v33 = vld [vmem:[#allocation3 + $0x408] sm:$0xff]  ;;  %v2882_v35 = vld [vmem:[#allocation3 + $0x418] sm:$0xff] }
 0x117   :  { %975 = vmatprep.subr.mxu0 %v936_v38  ;;  %1046 = vmatprep.subr.mxu1 %v938_v40  ;;  %v881_v38 = vand.u32 2147483647, %v2852_v37  ;;  %v872_v40 = vand.u32 2147483647, %v2853_v39  ;;  %v2883_v37 = vld [vmem:[#allocation3 + $0x400] sm:$0xff]  ;;  %v2884_v39 = vld [vmem:[#allocation3 + $0x410] sm:$0xff] }
 0x118   :  { %976 = vmatpush2.msra.mxu0 %v935_v42  ;;  %1047 = vmatpush2.msra.mxu1 %v937_v44  ;;  %v874_v42 = vand.u32 2147483647, %v2854_v41  ;;  %v871_v44 = vand.u32 2147483647, %v2855_v43  ;;  %v2885_v41 = vld [vmem:[#allocation3 + $0x3e8] sm:$0xff]  ;;  %v2886_v43 = vld [vmem:[#allocation3 + $0x3f8] sm:$0xff] }
 0x119   :  { %977 = vmatprep.subr.mxu0 %v928_v47  ;;  %1048 = vmatprep.subr.mxu1 %v930_v49  ;;  %v873_v47 = vand.u32 2147483647, %v2856_v46  ;;  %v864_v49 = vand.u32 2147483647, %v2857_v48  ;;  %v3171_v46 = vmul.f32 1.6228497, %v3155_v21 }
 0x11a   :  { %978 = vmatpush2.msra.mxu0 %v927_v51  ;;  %1049 = vmatpush2.msra.mxu1 %v929_v53  ;;  %v866_v51 = vand.u32 2147483647, %v2858_v50  ;;  %v863_v53 = vand.u32 2147483647, %v2859_v52  ;;  %v2892_v21 = vld [vmem:[#allocation3 + $0x3b0] sm:$0xff] }
 0x11b   :  { %979 = vmatprep.subr.mxu0 %v920_v22  ;;  %1050 = vmatprep.subr.mxu1 %v922_v56  ;;  %v865_v22 = vand.u32 2147483647, %v2860_v54  ;;  %v856_v56 = vand.u32 2147483647, %v2861_v55 }
 0x11c   :  { %980 = vmatpush2.msra.mxu0 %v919_v57  ;;  %1051 = vmatpush2.msra.mxu1 %v921_v59  ;;  %v858_v57 = vand.u32 2147483647, %v2862_v28  ;;  %v855_v59 = vand.u32 2147483647, %v2863_v58  ;;  %v2893_v28 = vld [vmem:[#allocation3 + $0x368] sm:$0xff]  ;;  %v2894_v58 = vld [vmem:[#allocation3 + $0x378] sm:$0xff] }
 0x11d   :  { %981 = vmatprep.subr.mxu0 %v912_v61  ;;  %1052 = vmatprep.subr.mxu1 %v914_v63  ;;  %v857_v61 = vand.u32 2147483647, %v2864_v60  ;;  %v848_v63 = vand.u32 2147483647, %v2865_v62  ;;  %v2895_v60 = vld [vmem:[#allocation3 + $0x360] sm:$0xff]  ;;  %v2896_v62 = vld [vmem:[#allocation3 + $0x370] sm:$0xff] }
 0x11e   :  { %982 = vmatpush2.msra.mxu0 %v911_v1  ;;  %1053 = vmatpush2.msra.mxu1 %v913_v3  ;;  %v850_v1 = vand.u32 2147483647, %v2866_v0  ;;  %v847_v3 = vand.u32 2147483647, %v2867_v2  ;;  %v2897_v0 = vld [vmem:[#allocation3 + $0x328] sm:$0xff]  ;;  %v2898_v2 = vld [vmem:[#allocation3 + $0x338] sm:$0xff] }
 0x11f   :  { %983 = vmatprep.subr.mxu0 %v904_v5  ;;  %1054 = vmatprep.subr.mxu1 %v906_v7  ;;  %v849_v5 = vand.u32 2147483647, %v2868_v4  ;;  %v840_v7 = vand.u32 2147483647, %v2869_v6  ;;  %v2899_v4 = vld [vmem:[#allocation3 + $0x320] sm:$0xff]  ;;  %v2900_v6 = vld [vmem:[#allocation3 + $0x330] sm:$0xff] }
 0x120   :  { %984 = vmatpush2.msra.mxu0 %v903_v9  ;;  %1055 = vmatpush2.msra.mxu1 %v905_v11  ;;  %v842_v9 = vand.u32 2147483647, %v2870_v8  ;;  %v839_v11 = vand.u32 2147483647, %v2871_v10  ;;  %v2901_v8 = vld [vmem:[#allocation3 + $0x2e8] sm:$0xff]  ;;  %v2902_v10 = vld [vmem:[#allocation3 + $0x2f8] sm:$0xff] }
 0x121   :  { %985 = vmatprep.subr.mxu0 %v896_v13  ;;  %1056 = vmatprep.subr.mxu1 %v898_v15  ;;  %v841_v13 = vand.u32 2147483647, %v2872_v12  ;;  %v832_v15 = vand.u32 2147483647, %v2873_v14  ;;  %v2903_v12 = vld [vmem:[#allocation3 + $0x2e0] sm:$0xff] }
 0x122   :  { %986 = vmatpush2.msra.mxu0 %v895_v17  ;;  %1057 = vmatpush2.msra.mxu1 %v897_v19  ;;  %v834_v17 = vand.u32 2147483647, %v2874_v16  ;;  %v831_v19 = vand.u32 2147483647, %v2875_v18 }
 0x123   :  { %987 = vmatprep.subr.mxu0 %v888_v23  ;;  %1058 = vmatprep.subr.mxu1 %v890_v25  ;;  %v833_v23 = vand.u32 2147483647, %v2876_v20  ;;  %v824_v25 = vand.u32 2147483647, %v2877_v24 }
 0x124   :  { %988 = vmatpush2.msra.mxu0 %v887_v27  ;;  %1059 = vmatpush2.msra.mxu1 %v889_v30  ;;  %v826_v27 = vand.u32 2147483647, %v2878_v26  ;;  %v823_v30 = vand.u32 2147483647, %v2879_v29 }
 0x125   :  { %989 = vmatprep.subr.mxu0 %v880_v32  ;;  %1060 = vmatprep.subr.mxu1 %v882_v34  ;;  %v825_v32 = vand.u32 2147483647, %v2880_v31  ;;  %v816_v34 = vand.u32 2147483647, %v2881_v33 }
 0x126   :  { %990 = vmatpush2.msra.mxu0 %v879_v36  ;;  %1061 = vmatpush2.msra.mxu1 %v881_v38  ;;  %v818_v36 = vand.u32 2147483647, %v2882_v35  ;;  %v815_v38 = vand.u32 2147483647, %v2883_v37 }
 0x127   :  { %991 = vmatprep.subr.mxu0 %v872_v40  ;;  %1062 = vmatprep.subr.mxu1 %v874_v42  ;;  %v817_v40 = vand.u32 2147483647, %v2884_v39  ;;  %v812_v42 = vand.u32 2147483647, %v2885_v41 }
 0x128   :  { %992 = vmatpush2.msra.mxu0 %v871_v44  ;;  %1063 = vmatpush2.msra.mxu1 %v873_v47  ;;  %v814_v44 = vand.u32 2147483647, %v2886_v43  ;;  %v2887_v47 = vld [vmem:[#allocation3 + $0x3e0] sm:$0xff] }
 0x129   :  { %993 = vmatprep.subr.mxu0 %v864_v49  ;;  %1064 = vmatprep.subr.mxu1 %v866_v51  ;;  %v811_v48 = vand.u32 2147483647, %v2887_v47  ;;  %v2888_v49 = vld [vmem:[#allocation3 + $0x3f0] sm:$0xff]  ;;  %v2889_v51 = vld [vmem:[#allocation3 + $0x3a8] sm:$0xff] }
 0x12a   :  { %994 = vmatpush2.msra.mxu0 %v863_v53  ;;  %1065 = vmatpush2.msra.mxu1 %v865_v22  ;;  %v813_v50 = vand.u32 2147483647, %v2888_v49  ;;  %v804_v52 = vand.u32 2147483647, %v2889_v51  ;;  %v2890_v53 = vld [vmem:[#allocation3 + $0x3b8] sm:$0xff]  ;;  %v2891_v22 = vld [vmem:[#allocation3 + $0x3a0] sm:$0xff] }
 0x12b   :  { %995 = vmatprep.subr.mxu0 %v856_v56  ;;  %1066 = vmatprep.subr.mxu1 %v858_v57  ;;  %v806_v54 = vand.u32 2147483647, %v2890_v53  ;;  %v803_v55 = vand.u32 2147483647, %v2891_v22  ;;  %v805_v56 = vand.u32 2147483647, %v2892_v21 }
 0x12c   :  { %996 = vmatpush2.msra.mxu0 %v855_v59  ;;  %1067 = vmatpush2.msra.mxu1 %v857_v61  ;;  %v796_v57 = vand.u32 2147483647, %v2893_v28  ;;  %v798_v59 = vand.u32 2147483647, %v2894_v58  ;;  %v795_v61 = vand.u32 2147483647, %v2895_v60 }
 0x12d   :  { %997 = vmatprep.subr.mxu0 %v848_v63  ;;  %1068 = vmatprep.subr.mxu1 %v850_v1  ;;  %v797_v63 = vand.u32 2147483647, %v2896_v62  ;;  %v788_v1 = vand.u32 2147483647, %v2897_v0 }
 0x12e   :  { %998 = vmatpush2.msra.mxu0 %v847_v3  ;;  %1069 = vmatpush2.msra.mxu1 %v849_v5  ;;  %v790_v3 = vand.u32 2147483647, %v2898_v2  ;;  %v787_v5 = vand.u32 2147483647, %v2899_v4 }
 0x12f   :  { %999 = vmatprep.subr.mxu0 %v840_v7  ;;  %1070 = vmatprep.subr.mxu1 %v842_v9  ;;  %v789_v7 = vand.u32 2147483647, %v2900_v6  ;;  %v780_v9 = vand.u32 2147483647, %v2901_v8 }
 0x130   :  { %1000 = vmatpush2.msra.mxu0 %v839_v11  ;;  %1071 = vmatpush2.msra.mxu1 %v841_v13  ;;  %v782_v11 = vand.u32 2147483647, %v2902_v10  ;;  %v2904_v13 = vld [vmem:[#allocation3 + $0x2f0] sm:$0xff] }
 0x131   :  { %1001 = vmatprep.subr.mxu0 %v832_v15  ;;  %1072 = vmatprep.subr.mxu1 %v834_v17  ;;  %v781_v14 = vand.u32 2147483647, %v2904_v13  ;;  %v2905_v15 = vld [vmem:[#allocation3 + $0x2a8] sm:$0xff]  ;;  %v2906_v17 = vld [vmem:[#allocation3 + $0x2b8] sm:$0xff] }
 0x132   :  { %1002 = vmatpush2.msra.mxu0 %v831_v19  ;;  %1073 = vmatpush2.msra.mxu1 %v833_v23  ;;  %v772_v16 = vand.u32 2147483647, %v2905_v15  ;;  %v774_v18 = vand.u32 2147483647, %v2906_v17  ;;  %v2907_v19 = vld [vmem:[#allocation3 + $0x2a0] sm:$0xff]  ;;  %v2908_v23 = vld [vmem:[#allocation3 + $0x2b0] sm:$0xff] }
 0x133   :  { %1003 = vmatprep.subr.mxu0 %v824_v25  ;;  %1074 = vmatprep.subr.mxu1 %v826_v27  ;;  %v771_v20 = vand.u32 2147483647, %v2907_v19  ;;  %v773_v24 = vand.u32 2147483647, %v2908_v23  ;;  %v2909_v25 = vld [vmem:[#allocation3 + $0x268] sm:$0xff]  ;;  %v2910_v27 = vld [vmem:[#allocation3 + $0x278] sm:$0xff] }
 0x134   :  { %1004 = vmatpush2.msra.mxu0 %v823_v30  ;;  %1075 = vmatpush2.msra.mxu1 %v825_v32  ;;  %v764_v26 = vand.u32 2147483647, %v2909_v25  ;;  %v766_v29 = vand.u32 2147483647, %v2910_v27  ;;  %v2911_v30 = vld [vmem:[#allocation3 + $0x260] sm:$0xff]  ;;  %v2912_v32 = vld [vmem:[#allocation3 + $0x270] sm:$0xff] }
 0x135   :  { %1005 = vmatprep.subr.mxu0 %v816_v34  ;;  %1076 = vmatprep.subr.mxu1 %v818_v36  ;;  %v763_v31 = vand.u32 2147483647, %v2911_v30  ;;  %v765_v33 = vand.u32 2147483647, %v2912_v32  ;;  %v2913_v34 = vld [vmem:[#allocation3 + $0x228] sm:$0xff]  ;;  %v2914_v36 = vld [vmem:[#allocation3 + $0x238] sm:$0xff] }
 0x136   :  { %1006 = vmatpush2.msra.mxu0 %v815_v38  ;;  %1077 = vmatpush2.msra.mxu1 %v817_v40  ;;  %v756_v35 = vand.u32 2147483647, %v2913_v34  ;;  %v758_v37 = vand.u32 2147483647, %v2914_v36  ;;  %v2915_v38 = vld [vmem:[#allocation3 + $0x220] sm:$0xff]  ;;  %v2916_v40 = vld [vmem:[#allocation3 + $0x230] sm:$0xff] }
 0x137   :  { %1008 = vmatmul.mubr.f32.vlgmr.msra.gmra.mxu0 %v3171_v46  ;;  %1079 = vmatmul.mubr.f32.vlgmr.msra.gmra.mxu1 %v3171_v46  ;;  %v755_v39 = vand.u32 2147483647, %v2915_v38  ;;  %v757_v41 = vand.u32 2147483647, %v2916_v40 }
 0x138   :  { %1085 = vmatprep.subr.mxu0 %v812_v42  ;;  %1156 = vmatprep.subr.mxu1 %v814_v44  ;;  %v2917_v42 = vld [vmem:[#allocation3 + $0x1e8] sm:$0xff]  ;;  %v2918_v44 = vld [vmem:[#allocation3 + $0x1f8] sm:$0xff] }
 0x139   :  { %1086 = vmatpush1.msra.mxu0 %v811_v48  ;;  %1149 = vmatprep.mubr.f32.mxu0 %v3164_v45  ;;  %v748_v43 = vand.u32 2147483647, %v2917_v42  ;;  %v750_v47 = vand.u32 2147483647, %v2918_v44  ;;  %v2919_v48 = vld [vmem:[#allocation3 + $0x1e0] sm:$0xff] }
 0x13a   :  { %1157 = vmatpush1.msra.mxu1 %v813_v50  ;;  %1220 = vmatprep.mubr.f32.mxu1 %v3164_v45  ;;  %v779_v45 = vand.u32 2147483647, %v2903_v12  ;;  %v747_v49 = vand.u32 2147483647, %v2919_v48  ;;  %v2920_v50 = vld [vmem:[#allocation3 + $0x1f0] sm:$0xff] }
 0x13b   :  { %1087 = vmatprep.subr.mxu0 %v804_v52  ;;  %1158 = vmatprep.subr.mxu1 %v806_v54  ;;  %v749_v51 = vand.u32 2147483647, %v2920_v50  ;;  %v2921_v52 = vld [vmem:[#allocation3 + $0x1a8] sm:$0xff]  ;;  %v2922_v54 = vld [vmem:[#allocation3 + $0x1b8] sm:$0xff] }
 0x13c   :  { %1088 = vmatpush1.msra.mxu0 %v803_v55  ;;  %1159 = vmatpush1.msra.mxu1 %v805_v56  ;;  %v740_v53 = vand.u32 2147483647, %v2921_v52  ;;  %v742_v22 = vand.u32 2147483647, %v2922_v54  ;;  %v2923_v55 = vld [vmem:[#allocation3 + $0x1a0] sm:$0xff]  ;;  %v2924_v56 = vld [vmem:[#allocation3 + $0x1b0] sm:$0xff] }
 0x13d   :  { %1089 = vmatprep.subr.mxu0 %v796_v57  ;;  %1160 = vmatprep.subr.mxu1 %v798_v59  ;;  %v739_v21 = vand.u32 2147483647, %v2923_v55  ;;  %v741_v28 = vand.u32 2147483647, %v2924_v56  ;;  %v2925_v57 = vld [vmem:[#allocation3 + $0x168] sm:$0xff]  ;;  %v2926_v59 = vld [vmem:[#allocation3 + $0x178] sm:$0xff] }
 0x13e   :  { %1090 = vmatpush1.msra.mxu0 %v795_v61  ;;  %1161 = vmatpush1.msra.mxu1 %v797_v63  ;;  %v732_v58 = vand.u32 2147483647, %v2925_v57  ;;  %v734_v60 = vand.u32 2147483647, %v2926_v59  ;;  %v2927_v61 = vld [vmem:[#allocation3 + $0x160] sm:$0xff]  ;;  %v2928_v63 = vld [vmem:[#allocation3 + $0x170] sm:$0xff] }
 0x13f   :  { %1091 = vmatprep.subr.mxu0 %v788_v1  ;;  %1162 = vmatprep.subr.mxu1 %v790_v3  ;;  %v731_v62 = vand.u32 2147483647, %v2927_v61  ;;  %v733_v0 = vand.u32 2147483647, %v2928_v63  ;;  %v2929_v1 = vld [vmem:[#allocation3 + $0x128] sm:$0xff]  ;;  %v2930_v3 = vld [vmem:[#allocation3 + $0x138] sm:$0xff] }
 0x140   :  { %1092 = vmatpush1.msra.mxu0 %v787_v5  ;;  %1163 = vmatpush1.msra.mxu1 %v789_v7  ;;  %v724_v2 = vand.u32 2147483647, %v2929_v1  ;;  %v726_v4 = vand.u32 2147483647, %v2930_v3  ;;  %v2931_v5 = vld [vmem:[#allocation3 + $0x120] sm:$0xff]  ;;  %v2932_v7 = vld [vmem:[#allocation3 + $0x130] sm:$0xff] }
 0x141   :  { %1093 = vmatprep.subr.mxu0 %v780_v9  ;;  %1164 = vmatprep.subr.mxu1 %v782_v11  ;;  %v723_v6 = vand.u32 2147483647, %v2931_v5  ;;  %v725_v8 = vand.u32 2147483647, %v2932_v7  ;;  %v2933_v9 = vld [vmem:[#allocation3 + $0xe8] sm:$0xff]  ;;  %v2934_v11 = vld [vmem:[#allocation3 + $0xf8] sm:$0xff] }
 0x142   :  { %1094 = vmatpush1.msra.mxu0 %v779_v45  ;;  %1165 = vmatpush1.msra.mxu1 %v781_v14  ;;  %v716_v10 = vand.u32 2147483647, %v2933_v9  ;;  %v718_v12 = vand.u32 2147483647, %v2934_v11  ;;  %v2935_v45 = vld [vmem:[#allocation3 + $0xe0] sm:$0xff]  ;;  %v2936_v14 = vld [vmem:[#allocation3 + $0xf0] sm:$0xff] }
 0x143   :  { %1095 = vmatprep.subr.mxu0 %v772_v16  ;;  %1166 = vmatprep.subr.mxu1 %v774_v18  ;;  %v715_v13 = vand.u32 2147483647, %v2935_v45  ;;  %v717_v15 = vand.u32 2147483647, %v2936_v14  ;;  %v2937_v16 = vld [vmem:[#allocation3 + $0xa8] sm:$0xff]  ;;  %v2938_v18 = vld [vmem:[#allocation3 + $0xb8] sm:$0xff] }
 0x144   :  { %1096 = vmatpush1.msra.mxu0 %v771_v20  ;;  %1167 = vmatpush1.msra.mxu1 %v773_v24  ;;  %v708_v17 = vand.u32 2147483647, %v2937_v16  ;;  %v710_v19 = vand.u32 2147483647, %v2938_v18  ;;  %v2939_v20 = vld [vmem:[#allocation3 + $0xa0] sm:$0xff]  ;;  %v2940_v24 = vld [vmem:[#allocation3 + $0xb0] sm:$0xff] }
 0x145   :  { %1097 = vmatprep.subr.mxu0 %v764_v26  ;;  %1168 = vmatprep.subr.mxu1 %v766_v29  ;;  %v707_v23 = vand.u32 2147483647, %v2939_v20  ;;  %v709_v25 = vand.u32 2147483647, %v2940_v24  ;;  %v2941_v26 = vld [vmem:[#allocation3 + $0x68] sm:$0xff]  ;;  %v2942_v29 = vld [vmem:[#allocation3 + $0x78] sm:$0xff] }
 0x146   :  { %1098 = vmatpush1.msra.mxu0 %v763_v31  ;;  %1169 = vmatpush1.msra.mxu1 %v765_v33  ;;  %v700_v27 = vand.u32 2147483647, %v2941_v26  ;;  %v702_v30 = vand.u32 2147483647, %v2942_v29  ;;  %v2943_v31 = vld [vmem:[#allocation3 + $0x60] sm:$0xff]  ;;  %v2944_v33 = vld [vmem:[#allocation3 + $0x70] sm:$0xff] }
 0x147   :  { %1099 = vmatprep.subr.mxu0 %v756_v35  ;;  %1170 = vmatprep.subr.mxu1 %v758_v37  ;;  %v699_v32 = vand.u32 2147483647, %v2943_v31  ;;  %v701_v34 = vand.u32 2147483647, %v2944_v33  ;;  %v2945_v35 = vld [vmem:[#allocation3 + $0x28] sm:$0xff]  ;;  %v2946_v37 = vld [vmem:[#allocation3 + $0x38] sm:$0xff] }
 0x148   :  { %1100 = vmatpush1.msra.mxu0 %v755_v39  ;;  %1171 = vmatpush1.msra.mxu1 %v757_v41  ;;  %v692_v36 = vand.u32 2147483647, %v2945_v35  ;;  %v694_v38 = vand.u32 2147483647, %v2946_v37  ;;  %v2947_v39 = vld [vmem:[#allocation3 + $0x20] sm:$0xff]  ;;  %v2948_v41 = vld [vmem:[#allocation3 + $0x30] sm:$0xff] }
 0x149   :  { %1101 = vmatprep.subr.mxu0 %v748_v43  ;;  %1172 = vmatprep.subr.mxu1 %v750_v47  ;;  %v691_v40 = vand.u32 2147483647, %v2947_v39  ;;  %v693_v42 = vand.u32 2147483647, %v2948_v41  ;;  %v2949_v43 = vld [vmem:[#allocation3 + $0x7e8] sm:$0xff]  ;;  %v2950_v47 = vld [vmem:[#allocation3 + $0x7f8] sm:$0xff] }
 0x14a   :  { %1102 = vmatpush1.msra.mxu0 %v747_v49  ;;  %1173 = vmatpush1.msra.mxu1 %v749_v51  ;;  %v940_v44 = vand.u32 2147483647, %v2949_v43  ;;  %v942_v48 = vand.u32 2147483647, %v2950_v47  ;;  %v2951_v49 = vld [vmem:[#allocation3 + $0x7e0] sm:$0xff]  ;;  %v2952_v51 = vld [vmem:[#allocation3 + $0x7f0] sm:$0xff] }
 0x14b   :  { %1103 = vmatprep.subr.mxu0 %v740_v53  ;;  %1174 = vmatprep.subr.mxu1 %v742_v22  ;;  %v939_v50 = vand.u32 2147483647, %v2951_v49  ;;  %v941_v52 = vand.u32 2147483647, %v2952_v51  ;;  %v2953_v53 = vld [vmem:[#allocation3 + $0x7a8] sm:$0xff]  ;;  %v2954_v22 = vld [vmem:[#allocation3 + $0x7b8] sm:$0xff] }
 0x14c   :  { %1104 = vmatpush1.msra.mxu0 %v739_v21  ;;  %1175 = vmatpush1.msra.mxu1 %v741_v28  ;;  %v932_v54 = vand.u32 2147483647, %v2953_v53  ;;  %v934_v55 = vand.u32 2147483647, %v2954_v22  ;;  %v2955_v21 = vld [vmem:[#allocation3 + $0x7a0] sm:$0xff]  ;;  %v2956_v28 = vld [vmem:[#allocation3 + $0x7b0] sm:$0xff] }
 0x14d   :  { %1105 = vmatprep.subr.mxu0 %v732_v58  ;;  %1176 = vmatprep.subr.mxu1 %v734_v60  ;;  %v931_v56 = vand.u32 2147483647, %v2955_v21  ;;  %v933_v57 = vand.u32 2147483647, %v2956_v28  ;;  %v2957_v58 = vld [vmem:[#allocation3 + $0x768] sm:$0xff]  ;;  %v2958_v60 = vld [vmem:[#allocation3 + $0x778] sm:$0xff] }
 0x14e   :  { %1106 = vmatpush1.msra.mxu0 %v731_v62  ;;  %1177 = vmatpush1.msra.mxu1 %v733_v0  ;;  %v924_v59 = vand.u32 2147483647, %v2957_v58  ;;  %v926_v61 = vand.u32 2147483647, %v2958_v60  ;;  %v2959_v62 = vld [vmem:[#allocation3 + $0x760] sm:$0xff]  ;;  %v2960_v0 = vld [vmem:[#allocation3 + $0x770] sm:$0xff] }
 0x14f   :  { %1107 = vmatprep.subr.mxu0 %v724_v2  ;;  %1178 = vmatprep.subr.mxu1 %v726_v4  ;;  %v923_v63 = vand.u32 2147483647, %v2959_v62  ;;  %v925_v1 = vand.u32 2147483647, %v2960_v0  ;;  %v2961_v2 = vld [vmem:[#allocation3 + $0x728] sm:$0xff]  ;;  %v2962_v4 = vld [vmem:[#allocation3 + $0x738] sm:$0xff] }
 0x150   :  { %1108 = vmatpush1.msra.mxu0 %v723_v6  ;;  %1179 = vmatpush1.msra.mxu1 %v725_v8  ;;  %v916_v3 = vand.u32 2147483647, %v2961_v2  ;;  %v918_v5 = vand.u32 2147483647, %v2962_v4  ;;  %v2963_v6 = vld [vmem:[#allocation3 + $0x720] sm:$0xff]  ;;  %v2964_v8 = vld [vmem:[#allocation3 + $0x730] sm:$0xff] }
 0x151   :  { %1109 = vmatprep.subr.mxu0 %v716_v10  ;;  %1180 = vmatprep.subr.mxu1 %v718_v12  ;;  %v915_v7 = vand.u32 2147483647, %v2963_v6  ;;  %v917_v9 = vand.u32 2147483647, %v2964_v8  ;;  %v2965_v10 = vld [vmem:[#allocation3 + $0x6e8] sm:$0xff]  ;;  %v2966_v12 = vld [vmem:[#allocation3 + $0x6f8] sm:$0xff] }
 0x152   :  { %1110 = vmatpush1.msra.mxu0 %v715_v13  ;;  %1181 = vmatpush1.msra.mxu1 %v717_v15  ;;  %v908_v11 = vand.u32 2147483647, %v2965_v10  ;;  %v910_v45 = vand.u32 2147483647, %v2966_v12  ;;  %v2967_v13 = vld [vmem:[#allocation3 + $0x6e0] sm:$0xff]  ;;  %v2968_v15 = vld [vmem:[#allocation3 + $0x6f0] sm:$0xff] }
 0x153   :  { %1111 = vmatprep.subr.mxu0 %v708_v17  ;;  %1182 = vmatprep.subr.mxu1 %v710_v19  ;;  %v907_v14 = vand.u32 2147483647, %v2967_v13  ;;  %v909_v16 = vand.u32 2147483647, %v2968_v15  ;;  %v2969_v17 = vld [vmem:[#allocation3 + $0x6a8] sm:$0xff]  ;;  %v2970_v19 = vld [vmem:[#allocation3 + $0x6b8] sm:$0xff] }
 0x154   :  { %1112 = vmatpush1.msra.mxu0 %v707_v23  ;;  %1183 = vmatpush1.msra.mxu1 %v709_v25  ;;  %v900_v18 = vand.u32 2147483647, %v2969_v17  ;;  %v902_v20 = vand.u32 2147483647, %v2970_v19  ;;  %v2971_v23 = vld [vmem:[#allocation3 + $0x6a0] sm:$0xff]  ;;  %v2972_v25 = vld [vmem:[#allocation3 + $0x6b0] sm:$0xff] }
 0x155   :  { %1113 = vmatprep.subr.mxu0 %v700_v27  ;;  %1184 = vmatprep.subr.mxu1 %v702_v30  ;;  %v899_v24 = vand.u32 2147483647, %v2971_v23  ;;  %v901_v26 = vand.u32 2147483647, %v2972_v25  ;;  %v2973_v27 = vld [vmem:[#allocation3 + $0x668] sm:$0xff]  ;;  %v2974_v30 = vld [vmem:[#allocation3 + $0x678] sm:$0xff] }
 0x156   :  { %1114 = vmatpush1.msra.mxu0 %v699_v32  ;;  %1185 = vmatpush1.msra.mxu1 %v701_v34  ;;  %v892_v29 = vand.u32 2147483647, %v2973_v27  ;;  %v894_v31 = vand.u32 2147483647, %v2974_v30  ;;  %v2975_v32 = vld [vmem:[#allocation3 + $0x660] sm:$0xff]  ;;  %v2976_v34 = vld [vmem:[#allocation3 + $0x670] sm:$0xff] }
 0x157   :  { %1115 = vmatprep.subr.mxu0 %v692_v36  ;;  %1186 = vmatprep.subr.mxu1 %v694_v38  ;;  %v891_v33 = vand.u32 2147483647, %v2975_v32  ;;  %v893_v35 = vand.u32 2147483647, %v2976_v34  ;;  %v2977_v36 = vld [vmem:[#allocation3 + $0x628] sm:$0xff]  ;;  %v2978_v38 = vld [vmem:[#allocation3 + $0x638] sm:$0xff] }
 0x158   :  { %1116 = vmatpush1.msra.mxu0 %v691_v40  ;;  %1187 = vmatpush1.msra.mxu1 %v693_v42  ;;  %v884_v37 = vand.u32 2147483647, %v2977_v36  ;;  %v886_v39 = vand.u32 2147483647, %v2978_v38  ;;  %v2979_v40 = vld [vmem:[#allocation3 + $0x620] sm:$0xff]  ;;  %v2980_v42 = vld [vmem:[#allocation3 + $0x630] sm:$0xff] }
 0x159   :  { %1117 = vmatprep.subr.mxu0 %v940_v44  ;;  %1188 = vmatprep.subr.mxu1 %v942_v48  ;;  %v883_v41 = vand.u32 2147483647, %v2979_v40  ;;  %v885_v43 = vand.u32 2147483647, %v2980_v42  ;;  %v2981_v44 = vld [vmem:[#allocation3 + $0x5e8] sm:$0xff]  ;;  %v2982_v48 = vld [vmem:[#allocation3 + $0x5f8] sm:$0xff] }
 0x15a   :  { %1118 = vmatpush2.msra.mxu0 %v939_v50  ;;  %1189 = vmatpush2.msra.mxu1 %v941_v52  ;;  %v876_v47 = vand.u32 2147483647, %v2981_v44  ;;  %v878_v49 = vand.u32 2147483647, %v2982_v48  ;;  %v2983_v50 = vld [vmem:[#allocation3 + $0x5e0] sm:$0xff]  ;;  %v2984_v52 = vld [vmem:[#allocation3 + $0x5f0] sm:$0xff] }
 0x15b   :  { %1119 = vmatprep.subr.mxu0 %v932_v54  ;;  %1190 = vmatprep.subr.mxu1 %v934_v55  ;;  %v875_v51 = vand.u32 2147483647, %v2983_v50  ;;  %v877_v53 = vand.u32 2147483647, %v2984_v52  ;;  %v2985_v54 = vld [vmem:[#allocation3 + $0x5a8] sm:$0xff]  ;;  %v2986_v55 = vld [vmem:[#allocation3 + $0x5b8] sm:$0xff] }
 0x15c   :  { %1120 = vmatpush2.msra.mxu0 %v931_v56  ;;  %1191 = vmatpush2.msra.mxu1 %v933_v57  ;;  %v868_v22 = vand.u32 2147483647, %v2985_v54  ;;  %v870_v21 = vand.u32 2147483647, %v2986_v55  ;;  %v2987_v56 = vld [vmem:[#allocation3 + $0x5a0] sm:$0xff]  ;;  %v2988_v57 = vld [vmem:[#allocation3 + $0x5b0] sm:$0xff] }
 0x15d   :  { %1121 = vmatprep.subr.mxu0 %v924_v59  ;;  %1192 = vmatprep.subr.mxu1 %v926_v61  ;;  %v867_v28 = vand.u32 2147483647, %v2987_v56  ;;  %v869_v58 = vand.u32 2147483647, %v2988_v57  ;;  %v2989_v59 = vld [vmem:[#allocation3 + $0x568] sm:$0xff]  ;;  %v2990_v61 = vld [vmem:[#allocation3 + $0x578] sm:$0xff] }
 0x15e   :  { %1122 = vmatpush2.msra.mxu0 %v923_v63  ;;  %1193 = vmatpush2.msra.mxu1 %v925_v1  ;;  %v860_v60 = vand.u32 2147483647, %v2989_v59  ;;  %v862_v62 = vand.u32 2147483647, %v2990_v61  ;;  %v2991_v63 = vld [vmem:[#allocation3 + $0x560] sm:$0xff]  ;;  %v2992_v1 = vld [vmem:[#allocation3 + $0x570] sm:$0xff] }
 0x15f   :  { %1123 = vmatprep.subr.mxu0 %v916_v3  ;;  %1194 = vmatprep.subr.mxu1 %v918_v5  ;;  %v859_v0 = vand.u32 2147483647, %v2991_v63  ;;  %v861_v2 = vand.u32 2147483647, %v2992_v1  ;;  %v2993_v3 = vld [vmem:[#allocation3 + $0x528] sm:$0xff]  ;;  %v2994_v5 = vld [vmem:[#allocation3 + $0x538] sm:$0xff] }
 0x160   :  { %1124 = vmatpush2.msra.mxu0 %v915_v7  ;;  %1195 = vmatpush2.msra.mxu1 %v917_v9  ;;  %v852_v4 = vand.u32 2147483647, %v2993_v3  ;;  %v854_v6 = vand.u32 2147483647, %v2994_v5  ;;  %v2995_v7 = vld [vmem:[#allocation3 + $0x520] sm:$0xff]  ;;  %v2996_v9 = vld [vmem:[#allocation3 + $0x530] sm:$0xff] }
 0x161   :  { %1125 = vmatprep.subr.mxu0 %v908_v11  ;;  %1196 = vmatprep.subr.mxu1 %v910_v45  ;;  %v851_v8 = vand.u32 2147483647, %v2995_v7  ;;  %v853_v10 = vand.u32 2147483647, %v2996_v9  ;;  %v2997_v11 = vld [vmem:[#allocation3 + $0x4e8] sm:$0xff]  ;;  %v2998_v45 = vld [vmem:[#allocation3 + $0x4f8] sm:$0xff] }
 0x162   :  { %1126 = vmatpush2.msra.mxu0 %v907_v14  ;;  %1197 = vmatpush2.msra.mxu1 %v909_v16  ;;  %v844_v12 = vand.u32 2147483647, %v2997_v11  ;;  %v846_v13 = vand.u32 2147483647, %v2998_v45  ;;  %v2999_v14 = vld [vmem:[#allocation3 + $0x4e0] sm:$0xff]  ;;  %v3000_v16 = vld [vmem:[#allocation3 + $0x4f0] sm:$0xff] }
 0x163   :  { %1127 = vmatprep.subr.mxu0 %v900_v18  ;;  %1198 = vmatprep.subr.mxu1 %v902_v20  ;;  %v843_v15 = vand.u32 2147483647, %v2999_v14  ;;  %v845_v17 = vand.u32 2147483647, %v3000_v16  ;;  %v3001_v18 = vld [vmem:[#allocation3 + $0x4a8] sm:$0xff]  ;;  %v3002_v20 = vld [vmem:[#allocation3 + $0x4b8] sm:$0xff] }
 0x164   :  { %1128 = vmatpush2.msra.mxu0 %v899_v24  ;;  %1199 = vmatpush2.msra.mxu1 %v901_v26  ;;  %v836_v19 = vand.u32 2147483647, %v3001_v18  ;;  %v838_v23 = vand.u32 2147483647, %v3002_v20  ;;  %v3003_v24 = vld [vmem:[#allocation3 + $0x4a0] sm:$0xff]  ;;  %v3004_v26 = vld [vmem:[#allocation3 + $0x4b0] sm:$0xff] }
 0x165   :  { %1129 = vmatprep.subr.mxu0 %v892_v29  ;;  %1200 = vmatprep.subr.mxu1 %v894_v31  ;;  %v835_v25 = vand.u32 2147483647, %v3003_v24  ;;  %v837_v27 = vand.u32 2147483647, %v3004_v26  ;;  %v3005_v29 = vld [vmem:[#allocation3 + $0x468] sm:$0xff]  ;;  %v3006_v31 = vld [vmem:[#allocation3 + $0x478] sm:$0xff] }
 0x166   :  { %1130 = vmatpush2.msra.mxu0 %v891_v33  ;;  %1201 = vmatpush2.msra.mxu1 %v893_v35  ;;  %v828_v30 = vand.u32 2147483647, %v3005_v29  ;;  %v830_v32 = vand.u32 2147483647, %v3006_v31  ;;  %v3007_v33 = vld [vmem:[#allocation3 + $0x460] sm:$0xff]  ;;  %v3008_v35 = vld [vmem:[#allocation3 + $0x470] sm:$0xff] }
 0x167   :  { %1131 = vmatprep.subr.mxu0 %v884_v37  ;;  %1202 = vmatprep.subr.mxu1 %v886_v39  ;;  %v827_v34 = vand.u32 2147483647, %v3007_v33  ;;  %v829_v36 = vand.u32 2147483647, %v3008_v35  ;;  %v3009_v37 = vld [vmem:[#allocation3 + $0x428] sm:$0xff]  ;;  %v3010_v39 = vld [vmem:[#allocation3 + $0x438] sm:$0xff] }
 0x168   :  { %1132 = vmatpush2.msra.mxu0 %v883_v41  ;;  %1203 = vmatpush2.msra.mxu1 %v885_v43  ;;  %v820_v38 = vand.u32 2147483647, %v3009_v37  ;;  %v822_v40 = vand.u32 2147483647, %v3010_v39  ;;  %v3011_v41 = vld [vmem:[#allocation3 + $0x420] sm:$0xff]  ;;  %v3012_v43 = vld [vmem:[#allocation3 + $0x430] sm:$0xff] }
 0x169   :  { %1133 = vmatprep.subr.mxu0 %v876_v47  ;;  %1204 = vmatprep.subr.mxu1 %v878_v49  ;;  %v819_v42 = vand.u32 2147483647, %v3011_v41  ;;  %v821_v44 = vand.u32 2147483647, %v3012_v43  ;;  %v3177_v47 = vld [vmem:[#allocation5 + $0xf8] sm:$0xff]  ;;  %v3189_v52 = vld [vmem:[#allocation5 + $0x1f0] sm:$0xff] }
 0x16a   :  { %1134 = vmatpush2.msra.mxu0 %v875_v51  ;;  %1205 = vmatpush2.msra.mxu1 %v877_v53  ;;  %v3179_v48 = vld [vmem:[#allocation5 + $0x1f8] sm:$0xff]  ;;  %v3187_v51 = vld [vmem:[#allocation5 + $0xf0] sm:$0xff]  ;;  %v3201_v55 = vld [vmem:[#allocation5 + $0x1e8] sm:$0xff] }
 0x16b   :  { %1135 = vmatprep.subr.mxu0 %v868_v22  ;;  %1206 = vmatprep.subr.mxu1 %v870_v21  ;;  %v3181_v49 = vld [vmem:[#allocation5 + $0x78] sm:$0xff]  ;;  %v3193_v53 = vld [vmem:[#allocation5 + $0x70] sm:$0xff]  ;;  %v3199_v22 = vld [vmem:[#allocation5 + $0xe8] sm:$0xff] }
 0x16c   :  { %1136 = vmatpush2.msra.mxu0 %v867_v28  ;;  %1207 = vmatpush2.msra.mxu1 %v869_v58  ;;  %v3183_v50 = vld [vmem:[#allocation5 + $0x178] sm:$0xff]  ;;  %v3195_v54 = vld [vmem:[#allocation5 + $0x170] sm:$0xff]  ;;  %v3207_v21 = vld [vmem:[#allocation5 + $0x168] sm:$0xff] }
 0x16d   :  { %1137 = vmatprep.subr.mxu0 %v860_v60  ;;  %1208 = vmatprep.subr.mxu1 %v862_v62  ;;  %v3211_v56 = vld [vmem:[#allocation5 + $0xe0] sm:$0xff]  ;;  %v3223_v59 = vld [vmem:[#allocation5 + $0xd8] sm:$0xff]  ;;  %v3235_v63 = vld [vmem:[#allocation5 + $0xd0] sm:$0xff] }
 0x16e   :  { %1138 = vmatpush2.msra.mxu0 %v859_v0  ;;  %1209 = vmatpush2.msra.mxu1 %v861_v2  ;;  %v3213_v28 = vld [vmem:[#allocation5 + $0x1e0] sm:$0xff]  ;;  %v3225_v60 = vld [vmem:[#allocation5 + $0x1d8] sm:$0xff]  ;;  %v3237_v0 = vld [vmem:[#allocation5 + $0x1d0] sm:$0xff] }
 0x16f   :  { %1139 = vmatprep.subr.mxu0 %v852_v4  ;;  %1210 = vmatprep.subr.mxu1 %v854_v6  ;;  %v3217_v57 = vld [vmem:[#allocation5 + $0x60] sm:$0xff]  ;;  %v3229_v61 = vld [vmem:[#allocation5 + $0x58] sm:$0xff]  ;;  %v3241_v1 = vld [vmem:[#allocation5 + $0x50] sm:$0xff] }
 0x170   :  { %1140 = vmatpush2.msra.mxu0 %v851_v8  ;;  %1211 = vmatpush2.msra.mxu1 %v853_v10  ;;  %v3219_v58 = vld [vmem:[#allocation5 + $0x160] sm:$0xff]  ;;  %v3231_v62 = vld [vmem:[#allocation5 + $0x158] sm:$0xff]  ;;  %v3243_v2 = vld [vmem:[#allocation5 + $0x150] sm:$0xff] }
 0x171   :  { %1141 = vmatprep.subr.mxu0 %v844_v12  ;;  %1212 = vmatprep.subr.mxu1 %v846_v13  ;;  %v3247_v3 = vld [vmem:[#allocation5 + $0xc8] sm:$0xff]  ;;  %v3259_v7 = vld [vmem:[#allocation5 + $0xc0] sm:$0xff]  ;;  %v3271_v11 = vld [vmem:[#allocation5 + $0xb8] sm:$0xff] }
 0x172   :  { %1142 = vmatpush2.msra.mxu0 %v843_v15  ;;  %1213 = vmatpush2.msra.mxu1 %v845_v17  ;;  %v3249_v4 = vld [vmem:[#allocation5 + $0x1c8] sm:$0xff]  ;;  %v3261_v8 = vld [vmem:[#allocation5 + $0x1c0] sm:$0xff]  ;;  %3915 = vst [vmem:[#allocation12_spill] sm:$0xff] %v3271_v11  ;;  %v3273_v12 = vld [vmem:[#allocation5 + $0x1b8] sm:$0xff] }
 0x173   :  { %1143 = vmatprep.subr.mxu0 %v836_v19  ;;  %1214 = vmatprep.subr.mxu1 %v838_v23  ;;  %v3253_v5 = vld [vmem:[#allocation5 + $0x48] sm:$0xff]  ;;  %v3265_v9 = vld [vmem:[#allocation5 + $0x40] sm:$0xff]  ;;  %3916 = vst [vmem:[#allocation13_spill] sm:$0xff] %v3273_v12  ;;  %v3277_v45 = vld [vmem:[#allocation5 + $0x38] sm:$0xff] }
 0x174   :  { %1144 = vmatpush2.msra.mxu0 %v835_v25  ;;  %1215 = vmatpush2.msra.mxu1 %v837_v27  ;;  %v3255_v6 = vld [vmem:[#allocation5 + $0x148] sm:$0xff]  ;;  %3913 = vst [vmem:[#allocation10_spill] sm:$0xff] %v3265_v9  ;;  %v3267_v10 = vld [vmem:[#allocation5 + $0x140] sm:$0xff]  ;;  %3917 = vst [vmem:[#allocation14_spill] sm:$0xff] %v3277_v45 }
 0x175   :  { %1145 = vmatprep.subr.mxu0 %v828_v30  ;;  %1216 = vmatprep.subr.mxu1 %v830_v32  ;;  %3914 = vst [vmem:[#allocation11_spill] sm:$0xff] %v3267_v10  ;;  %v3279_v13 = vld [vmem:[#allocation5 + $0x138] sm:$0xff]  ;;  %v3283_v14 = vld [vmem:[#allocation5 + $0xb0] sm:$0xff]  ;;  %v3295_v18 = vld [vmem:[#allocation5 + $0xa8] sm:$0xff] }
 0x176   :  { %1146 = vmatpush2.msra.mxu0 %v827_v34  ;;  %1217 = vmatpush2.msra.mxu1 %v829_v36  ;;  %3918 = vst [vmem:[#allocation15_spill] sm:$0xff] %v3279_v13  ;;  %3919 = vst [vmem:[#allocation16_spill] sm:$0xff] %v3283_v14  ;;  %v3285_v15 = vld [vmem:[#allocation5 + $0x1b0] sm:$0xff]  ;;  %v3297_v19 = vld [vmem:[#allocation5 + $0x1a8] sm:$0xff] }
 0x177   :  { %1147 = vmatprep.subr.mxu0 %v820_v38  ;;  %1218 = vmatprep.subr.mxu1 %v822_v40  ;;  %3920 = vst [vmem:[#allocation17_spill] sm:$0xff] %v3285_v15  ;;  %v3289_v16 = vld [vmem:[#allocation5 + $0x30] sm:$0xff]  ;;  %3923 = vst [vmem:[#allocation20_spill] sm:$0xff] %v3295_v18  ;;  %v3301_v20 = vld [vmem:[#allocation5 + $0x28] sm:$0xff] }
 0x178   :  { %1148 = vmatpush2.msra.mxu0 %v819_v42  ;;  %1219 = vmatpush2.msra.mxu1 %v821_v44  ;;  %3921 = vst [vmem:[#allocation18_spill] sm:$0xff] %v3289_v16  ;;  %v3291_v17 = vld [vmem:[#allocation5 + $0x130] sm:$0xff]  ;;  %3924 = vst [vmem:[#allocation21_spill] sm:$0xff] %v3297_v19  ;;  %v3303_v23 = vld [vmem:[#allocation5 + $0x128] sm:$0xff] }
 0x179   :  { %1150 = vmatmul.mubr.f32.vlgmr.msra.gmra.mxu0 %v3171_v46  ;;  %1221 = vmatmul.mubr.f32.vlgmr.msra.gmra.mxu1 %v3171_v46  ;;  %v3205_v46 = vld [vmem:[#allocation5 + $0x68] sm:$0xff]  ;;  %3922 = vst [vmem:[#allocation19_spill] sm:$0xff] %v3291_v17  ;;  %3925 = vst [vmem:[#allocation22_spill] sm:$0xff] %v3301_v20  ;;  %v3307_v24 = vld [vmem:[#allocation5 + $0xa0] sm:$0xff] }
 0x17a   :  { %2362 = vmatprep.subr.mxu0 %v3177_v47  ;;  %2397 = vmatprep.subr.mxu1 %v3179_v48  ;;  %3926 = vst [vmem:[#allocation23_spill] sm:$0xff] %v3303_v23  ;;  %3927 = vst [vmem:[#allocation24_spill] sm:$0xff] %v3307_v24  ;;  %v3309_v25 = vld [vmem:[#allocation5 + $0x1a0] sm:$0xff]  ;;  %v3319_v29 = vld [vmem:[#allocation5 + $0x98] sm:$0xff] }
 0x17b   :  { %2363 = vmatpush3.msra.mxu0 %v3181_v49  ;;  %2398 = vmatpush3.msra.mxu1 %v3183_v50  ;;  %3928 = vst [vmem:[#allocation25_spill] sm:$0xff] %v3309_v25  ;;  %v3313_v26 = vld [vmem:[#allocation5 + $0x20] sm:$0xff]  ;;  %3931 = vst [vmem:[#allocation28_spill] sm:$0xff] %v3319_v29  ;;  %v3321_v30 = vld [vmem:[#allocation5 + $0x198] sm:$0xff] }
 0x17c   :  { %2364 = vmatprep.subr.mxu0 %v3187_v51  ;;  %2399 = vmatprep.subr.mxu1 %v3189_v52  ;;  %3929 = vst [vmem:[#allocation26_spill] sm:$0xff] %v3313_v26  ;;  %v3315_v27 = vld [vmem:[#allocation5 + $0x120] sm:$0xff]  ;;  %3932 = vst [vmem:[#allocation29_spill] sm:$0xff] %v3321_v30  ;;  %v3325_v31 = vld [vmem:[#allocation5 + $0x18] sm:$0xff] }
 0x17d   :  { %2365 = vmatpush3.msra.mxu0 %v3193_v53  ;;  %2400 = vmatpush3.msra.mxu1 %v3195_v54  ;;  %3930 = vst [vmem:[#allocation27_spill] sm:$0xff] %v3315_v27  ;;  %3933 = vst [vmem:[#allocation30_spill] sm:$0xff] %v3325_v31  ;;  %v3327_v32 = vld [vmem:[#allocation5 + $0x118] sm:$0xff]  ;;  %v3331_v33 = vld [vmem:[#allocation5 + $0x90] sm:$0xff] }
 0x17e   :  { %2366 = vmatprep.subr.mxu0 %v3199_v22  ;;  %2401 = vmatprep.subr.mxu1 %v3201_v55  ;;  %3934 = vst [vmem:[#allocation31_spill] sm:$0xff] %v3327_v32  ;;  %3935 = vst [vmem:[#allocation32_spill] sm:$0xff] %v3331_v33  ;;  %v3333_v34 = vld [vmem:[#allocation5 + $0x190] sm:$0xff]  ;;  %v3343_v37 = vld [vmem:[#allocation5 + $0x88] sm:$0xff] }
 0x17f   :  { %2367 = vmatpush3.msra.mxu0 %v3205_v46  ;;  %2402 = vmatpush3.msra.mxu1 %v3207_v21  ;;  %3936 = vst [vmem:[#allocation33_spill] sm:$0xff] %v3333_v34  ;;  %v3337_v35 = vld [vmem:[#allocation5 + $0x10] sm:$0xff]  ;;  %3939 = vst [vmem:[#allocation36_spill] sm:$0xff] %v3343_v37  ;;  %v3345_v38 = vld [vmem:[#allocation5 + $0x188] sm:$0xff] }
 0x180   :  { %2368 = vmatprep.subr.mxu0 %v3211_v56  ;;  %2403 = vmatprep.subr.mxu1 %v3213_v28  ;;  %3937 = vst [vmem:[#allocation34_spill] sm:$0xff] %v3337_v35  ;;  %v3339_v36 = vld [vmem:[#allocation5 + $0x110] sm:$0xff]  ;;  %3940 = vst [vmem:[#allocation37_spill] sm:$0xff] %v3345_v38  ;;  %v3349_v39 = vld [vmem:[#allocation5 + $0x8] sm:$0xff] }
 0x181   :  { %2369 = vmatpush3.msra.mxu0 %v3217_v57  ;;  %2404 = vmatpush3.msra.mxu1 %v3219_v58  ;;  %3938 = vst [vmem:[#allocation35_spill] sm:$0xff] %v3339_v36  ;;  %3941 = vst [vmem:[#allocation38_spill] sm:$0xff] %v3349_v39  ;;  %v3351_v40 = vld [vmem:[#allocation5 + $0x108] sm:$0xff]  ;;  %v3355_v41 = vld [vmem:[#allocation5 + $0x80] sm:$0xff] }
 0x182   :  { %2370 = vmatprep.subr.mxu0 %v3223_v59  ;;  %2405 = vmatprep.subr.mxu1 %v3225_v60  ;;  %3942 = vst [vmem:[#allocation39_spill] sm:$0xff] %v3351_v40  ;;  %3943 = vst [vmem:[#allocation40_spill] sm:$0xff] %v3355_v41  ;;  %v3357_v42 = vld [vmem:[#allocation5 + $0x180] sm:$0xff] }
 0x183   :  { %2371 = vmatpush3.msra.mxu0 %v3229_v61  ;;  %2406 = vmatpush3.msra.mxu1 %v3231_v62  ;;  %3944 = vst [vmem:[#allocation41_spill] sm:$0xff] %v3357_v42  ;;  %v3361_v43 = vld [vmem:[#allocation5] sm:$0xff] }
 0x184   :  { %2372 = vmatprep.subr.mxu0 %v3235_v63  ;;  %2407 = vmatprep.subr.mxu1 %v3237_v0  ;;  %3945 = vst [vmem:[#allocation42_spill] sm:$0xff] %v3361_v43  ;;  %v3363_v44 = vld [vmem:[#allocation5 + $0x100] sm:$0xff] }
 0x185   :  { %2373 = vmatpush3.msra.mxu0 %v3241_v1  ;;  %2408 = vmatpush3.msra.mxu1 %v3243_v2  ;;  %3946 = vst [vmem:[#allocation43_spill] sm:$0xff] %v3363_v44 }
 0x186   :  { %2374 = vmatprep.subr.mxu0 %v3247_v3  ;;  %2409 = vmatprep.subr.mxu1 %v3249_v4 }
 0x187   :  { %2375 = vmatpush3.msra.mxu0 %v3253_v5  ;;  %2410 = vmatpush3.msra.mxu1 %v3255_v6 }
 0x188   :  { %2376 = vmatprep.subr.mxu0 %v3259_v7  ;;  %2411 = vmatprep.subr.mxu1 %v3261_v8 }
 0x189   :  { %2377 = vmatpush3.msra.mxu0 %v3265_v9  ;;  %2412 = vmatpush3.msra.mxu1 %v3267_v10 }
 0x18a   :  { %2378 = vmatprep.subr.mxu0 %v3271_v11  ;;  %2413 = vmatprep.subr.mxu1 %v3273_v12 }
 0x18b   :  { %2379 = vmatpush3.msra.mxu0 %v3277_v45  ;;  %2414 = vmatpush3.msra.mxu1 %v3279_v13 }
 0x18c   :  { %2380 = vmatprep.subr.mxu0 %v3283_v14  ;;  %2415 = vmatprep.subr.mxu1 %v3285_v15 }
 0x18d   :  { %2381 = vmatpush3.msra.mxu0 %v3289_v16  ;;  %2416 = vmatpush3.msra.mxu1 %v3291_v17 }
 0x18e   :  { %2382 = vmatprep.subr.mxu0 %v3295_v18  ;;  %2417 = vmatprep.subr.mxu1 %v3297_v19 }
 0x18f   :  { %2383 = vmatpush3.msra.mxu0 %v3301_v20  ;;  %2418 = vmatpush3.msra.mxu1 %v3303_v23 }
 0x190   :  { %2384 = vmatprep.subr.mxu0 %v3307_v24  ;;  %2419 = vmatprep.subr.mxu1 %v3309_v25 }
 0x191   :  { %2385 = vmatpush3.msra.mxu0 %v3313_v26  ;;  %2420 = vmatpush3.msra.mxu1 %v3315_v27 }
 0x192   :  { %2386 = vmatprep.subr.mxu0 %v3319_v29  ;;  %2421 = vmatprep.subr.mxu1 %v3321_v30 }
 0x193   :  { %2387 = vmatpush3.msra.mxu0 %v3325_v31  ;;  %2422 = vmatpush3.msra.mxu1 %v3327_v32 }
 0x194   :  { %2388 = vmatprep.subr.mxu0 %v3331_v33  ;;  %2423 = vmatprep.subr.mxu1 %v3333_v34  ;;  %v3367_v34 = vld [vmem:[#allocation5 + $0x2f8] sm:$0xff] }
 0x195   :  { %2389 = vmatpush3.msra.mxu0 %v3337_v35  ;;  %2424 = vmatpush3.msra.mxu1 %v3339_v36  ;;  %3947 = vst [vmem:[#allocation44_spill] sm:$0xff] %v3367_v34  ;;  %v3369_v35 = vld [vmem:[#allocation5 + $0x3f8] sm:$0xff] }
 0x196   :  { %2390 = vmatprep.subr.mxu0 %v3343_v37  ;;  %2425 = vmatprep.subr.mxu1 %v3345_v38  ;;  %3948 = vst [vmem:[#allocation45_spill] sm:$0xff] %v3369_v35  ;;  %v363_v38 = vlaneseq  ;;  %v540_v37 = vpop.f32.mrf.mxu1 }
 0x197   :  { %2391 = vmatpush3.msra.mxu0 %v3349_v39  ;;  %2426 = vmatpush3.msra.mxu1 %v3351_v40  ;;  %v469_v40 = vpop.f32.mrf.mxu0 }
 0x198   :  { %2392 = vmatprep.subr.mxu0 %v3355_v41  ;;  %2427 = vmatprep.subr.mxu1 %v3357_v42  ;;  %v3377_v39 = vshrl.u32 %v363_v38, 7  ;;  %v3384_v42 = vld [vmem:[%s3815_s3] sm:$0xff] }
 0x199   :  { %2393 = vmatpush3.msra.mxu0 %v3361_v43  ;;  %2428 = vmatpush3.msra.mxu1 %v3363_v44  ;;  %v471_v43 = vpop.f32.mrf.mxu0  ;;  %v542_v44 = vpop.f32.mrf.mxu1 }
 0x19a   :  { %2432 = vmatprep.subr.mxu0 %v3367_v34  ;;  %2467 = vmatprep.subr.mxu1 %v3369_v35  ;;  %v365_v36 = vsub.s32 0, %v3377_v39  ;;  %v373_v33 = vsub.s32 2, %v3377_v39  ;;  %v369_v34 = vsub.s32 1, %v3377_v39  ;;  %v377_v35 = vsub.s32 3, %v3377_v39 }
 0x19c   :  { %v366_v32 = vrot.slane %v3384_v42, %v365_v36  ;;  %v374_v31 = vrot.slane %v3384_v42, %v373_v33  ;;  %v370_v30 = vrot.slane %v3384_v42, %v369_v34  ;;  %v378_v29 = vrot.slane %v3384_v42, %v377_v35 }
 0x19e   :  { %v470_v25 = vadd.f32 %v469_v40, %v366_v32  ;;  %v541_v24 = vadd.f32 %v540_v37, %v374_v31  ;;  %v472_v15 = vadd.f32 %v471_v43, %v370_v30  ;;  %v543_v36 = vadd.f32 %v542_v44, %v378_v29  ;;  %v3408_v43 = vld [vmem:[#allocation5 + $0x278] sm:$0xff] }
 0x19f   :  { %v3410_v44 = vld [vmem:[#allocation5 + $0x378] sm:$0xff] }
 0x1b5   :  { %v3388_v41 = vpop.f32.mrf.mxu0  ;;  %v3390_v38 = vpop.f32.mrf.mxu1 }
 0x1b7   :  { %v3396_v27 = vpop.f32.mrf.mxu0  ;;  %v3398_v26 = vpop.f32.mrf.mxu1 }
 0x1f7   :  { %v1009_v23 = vpop.f32.mrf.mxu0  ;;  %v1080_v20 = vpop.f32.mrf.mxu1 }
 0x1f8   :  { %v1227_v19 = vsub.f32 %v470_v25, %v1009_v23  ;;  %v1243_v18 = vadd.f32 %v1009_v23, %v470_v25  ;;  %v1229_v17 = vsub.f32 %v541_v24, %v1080_v20  ;;  %v1245_v16 = vadd.f32 %v1080_v20, %v541_v24 }
 0x1f9   :  { %v1011_v14 = vpop.f32.mrf.mxu0  ;;  %v1082_v33 = vpop.f32.mrf.mxu1 }
 0x1fa   :  { %v1235_v13 = vmax.f32 %v1227_v19, 0.0  ;;  %v1251_v34 = vmax.f32 %v1243_v18, 0.0  ;;  %v1237_v45 = vmax.f32 %v1229_v17, 0.0  ;;  %v1253_v35 = vmax.f32 %v1245_v16, 0.0 }
 0x1fb   :  { %v1228_v12 = vsub.f32 %v472_v15, %v1011_v14  ;;  %v1244_v11 = vadd.f32 %v1011_v14, %v472_v15  ;;  %v1230_v10 = vsub.f32 %v543_v36, %v1082_v33  ;;  %v1246_v9 = vadd.f32 %v1082_v33, %v543_v36  ;;  %v3428_v36 = vld [vmem:[#allocation5 + $0x268] sm:$0xff] }
 0x1fc   :  { %v3400_v32 = vsub.f32 %v1251_v34, %v1235_v13  ;;  %v3402_v31 = vsub.f32 %v1253_v35, %v1237_v45  ;;  %v1300_v24 = vadd.f32 %v1251_v34, %v1235_v13  ;;  %v1302_v29 = vadd.f32 %v1253_v35, %v1237_v45  ;;  %v3422_v45 = vld [vmem:[#allocation5 + $0x2e8] sm:$0xff]  ;;  %3950 = vst [vmem:[#allocation47_spill] sm:$0xff] %v3428_v36  ;;  %v3434_v34 = vld [vmem:[#allocation5 + $0x2e0] sm:$0xff] }
 0x1fd   :  { %v1236_v37 = vmax.f32 %v1228_v12, 0.0  ;;  %v1252_v23 = vmax.f32 %v1244_v11, 0.0  ;;  %v1238_v25 = vmax.f32 %v1230_v10, 0.0  ;;  %v1254_v20 = vmax.f32 %v1246_v9, 0.0  ;;  %v3412_v10 = vld [vmem:[#allocation5 + $0x2f0] sm:$0xff]  ;;  %v3424_v13 = vld [vmem:[#allocation5 + $0x3e8] sm:$0xff] }
 0x1fe   :  { %v1308_v15 = vmul.f32 0.5, %v1300_v24  ;;  %v1310_v19 = vmul.f32 0.5, %v1302_v29  ;;  %v3414_v9 = vld [vmem:[#allocation5 + $0x3f0] sm:$0xff]  ;;  %3949 = vst [vmem:[#allocation46_spill] sm:$0xff] %v3424_v13  ;;  %v3430_v33 = vld [vmem:[#allocation5 + $0x368] sm:$0xff]  ;;  %3952 = vst [vmem:[#allocation49_spill] sm:$0xff] %v3434_v34 }
 0x1ff   :  { %v1301_v30 = vadd.f32 %v1252_v23, %v1236_v37  ;;  %v3404_v40 = vsub.f32 %v1252_v23, %v1236_v37  ;;  %v1303_v18 = vadd.f32 %v1254_v20, %v1238_v25  ;;  %v3406_v17 = vsub.f32 %v1254_v20, %v1238_v25  ;;  %v3416_v11 = vld [vmem:[#allocation5 + $0x270] sm:$0xff]  ;;  %3951 = vst [vmem:[#allocation48_spill] sm:$0xff] %v3430_v33  ;;  %v3436_v35 = vld [vmem:[#allocation5 + $0x3e0] sm:$0xff]  ;;  %v3446_v25 = vld [vmem:[#allocation5 + $0x2d8] sm:$0xff] }
 0x200   :  { %v3418_v12 = vld [vmem:[#allocation5 + $0x370] sm:$0xff]  ;;  %3953 = vst [vmem:[#allocation50_spill] sm:$0xff] %v3436_v35  ;;  %v3440_v37 = vld [vmem:[#allocation5 + $0x260] sm:$0xff]  ;;  %3956 = vst [vmem:[#allocation53_spill] sm:$0xff] %v3446_v25 }
 0x201   :  { %v1309_v16 = vmul.f32 0.5, %v1301_v30  ;;  %v1311_v14 = vmul.f32 0.5, %v1303_v18  ;;  %3954 = vst [vmem:[#allocation51_spill] sm:$0xff] %v3440_v37  ;;  %v3442_v23 = vld [vmem:[#allocation5 + $0x360] sm:$0xff]  ;;  %v3448_v20 = vld [vmem:[#allocation5 + $0x3d8] sm:$0xff]  ;;  %v3458_v30 = vld [vmem:[#allocation5 + $0x2d0] sm:$0xff] }
 0x202   :  { %3955 = vst [vmem:[#allocation52_spill] sm:$0xff] %v3442_v23  ;;  %3957 = vst [vmem:[#allocation54_spill] sm:$0xff] %v3448_v20  ;;  %v3452_v24 = vld [vmem:[#allocation5 + $0x258] sm:$0xff]  ;;  %v3460_v18 = vld [vmem:[#allocation5 + $0x3d0] sm:$0xff] }
 0x203   :  { %1531 = vmatprep.mubr.f32.mxu0 %v1309_v16  ;;  %1601 = vmatprep.mubr.f32.mxu1 %v1311_v14  ;;  %3958 = vst [vmem:[#allocation55_spill] sm:$0xff] %v3452_v24  ;;  %v3454_v29 = vld [vmem:[#allocation5 + $0x358] sm:$0xff]  ;;  %3960 = vst [vmem:[#allocation57_spill] sm:$0xff] %v3458_v30  ;;  %v3464_v16 = vld [vmem:[#allocation5 + $0x250] sm:$0xff] }
 0x204   :  { %1532 = vmatmul.mubr.f32.vlgmr.msra.gmra.mxu0 %v1308_v15  ;;  %1602 = vmatmul.mubr.f32.vlgmr.msra.gmra.mxu1 %v1310_v19  ;;  %3959 = vst [vmem:[#allocation56_spill] sm:$0xff] %v3454_v29  ;;  %3961 = vst [vmem:[#allocation58_spill] sm:$0xff] %v3460_v18  ;;  %v3466_v14 = vld [vmem:[#allocation5 + $0x350] sm:$0xff]  ;;  %v3470_v15 = vld [vmem:[#allocation5 + $0x2c8] sm:$0xff] }
 0x205   :  { %2433 = vmatpush3.msra.mxu0 %v3408_v43  ;;  %2468 = vmatpush3.msra.mxu1 %v3410_v44  ;;  %3962 = vst [vmem:[#allocation59_spill] sm:$0xff] %v3464_v16  ;;  %3963 = vst [vmem:[#allocation60_spill] sm:$0xff] %v3466_v14  ;;  %v3472_v19 = vld [vmem:[#allocation5 + $0x3c8] sm:$0xff] }
 0x206   :  { %2434 = vmatprep.subr.mxu0 %v3412_v10  ;;  %2469 = vmatprep.subr.mxu1 %v3414_v9  ;;  %3964 = vst [vmem:[#allocation61_spill] sm:$0xff] %v3470_v15  ;;  %3965 = vst [vmem:[#allocation62_spill] sm:$0xff] %v3472_v19 }
 0x207   :  { %2435 = vmatpush3.msra.mxu0 %v3416_v11  ;;  %2470 = vmatpush3.msra.mxu1 %v3418_v12 }
 0x208   :  { %2436 = vmatprep.subr.mxu0 %v3422_v45  ;;  %2471 = vmatprep.subr.mxu1 %v3424_v13 }
 0x209   :  { %2437 = vmatpush3.msra.mxu0 %v3428_v36  ;;  %2472 = vmatpush3.msra.mxu1 %v3430_v33 }
 0x20a   :  { %2438 = vmatprep.subr.mxu0 %v3434_v34  ;;  %2473 = vmatprep.subr.mxu1 %v3436_v35 }
 0x20b   :  { %2439 = vmatpush3.msra.mxu0 %v3440_v37  ;;  %2474 = vmatpush3.msra.mxu1 %v3442_v23  ;;  %v3476_v23 = vld [vmem:[#allocation5 + $0x248] sm:$0xff]  ;;  %v1810_v37 = vand.u32 2147483647, %v3179_v48  ;;  %v389_v48 = vsub.s32 6, %v3377_v39 }
 0x20c   :  { %2440 = vmatprep.subr.mxu0 %v3446_v25  ;;  %2475 = vmatprep.subr.mxu1 %v3448_v20  ;;  %3966 = vst [vmem:[#allocation63_spill] sm:$0xff] %v3476_v23  ;;  %v3478_v25 = vld [vmem:[#allocation5 + $0x348] sm:$0xff]  ;;  %v3482_v20 = vld [vmem:[#allocation5 + $0x2c0] sm:$0xff] }
 0x20d   :  { %2441 = vmatpush3.msra.mxu0 %v3452_v24  ;;  %2476 = vmatpush3.msra.mxu1 %v3454_v29  ;;  %3967 = vst [vmem:[#allocation64_spill] sm:$0xff] %v3478_v25  ;;  %3968 = vst [vmem:[#allocation65_spill] sm:$0xff] %v3482_v20  ;;  %v3484_v24 = vld [vmem:[#allocation5 + $0x3c0] sm:$0xff] }
 0x20e   :  { %2442 = vmatprep.subr.mxu0 %v3458_v30  ;;  %2477 = vmatprep.subr.mxu1 %v3460_v18  ;;  %3969 = vst [vmem:[#allocation66_spill] sm:$0xff] %v3484_v24  ;;  %v3488_v29 = vld [vmem:[#allocation5 + $0x240] sm:$0xff]  ;;  %v3494_v18 = vld [vmem:[#allocation5 + $0x2b8] sm:$0xff] }
 0x20f   :  { %2443 = vmatpush3.msra.mxu0 %v3464_v16  ;;  %2478 = vmatpush3.msra.mxu1 %v3466_v14  ;;  %3970 = vst [vmem:[#allocation67_spill] sm:$0xff] %v3488_v29  ;;  %v3490_v30 = vld [vmem:[#allocation5 + $0x340] sm:$0xff]  ;;  %3972 = vst [vmem:[#allocation69_spill] sm:$0xff] %v3494_v18  ;;  %v3496_v16 = vld [vmem:[#allocation5 + $0x3b8] sm:$0xff] }
 0x210   :  { %2444 = vmatprep.subr.mxu0 %v3470_v15  ;;  %2479 = vmatprep.subr.mxu1 %v3472_v19  ;;  %3971 = vst [vmem:[#allocation68_spill] sm:$0xff] %v3490_v30  ;;  %3973 = vst [vmem:[#allocation70_spill] sm:$0xff] %v3496_v16  ;;  %v3500_v14 = vld [vmem:[#allocation5 + $0x238] sm:$0xff]  ;;  %v3506_v19 = vld [vmem:[#allocation5 + $0x2b0] sm:$0xff] }
 0x211   :  { %2445 = vmatpush3.msra.mxu0 %v3476_v23  ;;  %2480 = vmatpush3.msra.mxu1 %v3478_v25  ;;  %3974 = vst [vmem:[#allocation71_spill] sm:$0xff] %v3500_v14  ;;  %v3502_v15 = vld [vmem:[#allocation5 + $0x338] sm:$0xff]  ;;  %3976 = vst [vmem:[#allocation73_spill] sm:$0xff] %v3506_v19  ;;  %v3508_v23 = vld [vmem:[#allocation5 + $0x3b0] sm:$0xff] }
 0x212   :  { %2446 = vmatprep.subr.mxu0 %v3482_v20  ;;  %2481 = vmatprep.subr.mxu1 %v3484_v24  ;;  %3975 = vst [vmem:[#allocation72_spill] sm:$0xff] %v3502_v15  ;;  %3977 = vst [vmem:[#allocation74_spill] sm:$0xff] %v3508_v23  ;;  %v3512_v25 = vld [vmem:[#allocation5 + $0x230] sm:$0xff]  ;;  %v3518_v24 = vld [vmem:[#allocation5 + $0x2a8] sm:$0xff] }
 0x213   :  { %2447 = vmatpush3.msra.mxu0 %v3488_v29  ;;  %2482 = vmatpush3.msra.mxu1 %v3490_v30  ;;  %3978 = vst [vmem:[#allocation75_spill] sm:$0xff] %v3512_v25  ;;  %v3514_v20 = vld [vmem:[#allocation5 + $0x330] sm:$0xff]  ;;  %3980 = vst [vmem:[#allocation77_spill] sm:$0xff] %v3518_v24  ;;  %v3520_v29 = vld [vmem:[#allocation5 + $0x3a8] sm:$0xff] }
 0x214   :  { %2448 = vmatprep.subr.mxu0 %v3494_v18  ;;  %2483 = vmatprep.subr.mxu1 %v3496_v16  ;;  %3979 = vst [vmem:[#allocation76_spill] sm:$0xff] %v3514_v20  ;;  %3981 = vst [vmem:[#allocation78_spill] sm:$0xff] %v3520_v29  ;;  %v3524_v30 = vld [vmem:[#allocation5 + $0x228] sm:$0xff]  ;;  %v3530_v16 = vld [vmem:[#allocation5 + $0x2a0] sm:$0xff] }
 0x215   :  { %2449 = vmatpush3.msra.mxu0 %v3500_v14  ;;  %2484 = vmatpush3.msra.mxu1 %v3502_v15  ;;  %3982 = vst [vmem:[#allocation79_spill] sm:$0xff] %v3524_v30  ;;  %v3526_v18 = vld [vmem:[#allocation5 + $0x328] sm:$0xff]  ;;  %3984 = vst [vmem:[#allocation81_spill] sm:$0xff] %v3530_v16  ;;  %v3532_v14 = vld [vmem:[#allocation5 + $0x3a0] sm:$0xff] }
 0x216   :  { %2450 = vmatprep.subr.mxu0 %v3506_v19  ;;  %2485 = vmatprep.subr.mxu1 %v3508_v23  ;;  %3983 = vst [vmem:[#allocation80_spill] sm:$0xff] %v3526_v18  ;;  %3985 = vst [vmem:[#allocation82_spill] sm:$0xff] %v3532_v14  ;;  %v3536_v15 = vld [vmem:[#allocation5 + $0x220] sm:$0xff]  ;;  %v3542_v23 = vld [vmem:[#allocation5 + $0x298] sm:$0xff] }
 0x217   :  { %2451 = vmatpush3.msra.mxu0 %v3512_v25  ;;  %2486 = vmatpush3.msra.mxu1 %v3514_v20  ;;  %3986 = vst [vmem:[#allocation83_spill] sm:$0xff] %v3536_v15  ;;  %v3538_v19 = vld [vmem:[#allocation5 + $0x320] sm:$0xff]  ;;  %3988 = vst [vmem:[#allocation85_spill] sm:$0xff] %v3542_v23  ;;  %v3544_v25 = vld [vmem:[#allocation5 + $0x398] sm:$0xff] }
 0x218   :  { %2452 = vmatprep.subr.mxu0 %v3518_v24  ;;  %2487 = vmatprep.subr.mxu1 %v3520_v29  ;;  %3987 = vst [vmem:[#allocation84_spill] sm:$0xff] %v3538_v19  ;;  %3989 = vst [vmem:[#allocation86_spill] sm:$0xff] %v3544_v25  ;;  %v3548_v20 = vld [vmem:[#allocation5 + $0x218] sm:$0xff]  ;;  %v3554_v29 = vld [vmem:[#allocation5 + $0x290] sm:$0xff] }
 0x219   :  { %2453 = vmatpush3.msra.mxu0 %v3524_v30  ;;  %2488 = vmatpush3.msra.mxu1 %v3526_v18  ;;  %3990 = vst [vmem:[#allocation87_spill] sm:$0xff] %v3548_v20  ;;  %v3550_v24 = vld [vmem:[#allocation5 + $0x318] sm:$0xff]  ;;  %3992 = vst [vmem:[#allocation89_spill] sm:$0xff] %v3554_v29  ;;  %v3556_v30 = vld [vmem:[#allocation5 + $0x390] sm:$0xff] }
 0x21a   :  { %2454 = vmatprep.subr.mxu0 %v3530_v16  ;;  %2489 = vmatprep.subr.mxu1 %v3532_v14  ;;  %3991 = vst [vmem:[#allocation88_spill] sm:$0xff] %v3550_v24  ;;  %3993 = vst [vmem:[#allocation90_spill] sm:$0xff] %v3556_v30  ;;  %v3560_v18 = vld [vmem:[#allocation5 + $0x210] sm:$0xff]  ;;  %v3566_v14 = vld [vmem:[#allocation5 + $0x288] sm:$0xff] }
 0x21b   :  { %2455 = vmatpush3.msra.mxu0 %v3536_v15  ;;  %2490 = vmatpush3.msra.mxu1 %v3538_v19  ;;  %3994 = vst [vmem:[#allocation91_spill] sm:$0xff] %v3560_v18  ;;  %v3562_v16 = vld [vmem:[#allocation5 + $0x310] sm:$0xff]  ;;  %3996 = vst [vmem:[#allocation93_spill] sm:$0xff] %v3566_v14  ;;  %v3568_v15 = vld [vmem:[#allocation5 + $0x388] sm:$0xff] }
 0x21c   :  { %2456 = vmatprep.subr.mxu0 %v3542_v23  ;;  %2491 = vmatprep.subr.mxu1 %v3544_v25  ;;  %3995 = vst [vmem:[#allocation92_spill] sm:$0xff] %v3562_v16  ;;  %3997 = vst [vmem:[#allocation94_spill] sm:$0xff] %v3568_v15  ;;  %v3572_v19 = vld [vmem:[#allocation5 + $0x208] sm:$0xff]  ;;  %v3578_v25 = vld [vmem:[#allocation5 + $0x280] sm:$0xff] }
 0x21d   :  { %2457 = vmatpush3.msra.mxu0 %v3548_v20  ;;  %2492 = vmatpush3.msra.mxu1 %v3550_v24  ;;  %3998 = vst [vmem:[#allocation95_spill] sm:$0xff] %v3572_v19  ;;  %v3574_v23 = vld [vmem:[#allocation5 + $0x308] sm:$0xff]  ;;  %4000 = vst [vmem:[#allocation97_spill] sm:$0xff] %v3578_v25  ;;  %v3580_v20 = vld [vmem:[#allocation5 + $0x380] sm:$0xff]  ;;  %v1778_v24 = vand.u32 2147483647, %v3177_v47 }
 0x21e   :  { %2458 = vmatprep.subr.mxu0 %v3554_v29  ;;  %2493 = vmatprep.subr.mxu1 %v3556_v30  ;;  %3999 = vst [vmem:[#allocation96_spill] sm:$0xff] %v3574_v23  ;;  %4001 = vst [vmem:[#allocation98_spill] sm:$0xff] %v3580_v20  ;;  %v3586_v30 = vld [vmem:[#allocation5 + $0x200] sm:$0xff]  ;;  %v381_v47 = vsub.s32 4, %v3377_v39 }
 0x21f   :  { %2459 = vmatpush3.msra.mxu0 %v3560_v18  ;;  %2494 = vmatpush3.msra.mxu1 %v3562_v16  ;;  %4002 = vst [vmem:[#allocation99_spill] sm:$0xff] %v3586_v30  ;;  %v3588_v29 = vld [vmem:[#allocation5 + $0x300] sm:$0xff] }
 0x220   :  { %2460 = vmatprep.subr.mxu0 %v3566_v14  ;;  %2495 = vmatprep.subr.mxu1 %v3568_v15  ;;  %4003 = vst [vmem:[#allocation100_spill] sm:$0xff] %v3588_v29  ;;  %v385_v15 = vsub.s32 5, %v3377_v39 }
 0x221   :  { %2461 = vmatpush3.msra.mxu0 %v3572_v19  ;;  %2496 = vmatpush3.msra.mxu1 %v3574_v23  ;;  %v393_v19 = vsub.s32 7, %v3377_v39  ;;  %v382_v23 = vrot.slane %v3384_v42, %v381_v47 }
 0x222   :  { %2462 = vmatprep.subr.mxu0 %v3578_v25  ;;  %2497 = vmatprep.subr.mxu1 %v3580_v20  ;;  %v390_v25 = vrot.slane %v3384_v42, %v389_v48  ;;  %v386_v20 = vrot.slane %v3384_v42, %v385_v15 }
 0x223   :  { %2463 = vmatpush3.msra.mxu0 %v3586_v30  ;;  %2498 = vmatpush3.msra.mxu1 %v3588_v29  ;;  %v394_v30 = vrot.slane %v3384_v42, %v393_v19  ;;  %v612_v29 = vadd.f32 %v3388_v41, %v382_v23 }
 0x224   :  { %2502 = vmatprep.subr.mxu0 %v1778_v24  ;;  %2537 = vmatprep.subr.mxu1 %v1810_v37  ;;  %v683_v37 = vadd.f32 %v3390_v38, %v390_v25  ;;  %v614_v39 = vadd.f32 %v3396_v27, %v386_v20 }
 0x225   :  { %v685_v47 = vadd.f32 %v3398_v26, %v394_v30 }
 0x239   :  { %v1151_v24 = vpop.f32.mrf.mxu0  ;;  %v1222_v14 = vpop.f32.mrf.mxu1 }
 0x23a   :  { %v1231_v16 = vsub.f32 %v612_v29, %v1151_v24  ;;  %v1247_v18 = vadd.f32 %v1151_v24, %v612_v29  ;;  %v1233_v35 = vsub.f32 %v683_v37, %v1222_v14  ;;  %v1249_v34 = vadd.f32 %v1222_v14, %v683_v37 }
 0x23b   :  { %v1153_v33 = vpop.f32.mrf.mxu0  ;;  %v1224_v48 = vpop.f32.mrf.mxu1 }
 0x23c   :  { %v1239_v36 = vmax.f32 %v1231_v16, 0.0  ;;  %v1255_v15 = vmax.f32 %v1247_v18, 0.0  ;;  %v1241_v13 = vmax.f32 %v1233_v35, 0.0  ;;  %v1257_v42 = vmax.f32 %v1249_v34, 0.0 }
 0x23d   :  { %v1232_v19 = vsub.f32 %v614_v39, %v1153_v33  ;;  %v3608_v41 = vadd.f32 %v1153_v33, %v614_v39  ;;  %v1234_v38 = vsub.f32 %v685_v47, %v1224_v48  ;;  %v3610_v23 = vadd.f32 %v1224_v48, %v685_v47 }
 0x23e   :  { %v3612_v25 = vsub.f32 %v1255_v15, %v1239_v36  ;;  %v3614_v29 = vsub.f32 %v1257_v42, %v1241_v13  ;;  %v1304_v35 = vadd.f32 %v1255_v15, %v1239_v36  ;;  %v1306_v34 = vadd.f32 %v1257_v42, %v1241_v13 }
 0x23f   :  { %v3616_v14 = vmax.f32 %v1232_v19, 0.0  ;;  %v1256_v26 = vmax.f32 %v3608_v41, 0.0  ;;  %v3619_v27 = vmax.f32 %v1234_v38, 0.0  ;;  %v1258_v20 = vmax.f32 %v3610_v23, 0.0  ;;  %v4005_v38 = vld [vmem:[#allocation11_spill] sm:$0xff] }
 0x240   :  { %v1762_v18 = vand.u32 2147483647, %v3181_v49  ;;  %v1794_v16 = vand.u32 2147483647, %v3183_v50  ;;  %v1777_v39 = vand.u32 2147483647, %v3187_v51 }
 0x241   :  { %v1305_v33 = vadd.f32 %v1256_v26, %v3616_v14  ;;  %v1307_v30 = vadd.f32 %v1258_v20, %v3619_v27  ;;  %v1312_v47 = vmul.f32 0.5, %v1304_v35  ;;  %v1314_v48 = vmul.f32 0.5, %v1306_v34  ;;  %v4007_v34 = vld [vmem:[#allocation13_spill] sm:$0xff] }
 0x242   :  { %v1809_v13 = vand.u32 2147483647, %v3189_v52  ;;  %v1761_v36 = vand.u32 2147483647, %v3193_v53  ;;  %v1793_v15 = vand.u32 2147483647, %v3195_v54 }
 0x243   :  { %v1313_v37 = vmul.f32 0.5, %v1305_v33  ;;  %v1315_v24 = vmul.f32 0.5, %v1307_v30  ;;  %v1325_v49 = vmul.f32 0.5, %v3404_v40  ;;  %v1776_v50 = vand.u32 2147483647, %v3199_v22  ;;  %v4009_v30 = vld [vmem:[#allocation15_spill] sm:$0xff] }
 0x244   :  { %v1808_v42 = vand.u32 2147483647, %v3201_v55  ;;  %v1327_v51 = vmul.f32 0.5, %v3406_v17  ;;  %v1760_v52 = vand.u32 2147483647, %v3205_v46 }
 0x245   :  { %1671 = vmatprep.mubr.f32.mxu0 %v1313_v37  ;;  %1741 = vmatprep.mubr.f32.mxu1 %v1315_v24  ;;  %v1792_v19 = vand.u32 2147483647, %v3207_v21  ;;  %v1775_v53 = vand.u32 2147483647, %v3211_v56  ;;  %v1807_v54 = vand.u32 2147483647, %v3213_v28 }
 0x246   :  { %1672 = vmatmul.mubr.f32.vlgmr.msra.gmra.mxu0 %v1312_v47  ;;  %1742 = vmatmul.mubr.f32.vlgmr.msra.gmra.mxu1 %v1314_v48  ;;  %v1759_v22 = vand.u32 2147483647, %v3217_v57  ;;  %v1791_v55 = vand.u32 2147483647, %v3219_v58  ;;  %v1774_v40 = vand.u32 2147483647, %v3223_v59 }
 0x247   :  { %2503 = vmatpush3.msra.mxu0 %v1762_v18  ;;  %2538 = vmatpush3.msra.mxu1 %v1794_v16  ;;  %v1806_v46 = vand.u32 2147483647, %v3225_v60  ;;  %v1758_v21 = vand.u32 2147483647, %v3229_v61  ;;  %v1790_v56 = vand.u32 2147483647, %v3231_v62 }
 0x248   :  { %2504 = vmatprep.subr.mxu0 %v1777_v39  ;;  %1939 = vmatprep.mubr.f32.mxu0 %v1325_v49  ;;  %v1773_v28 = vand.u32 2147483647, %v3235_v63  ;;  %v1805_v57 = vand.u32 2147483647, %v3237_v0  ;;  %v1757_v58 = vand.u32 2147483647, %v3241_v1 }
 0x249   :  { %2539 = vmatprep.subr.mxu1 %v1809_v13  ;;  %2009 = vmatprep.mubr.f32.mxu1 %v1327_v51  ;;  %v1789_v59 = vand.u32 2147483647, %v3243_v2  ;;  %v1772_v60 = vand.u32 2147483647, %v3247_v3  ;;  %v1804_v61 = vand.u32 2147483647, %v3249_v4 }
 0x24a   :  { %2505 = vmatpush3.msra.mxu0 %v1761_v36  ;;  %2540 = vmatpush3.msra.mxu1 %v1793_v15  ;;  %v1756_v62 = vand.u32 2147483647, %v3253_v5  ;;  %v1788_v63 = vand.u32 2147483647, %v3255_v6  ;;  %v1771_v0 = vand.u32 2147483647, %v3259_v7 }
 0x24b   :  { %2506 = vmatprep.subr.mxu0 %v1776_v50  ;;  %2541 = vmatprep.subr.mxu1 %v1808_v42  ;;  %v1803_v1 = vand.u32 2147483647, %v3261_v8  ;;  %v4004_v2 = vld [vmem:[#allocation10_spill] sm:$0xff]  ;;  %v1787_v3 = vand.u32 2147483647, %v4005_v38  ;;  %v4006_v4 = vld [vmem:[#allocation12_spill] sm:$0xff] }
 0x24c   :  { %2507 = vmatpush3.msra.mxu0 %v1760_v52  ;;  %2542 = vmatpush3.msra.mxu1 %v1792_v19  ;;  %v1755_v17 = vand.u32 2147483647, %v4004_v2  ;;  %v1770_v35 = vand.u32 2147483647, %v4006_v4  ;;  %v1802_v5 = vand.u32 2147483647, %v4007_v34 }
 0x24d   :  { %2508 = vmatprep.subr.mxu0 %v1775_v53  ;;  %2543 = vmatprep.subr.mxu1 %v1807_v54  ;;  %v4008_v6 = vld [vmem:[#allocation14_spill] sm:$0xff]  ;;  %v1786_v7 = vand.u32 2147483647, %v4009_v30  ;;  %v4010_v8 = vld [vmem:[#allocation16_spill] sm:$0xff]  ;;  %v4011_v16 = vld [vmem:[#allocation17_spill] sm:$0xff] }
 0x24e   :  { %2509 = vmatpush3.msra.mxu0 %v1759_v22  ;;  %2544 = vmatpush3.msra.mxu1 %v1791_v55  ;;  %v1754_v33 = vand.u32 2147483647, %v4008_v6  ;;  %v1769_v18 = vand.u32 2147483647, %v4010_v8  ;;  %v1801_v37 = vand.u32 2147483647, %v4011_v16 }
 0x24f   :  { %2510 = vmatprep.subr.mxu0 %v1774_v40  ;;  %2545 = vmatprep.subr.mxu1 %v1806_v46  ;;  %v4012_v24 = vld [vmem:[#allocation18_spill] sm:$0xff]  ;;  %v4013_v47 = vld [vmem:[#allocation19_spill] sm:$0xff]  ;;  %v4014_v13 = vld [vmem:[#allocation20_spill] sm:$0xff]  ;;  %v1858_v41 = vand.u32 2147483647, %v3410_v44 }
 0x250   :  { %2511 = vmatpush3.msra.mxu0 %v1758_v21  ;;  %2546 = vmatpush3.msra.mxu1 %v1790_v56  ;;  %v1753_v39 = vand.u32 2147483647, %v4012_v24  ;;  %v1785_v48 = vand.u32 2147483647, %v4013_v47  ;;  %v1768_v36 = vand.u32 2147483647, %v4014_v13 }
 0x251   :  { %2512 = vmatprep.subr.mxu0 %v1773_v28  ;;  %2547 = vmatprep.subr.mxu1 %v1805_v57  ;;  %v4015_v15 = vld [vmem:[#allocation21_spill] sm:$0xff]  ;;  %v4016_v50 = vld [vmem:[#allocation22_spill] sm:$0xff]  ;;  %v4017_v51 = vld [vmem:[#allocation23_spill] sm:$0xff] }
 0x252   :  { %2513 = vmatpush3.msra.mxu0 %v1757_v58  ;;  %2548 = vmatpush3.msra.mxu1 %v1789_v59  ;;  %v1800_v49 = vand.u32 2147483647, %v4015_v15  ;;  %v1752_v42 = vand.u32 2147483647, %v4016_v50  ;;  %v1784_v52 = vand.u32 2147483647, %v4017_v51  ;;  %v1323_v51 = vsub.f32 %v1258_v20, %v3619_v27 }
 0x253   :  { %2514 = vmatprep.subr.mxu0 %v1772_v60  ;;  %2549 = vmatprep.subr.mxu1 %v1804_v61  ;;  %v4018_v19 = vld [vmem:[#allocation24_spill] sm:$0xff]  ;;  %v4019_v54 = vld [vmem:[#allocation25_spill] sm:$0xff]  ;;  %v4020_v55 = vld [vmem:[#allocation26_spill] sm:$0xff]  ;;  %v1825_v27 = vand.u32 2147483647, %v3416_v11 }
 0x254   :  { %2515 = vmatpush3.msra.mxu0 %v1756_v62  ;;  %2550 = vmatpush3.msra.mxu1 %v1788_v63  ;;  %v1767_v53 = vand.u32 2147483647, %v4018_v19  ;;  %v1799_v22 = vand.u32 2147483647, %v4019_v54  ;;  %v1751_v40 = vand.u32 2147483647, %v4020_v55 }
 0x255   :  { %2516 = vmatprep.subr.mxu0 %v1771_v0  ;;  %2551 = vmatprep.subr.mxu1 %v1803_v1  ;;  %v4021_v46 = vld [vmem:[#allocation27_spill] sm:$0xff]  ;;  %v4022_v56 = vld [vmem:[#allocation28_spill] sm:$0xff]  ;;  %v4023_v57 = vld [vmem:[#allocation29_spill] sm:$0xff]  ;;  %v1326_v19 = vmul.f32 0.5, %v3402_v31  ;;  %v1331_v31 = vmul.f32 0.5, %v1323_v51 }
 0x256   :  { %2517 = vmatpush3.msra.mxu0 %v1755_v17  ;;  %2552 = vmatpush3.msra.mxu1 %v1787_v3  ;;  %v1783_v21 = vand.u32 2147483647, %v4021_v46  ;;  %v1766_v28 = vand.u32 2147483647, %v4022_v56  ;;  %v1798_v58 = vand.u32 2147483647, %v4023_v57 }
 0x257   :  { %2518 = vmatprep.subr.mxu0 %v1770_v35  ;;  %2553 = vmatprep.subr.mxu1 %v1802_v5  ;;  %v4024_v59 = vld [vmem:[#allocation30_spill] sm:$0xff]  ;;  %v4025_v61 = vld [vmem:[#allocation31_spill] sm:$0xff]  ;;  %v4026_v63 = vld [vmem:[#allocation32_spill] sm:$0xff] }
 0x258   :  { %2519 = vmatpush3.msra.mxu0 %v1754_v33  ;;  %2554 = vmatpush3.msra.mxu1 %v1786_v7  ;;  %v1750_v60 = vand.u32 2147483647, %v4024_v59  ;;  %v1782_v62 = vand.u32 2147483647, %v4025_v61  ;;  %v1765_v0 = vand.u32 2147483647, %v4026_v63 }
 0x259   :  { %2520 = vmatprep.subr.mxu0 %v1769_v18  ;;  %2555 = vmatprep.subr.mxu1 %v1801_v37  ;;  %v4027_v1 = vld [vmem:[#allocation33_spill] sm:$0xff]  ;;  %v4028_v17 = vld [vmem:[#allocation34_spill] sm:$0xff]  ;;  %v4029_v3 = vld [vmem:[#allocation35_spill] sm:$0xff] }
 0x25a   :  { %2521 = vmatpush3.msra.mxu0 %v1753_v39  ;;  %2556 = vmatpush3.msra.mxu1 %v1785_v48  ;;  %v1797_v2 = vand.u32 2147483647, %v4027_v1  ;;  %v1749_v38 = vand.u32 2147483647, %v4028_v17  ;;  %v1781_v4 = vand.u32 2147483647, %v4029_v3 }
 0x25b   :  { %2522 = vmatprep.subr.mxu0 %v1768_v36  ;;  %2557 = vmatprep.subr.mxu1 %v1800_v49  ;;  %v4030_v35 = vld [vmem:[#allocation36_spill] sm:$0xff]  ;;  %v4031_v5 = vld [vmem:[#allocation37_spill] sm:$0xff]  ;;  %v4032_v33 = vld [vmem:[#allocation38_spill] sm:$0xff]  ;;  %v1321_v36 = vsub.f32 %v1256_v26, %v3616_v14  ;;  %v1841_v14 = vand.u32 2147483647, %v3412_v10 }
 0x25c   :  { %2523 = vmatpush3.msra.mxu0 %v1752_v42  ;;  %2558 = vmatpush3.msra.mxu1 %v1784_v52  ;;  %v1764_v34 = vand.u32 2147483647, %v4030_v35  ;;  %v1796_v6 = vand.u32 2147483647, %v4031_v5  ;;  %v1748_v30 = vand.u32 2147483647, %v4032_v33 }
 0x25d   :  { %2524 = vmatprep.subr.mxu0 %v1767_v53  ;;  %2559 = vmatprep.subr.mxu1 %v1799_v22  ;;  %v4033_v7 = vld [vmem:[#allocation39_spill] sm:$0xff]  ;;  %v4034_v18 = vld [vmem:[#allocation40_spill] sm:$0xff]  ;;  %v4035_v37 = vld [vmem:[#allocation41_spill] sm:$0xff]  ;;  %v1324_v52 = vmul.f32 0.5, %v3400_v32  ;;  %v1826_v53 = vand.u32 2147483647, %v3408_v43 }
 0x25e   :  { %2525 = vmatpush3.msra.mxu0 %v1751_v40  ;;  %2560 = vmatpush3.msra.mxu1 %v1783_v21  ;;  %v1780_v8 = vand.u32 2147483647, %v4033_v7  ;;  %v1763_v16 = vand.u32 2147483647, %v4034_v18  ;;  %v1795_v24 = vand.u32 2147483647, %v4035_v37 }
 0x25f   :  { %2526 = vmatprep.subr.mxu0 %v1766_v28  ;;  %2561 = vmatprep.subr.mxu1 %v1798_v58  ;;  %v4036_v39 = vld [vmem:[#allocation42_spill] sm:$0xff]  ;;  %v4037_v48 = vld [vmem:[#allocation43_spill] sm:$0xff]  ;;  %v4038_v15 = vld [vmem:[#allocation44_spill] sm:$0xff]  ;;  %v1873_v26 = vand.u32 2147483647, %v3414_v9  ;;  %v1329_v23 = vmul.f32 0.5, %v1321_v36 }
 0x260   :  { %2527 = vmatpush3.msra.mxu0 %v1750_v60  ;;  %2562 = vmatpush3.msra.mxu1 %v1782_v62  ;;  %v1747_v47 = vand.u32 2147483647, %v4036_v39  ;;  %v1779_v13 = vand.u32 2147483647, %v4037_v48  ;;  %v1842_v49 = vand.u32 2147483647, %v4038_v15 }
 0x261   :  { %2528 = vmatprep.subr.mxu0 %v1765_v0  ;;  %2563 = vmatprep.subr.mxu1 %v1797_v2  ;;  %v4039_v50 = vld [vmem:[#allocation45_spill] sm:$0xff]  ;;  %v1857_v32 = vand.u32 2147483647, %v3418_v12  ;;  %v1840_v43 = vand.u32 2147483647, %v3422_v45  ;;  %v4040_v20 = vld [vmem:[#allocation46_spill] sm:$0xff] }
 0x262   :  { %2529 = vmatpush3.msra.mxu0 %v1749_v38  ;;  %2564 = vmatpush3.msra.mxu1 %v1781_v4  ;;  %v1874_v42 = vand.u32 2147483647, %v4039_v50  ;;  %v1872_v44 = vand.u32 2147483647, %v4040_v20  ;;  %v4041_v54 = vld [vmem:[#allocation47_spill] sm:$0xff]  ;;  %v4042_v22 = vld [vmem:[#allocation48_spill] sm:$0xff] }
 0x263   :  { %2530 = vmatprep.subr.mxu0 %v1764_v34  ;;  %2565 = vmatprep.subr.mxu1 %v1796_v6  ;;  %v1824_v10 = vand.u32 2147483647, %v4041_v54  ;;  %v1856_v9 = vand.u32 2147483647, %v4042_v22  ;;  %v4043_v55 = vld [vmem:[#allocation49_spill] sm:$0xff]  ;;  %v4044_v11 = vld [vmem:[#allocation50_spill] sm:$0xff] }
 0x264   :  { %2531 = vmatpush3.msra.mxu0 %v1748_v30  ;;  %2566 = vmatpush3.msra.mxu1 %v1780_v8  ;;  %v1839_v40 = vand.u32 2147483647, %v4043_v55  ;;  %v1871_v46 = vand.u32 2147483647, %v4044_v11  ;;  %v4045_v12 = vld [vmem:[#allocation51_spill] sm:$0xff]  ;;  %v4046_v56 = vld [vmem:[#allocation52_spill] sm:$0xff] }
 0x265   :  { %2532 = vmatprep.subr.mxu0 %v1763_v16  ;;  %2567 = vmatprep.subr.mxu1 %v1795_v24  ;;  %v1823_v21 = vand.u32 2147483647, %v4045_v12  ;;  %v1855_v45 = vand.u32 2147483647, %v4046_v56  ;;  %v4047_v28 = vld [vmem:[#allocation53_spill] sm:$0xff]  ;;  %v4048_v58 = vld [vmem:[#allocation54_spill] sm:$0xff] }
 0x266   :  { %2533 = vmatpush3.msra.mxu0 %v1747_v47  ;;  %2568 = vmatpush3.msra.mxu1 %v1779_v13  ;;  %v1838_v57 = vand.u32 2147483647, %v4047_v28  ;;  %v1870_v59 = vand.u32 2147483647, %v4048_v58  ;;  %v4049_v60 = vld [vmem:[#allocation55_spill] sm:$0xff]  ;;  %v4050_v62 = vld [vmem:[#allocation56_spill] sm:$0xff] }
 0x267   :  { %1940 = vmatmul.mubr.f32.vlgmr.msra.gmra.mxu0 %v1324_v52  ;;  %2010 = vmatmul.mubr.f32.vlgmr.msra.gmra.mxu1 %v1326_v19  ;;  %v1822_v61 = vand.u32 2147483647, %v4049_v60  ;;  %v1854_v63 = vand.u32 2147483647, %v4050_v62  ;;  %v4051_v0 = vld [vmem:[#allocation57_spill] sm:$0xff]  ;;  %v4052_v2 = vld [vmem:[#allocation58_spill] sm:$0xff] }
 0x268   :  { %2572 = vmatprep.subr.mxu0 %v1842_v49  ;;  %2607 = vmatprep.subr.mxu1 %v1874_v42  ;;  %v1837_v1 = vand.u32 2147483647, %v4051_v0  ;;  %v1869_v17 = vand.u32 2147483647, %v4052_v2  ;;  %v4053_v38 = vld [vmem:[#allocation59_spill] sm:$0xff]  ;;  %v4054_v4 = vld [vmem:[#allocation60_spill] sm:$0xff] }
 0x269   :  { %2573 = vmatpush3.msra.mxu0 %v1826_v53  ;;  %2079 = vmatprep.mubr.f32.mxu0 %v1329_v23  ;;  %v1821_v3 = vand.u32 2147483647, %v4053_v38  ;;  %v1853_v35 = vand.u32 2147483647, %v4054_v4  ;;  %v4055_v34 = vld [vmem:[#allocation61_spill] sm:$0xff]  ;;  %v4056_v6 = vld [vmem:[#allocation62_spill] sm:$0xff] }
 0x26a   :  { %2608 = vmatpush3.msra.mxu1 %v1858_v41  ;;  %2149 = vmatprep.mubr.f32.mxu1 %v1331_v31  ;;  %v1836_v5 = vand.u32 2147483647, %v4055_v34  ;;  %v1868_v33 = vand.u32 2147483647, %v4056_v6  ;;  %v4057_v30 = vld [vmem:[#allocation63_spill] sm:$0xff]  ;;  %v4058_v8 = vld [vmem:[#allocation64_spill] sm:$0xff] }
 0x26b   :  { %2574 = vmatprep.subr.mxu0 %v1841_v14  ;;  %2609 = vmatprep.subr.mxu1 %v1873_v26  ;;  %v1820_v7 = vand.u32 2147483647, %v4057_v30  ;;  %v1852_v18 = vand.u32 2147483647, %v4058_v8  ;;  %v4059_v16 = vld [vmem:[#allocation65_spill] sm:$0xff]  ;;  %v4060_v24 = vld [vmem:[#allocation66_spill] sm:$0xff] }
 0x26c   :  { %2575 = vmatpush3.msra.mxu0 %v1825_v27  ;;  %2610 = vmatpush3.msra.mxu1 %v1857_v32  ;;  %v1835_v37 = vand.u32 2147483647, %v4059_v16  ;;  %v1867_v39 = vand.u32 2147483647, %v4060_v24  ;;  %v4061_v47 = vld [vmem:[#allocation67_spill] sm:$0xff]  ;;  %v4062_v13 = vld [vmem:[#allocation68_spill] sm:$0xff] }
 0x26d   :  { %2576 = vmatprep.subr.mxu0 %v1840_v43  ;;  %2611 = vmatprep.subr.mxu1 %v1872_v44  ;;  %v1819_v48 = vand.u32 2147483647, %v4061_v47  ;;  %v1851_v36 = vand.u32 2147483647, %v4062_v13  ;;  %v4063_v15 = vld [vmem:[#allocation69_spill] sm:$0xff]  ;;  %v4064_v50 = vld [vmem:[#allocation70_spill] sm:$0xff] }
 0x26e   :  { %2577 = vmatpush3.msra.mxu0 %v1824_v10  ;;  %2612 = vmatpush3.msra.mxu1 %v1856_v9  ;;  %v1834_v49 = vand.u32 2147483647, %v4063_v15  ;;  %v1866_v42 = vand.u32 2147483647, %v4064_v50  ;;  %v4065_v51 = vld [vmem:[#allocation71_spill] sm:$0xff]  ;;  %v4066_v19 = vld [vmem:[#allocation72_spill] sm:$0xff] }
 0x26f   :  { %2578 = vmatprep.subr.mxu0 %v1839_v40  ;;  %2613 = vmatprep.subr.mxu1 %v1871_v46  ;;  %v1818_v52 = vand.u32 2147483647, %v4065_v51  ;;  %v1850_v53 = vand.u32 2147483647, %v4066_v19  ;;  %v4067_v41 = vld [vmem:[#allocation73_spill] sm:$0xff]  ;;  %v4068_v26 = vld [vmem:[#allocation74_spill] sm:$0xff] }
 0x270   :  { %2579 = vmatpush3.msra.mxu0 %v1823_v21  ;;  %2614 = vmatpush3.msra.mxu1 %v1855_v45  ;;  %v1833_v14 = vand.u32 2147483647, %v4067_v41  ;;  %v1865_v23 = vand.u32 2147483647, %v4068_v26  ;;  %v4069_v27 = vld [vmem:[#allocation75_spill] sm:$0xff]  ;;  %v4070_v31 = vld [vmem:[#allocation76_spill] sm:$0xff] }
 0x271   :  { %2580 = vmatprep.subr.mxu0 %v1838_v57  ;;  %2615 = vmatprep.subr.mxu1 %v1870_v59  ;;  %v1817_v32 = vand.u32 2147483647, %v4069_v27  ;;  %v1849_v43 = vand.u32 2147483647, %v4070_v31  ;;  %v4071_v20 = vld [vmem:[#allocation77_spill] sm:$0xff]  ;;  %v4072_v54 = vld [vmem:[#allocation78_spill] sm:$0xff] }
 0x272   :  { %2581 = vmatpush3.msra.mxu0 %v1822_v61  ;;  %2616 = vmatpush3.msra.mxu1 %v1854_v63  ;;  %v1832_v44 = vand.u32 2147483647, %v4071_v20  ;;  %v1864_v10 = vand.u32 2147483647, %v4072_v54  ;;  %v4073_v22 = vld [vmem:[#allocation79_spill] sm:$0xff]  ;;  %v4074_v55 = vld [vmem:[#allocation80_spill] sm:$0xff] }
 0x273   :  { %2582 = vmatprep.subr.mxu0 %v1837_v1  ;;  %2617 = vmatprep.subr.mxu1 %v1869_v17  ;;  %v1816_v9 = vand.u32 2147483647, %v4073_v22  ;;  %v1848_v40 = vand.u32 2147483647, %v4074_v55  ;;  %v4075_v11 = vld [vmem:[#allocation81_spill] sm:$0xff]  ;;  %v4076_v12 = vld [vmem:[#allocation82_spill] sm:$0xff] }
 0x274   :  { %2583 = vmatpush3.msra.mxu0 %v1821_v3  ;;  %2618 = vmatpush3.msra.mxu1 %v1853_v35  ;;  %v1831_v46 = vand.u32 2147483647, %v4075_v11  ;;  %v1863_v21 = vand.u32 2147483647, %v4076_v12  ;;  %v4077_v56 = vld [vmem:[#allocation83_spill] sm:$0xff]  ;;  %v4078_v28 = vld [vmem:[#allocation84_spill] sm:$0xff] }
 0x275   :  { %2584 = vmatprep.subr.mxu0 %v1836_v5  ;;  %2619 = vmatprep.subr.mxu1 %v1868_v33  ;;  %v1815_v45 = vand.u32 2147483647, %v4077_v56  ;;  %v1847_v57 = vand.u32 2147483647, %v4078_v28  ;;  %v4079_v58 = vld [vmem:[#allocation85_spill] sm:$0xff]  ;;  %v4080_v60 = vld [vmem:[#allocation86_spill] sm:$0xff] }
 0x276   :  { %2585 = vmatpush3.msra.mxu0 %v1820_v7  ;;  %2620 = vmatpush3.msra.mxu1 %v1852_v18  ;;  %v1830_v59 = vand.u32 2147483647, %v4079_v58  ;;  %v1862_v61 = vand.u32 2147483647, %v4080_v60  ;;  %v4081_v62 = vld [vmem:[#allocation87_spill] sm:$0xff]  ;;  %v4082_v0 = vld [vmem:[#allocation88_spill] sm:$0xff] }
 0x277   :  { %2586 = vmatprep.subr.mxu0 %v1835_v37  ;;  %2621 = vmatprep.subr.mxu1 %v1867_v39  ;;  %v1814_v63 = vand.u32 2147483647, %v4081_v62  ;;  %v1846_v1 = vand.u32 2147483647, %v4082_v0  ;;  %v4083_v2 = vld [vmem:[#allocation89_spill] sm:$0xff]  ;;  %v4084_v38 = vld [vmem:[#allocation90_spill] sm:$0xff] }
 0x278   :  { %2587 = vmatpush3.msra.mxu0 %v1819_v48  ;;  %2622 = vmatpush3.msra.mxu1 %v1851_v36  ;;  %v1829_v17 = vand.u32 2147483647, %v4083_v2  ;;  %v1861_v3 = vand.u32 2147483647, %v4084_v38  ;;  %v4085_v4 = vld [vmem:[#allocation91_spill] sm:$0xff]  ;;  %v4086_v34 = vld [vmem:[#allocation92_spill] sm:$0xff] }
 0x279   :  { %2588 = vmatprep.subr.mxu0 %v1834_v49  ;;  %2623 = vmatprep.subr.mxu1 %v1866_v42  ;;  %v1813_v35 = vand.u32 2147483647, %v4085_v4  ;;  %v1845_v5 = vand.u32 2147483647, %v4086_v34  ;;  %v4087_v6 = vld [vmem:[#allocation93_spill] sm:$0xff]  ;;  %v4088_v30 = vld [vmem:[#allocation94_spill] sm:$0xff] }
 0x27a   :  { %2589 = vmatpush3.msra.mxu0 %v1818_v52  ;;  %2624 = vmatpush3.msra.mxu1 %v1850_v53  ;;  %v1828_v33 = vand.u32 2147483647, %v4087_v6  ;;  %v1860_v7 = vand.u32 2147483647, %v4088_v30  ;;  %v4089_v8 = vld [vmem:[#allocation95_spill] sm:$0xff]  ;;  %v4090_v16 = vld [vmem:[#allocation96_spill] sm:$0xff] }
 0x27b   :  { %2590 = vmatprep.subr.mxu0 %v1833_v14  ;;  %2625 = vmatprep.subr.mxu1 %v1865_v23  ;;  %v1812_v18 = vand.u32 2147483647, %v4089_v8  ;;  %v1844_v37 = vand.u32 2147483647, %v4090_v16  ;;  %v4091_v24 = vld [vmem:[#allocation97_spill] sm:$0xff]  ;;  %v4092_v47 = vld [vmem:[#allocation98_spill] sm:$0xff] }
 0x27c   :  { %2591 = vmatpush3.msra.mxu0 %v1817_v32  ;;  %2626 = vmatpush3.msra.mxu1 %v1849_v43  ;;  %v1827_v39 = vand.u32 2147483647, %v4091_v24  ;;  %v1859_v48 = vand.u32 2147483647, %v4092_v47  ;;  %v4093_v13 = vld [vmem:[#allocation99_spill] sm:$0xff]  ;;  %v4094_v15 = vld [vmem:[#allocation100_spill] sm:$0xff] }
 0x27d   :  { %2592 = vmatprep.subr.mxu0 %v1832_v44  ;;  %2627 = vmatprep.subr.mxu1 %v1864_v10  ;;  %v1811_v36 = vand.u32 2147483647, %v4093_v13  ;;  %v1843_v49 = vand.u32 2147483647, %v4094_v15  ;;  %v1328_v50 = vmul.f32 0.5, %v3612_v25  ;;  %v1330_v42 = vmul.f32 0.5, %v3614_v29 }
 0x27e   :  { %2593 = vmatpush3.msra.mxu0 %v1816_v9  ;;  %2628 = vmatpush3.msra.mxu1 %v1848_v40  ;;  %v2178_v51 = vld [vmem:[#allocation7 + $0x78] sm:$0xff]  ;;  %v2177_v52 = vld [vmem:[#allocation7 + $0x70] sm:$0xff]  ;;  %v2176_v19 = vld [vmem:[#allocation7 + $0x68] sm:$0xff]  ;;  %v3085_v53 = vmov 0.0  }
 0x27f   :  { %2594 = vmatprep.subr.mxu0 %v1831_v46  ;;  %2629 = vmatprep.subr.mxu1 %v1863_v21  ;;  %v2271_v41 = vand.u32 2147483647, %v2178_v51  ;;  %v2270_v14 = vand.u32 2147483647, %v2177_v52  ;;  %v2175_v25 = vld [vmem:[#allocation7 + $0x60] sm:$0xff]  ;;  %v2174_v26 = vld [vmem:[#allocation7 + $0x58] sm:$0xff] }
 0x280   :  { %2595 = vmatpush3.msra.mxu0 %v1815_v45  ;;  %2630 = vmatpush3.msra.mxu1 %v1847_v57  ;;  %v2269_v29 = vand.u32 2147483647, %v2176_v19  ;;  %v2268_v23 = vand.u32 2147483647, %v2175_v25  ;;  %v2173_v27 = vld [vmem:[#allocation7 + $0x50] sm:$0xff]  ;;  %v2172_v31 = vld [vmem:[#allocation7 + $0x48] sm:$0xff] }
 0x281   :  { %2596 = vmatprep.subr.mxu0 %v1830_v59  ;;  %2631 = vmatprep.subr.mxu1 %v1862_v61  ;;  %v2267_v32 = vand.u32 2147483647, %v2174_v26  ;;  %v2266_v43 = vand.u32 2147483647, %v2173_v27  ;;  %v2265_v20 = vand.u32 2147483647, %v2172_v31 }
 0x282   :  { %2597 = vmatpush3.msra.mxu0 %v1814_v63  ;;  %2632 = vmatpush3.msra.mxu1 %v1846_v1  ;;  %v2171_v44 = vld [vmem:[#allocation7 + $0x40] sm:$0xff]  ;;  %v2170_v10 = vld [vmem:[#allocation7 + $0x38] sm:$0xff]  ;;  %v2169_v9 = vld [vmem:[#allocation7 + $0x30] sm:$0xff] }
 0x283   :  { %2598 = vmatprep.subr.mxu0 %v1829_v17  ;;  %2633 = vmatprep.subr.mxu1 %v1861_v3  ;;  %v2264_v54 = vand.u32 2147483647, %v2171_v44  ;;  %v2263_v22 = vand.u32 2147483647, %v2170_v10  ;;  %v2262_v55 = vand.u32 2147483647, %v2169_v9 }
 0x284   :  { %2599 = vmatpush3.msra.mxu0 %v1813_v35  ;;  %2634 = vmatpush3.msra.mxu1 %v1845_v5  ;;  %v2168_v40 = vld [vmem:[#allocation7 + $0x28] sm:$0xff]  ;;  %v2167_v46 = vld [vmem:[#allocation7 + $0x20] sm:$0xff]  ;;  %v2166_v21 = vld [vmem:[#allocation7 + $0x18] sm:$0xff] }
 0x285   :  { %2600 = vmatprep.subr.mxu0 %v1828_v33  ;;  %2635 = vmatprep.subr.mxu1 %v1860_v7  ;;  %v2261_v11 = vand.u32 2147483647, %v2168_v40  ;;  %v2260_v12 = vand.u32 2147483647, %v2167_v46  ;;  %v2259_v56 = vand.u32 2147483647, %v2166_v21 }
 0x286   :  { %2601 = vmatpush3.msra.mxu0 %v1812_v18  ;;  %2636 = vmatpush3.msra.mxu1 %v1844_v37  ;;  %v2165_v45 = vld [vmem:[#allocation7 + $0x10] sm:$0xff]  ;;  %v2164_v57 = vld [vmem:[#allocation7 + $0x8] sm:$0xff]  ;;  %v2163_v59 = vld [vmem:[#allocation7] sm:$0xff] }
 0x287   :  { %2602 = vmatprep.subr.mxu0 %v1827_v39  ;;  %2637 = vmatprep.subr.mxu1 %v1859_v48  ;;  %v2258_v28 = vand.u32 2147483647, %v2165_v45  ;;  %v2257_v58 = vand.u32 2147483647, %v2164_v57  ;;  %v2256_v60 = vand.u32 2147483647, %v2163_v59 }
 0x288   :  { %2603 = vmatpush3.msra.mxu0 %v1811_v36  ;;  %2638 = vmatpush3.msra.mxu1 %v1843_v49  ;;  %v2360_v34 = vld [vmem:[%s3817_s5] ss:$0 sm:$0xff] }
 0x289   :  { %2080 = vmatmul.mubr.f32.vlgmr.msra.gmra.mxu0 %v1328_v50  ;;  %2150 = vmatmul.mubr.f32.vlgmr.msra.gmra.mxu1 %v1330_v42 }
 0x28a   :  { %2676 = vmatprep.subr.mxu0 %v3085_v53  ;;  %2711 = vmatprep.subr.mxu1 %v3085_v53 }
 0x28b   :  { %2677 = vmatpush3.msra.mxu0 %v2178_v51  ;;  %2712 = vmatpush3.msra.mxu1 %v2271_v41 }
 0x28c   :  { %2678 = vmatprep.subr.mxu0 %v3085_v53  ;;  %2713 = vmatprep.subr.mxu1 %v3085_v53 }
 0x28d   :  { %2679 = vmatpush3.msra.mxu0 %v2177_v52  ;;  %2714 = vmatpush3.msra.mxu1 %v2270_v14 }
 0x28e   :  { %2680 = vmatprep.subr.mxu0 %v3085_v53  ;;  %2715 = vmatprep.subr.mxu1 %v3085_v53 }
 0x28f   :  { %2681 = vmatpush3.msra.mxu0 %v2176_v19  ;;  %2716 = vmatpush3.msra.mxu1 %v2269_v29 }
 0x290   :  { %2682 = vmatprep.subr.mxu0 %v3085_v53  ;;  %2717 = vmatprep.subr.mxu1 %v3085_v53 }
 0x291   :  { %2683 = vmatpush3.msra.mxu0 %v2175_v25  ;;  %2718 = vmatpush3.msra.mxu1 %v2268_v23  ;;  %v2361_v23 = vld [vmem:[%s3819_s7] ss:$0 sm:$0xff] }
 0x292   :  { %2684 = vmatprep.subr.mxu0 %v3085_v53  ;;  %2719 = vmatprep.subr.mxu1 %v3085_v53 }
 0x293   :  { %2685 = vmatpush3.msra.mxu0 %v2174_v26  ;;  %2720 = vmatpush3.msra.mxu1 %v2267_v32 }
 0x294   :  { %2686 = vmatprep.subr.mxu0 %v3085_v53  ;;  %2721 = vmatprep.subr.mxu1 %v3085_v53 }
 0x295   :  { %2687 = vmatpush3.msra.mxu0 %v2173_v27  ;;  %2722 = vmatpush3.msra.mxu1 %v2266_v43 }
 0x296   :  { %2688 = vmatprep.subr.mxu0 %v3085_v53  ;;  %2723 = vmatprep.subr.mxu1 %v3085_v53 }
 0x297   :  { %2689 = vmatpush3.msra.mxu0 %v2172_v31  ;;  %2724 = vmatpush3.msra.mxu1 %v2265_v20 }
 0x298   :  { %2690 = vmatprep.subr.mxu0 %v3085_v53  ;;  %2725 = vmatprep.subr.mxu1 %v3085_v53 }
 0x299   :  { %2691 = vmatpush3.msra.mxu0 %v2171_v44  ;;  %2726 = vmatpush3.msra.mxu1 %v2264_v54 }
 0x29a   :  { %2692 = vmatprep.subr.mxu0 %v3085_v53  ;;  %2727 = vmatprep.subr.mxu1 %v3085_v53 }
 0x29b   :  { %2693 = vmatpush3.msra.mxu0 %v2170_v10  ;;  %2728 = vmatpush3.msra.mxu1 %v2263_v22 }
 0x29c   :  { %2694 = vmatprep.subr.mxu0 %v3085_v53  ;;  %2729 = vmatprep.subr.mxu1 %v3085_v53 }
 0x29d   :  { %2695 = vmatpush3.msra.mxu0 %v2169_v9  ;;  %2730 = vmatpush3.msra.mxu1 %v2262_v55 }
 0x29e   :  { %2696 = vmatprep.subr.mxu0 %v3085_v53  ;;  %2731 = vmatprep.subr.mxu1 %v3085_v53 }
 0x29f   :  { %2697 = vmatpush3.msra.mxu0 %v2168_v40  ;;  %2732 = vmatpush3.msra.mxu1 %v2261_v11 }
 0x2a0   :  { %2698 = vmatprep.subr.mxu0 %v3085_v53  ;;  %2733 = vmatprep.subr.mxu1 %v3085_v53 }
 0x2a1   :  { %2699 = vmatpush3.msra.mxu0 %v2167_v46  ;;  %2734 = vmatpush3.msra.mxu1 %v2260_v12 }
 0x2a2   :  { %2700 = vmatprep.subr.mxu0 %v3085_v53  ;;  %2735 = vmatprep.subr.mxu1 %v3085_v53 }
 0x2a3   :  { %2701 = vmatpush3.msra.mxu0 %v2166_v21  ;;  %2736 = vmatpush3.msra.mxu1 %v2259_v56 }
 0x2a4   :  { %2702 = vmatprep.subr.mxu0 %v3085_v53  ;;  %2737 = vmatprep.subr.mxu1 %v3085_v53 }
 0x2a5   :  { %2703 = vmatpush3.msra.mxu0 %v2165_v45  ;;  %2738 = vmatpush3.msra.mxu1 %v2258_v28 }
 0x2a6   :  { %2704 = vmatprep.subr.mxu0 %v3085_v53  ;;  %2739 = vmatprep.subr.mxu1 %v3085_v53 }
 0x2a7   :  { %2705 = vmatpush3.msra.mxu0 %v2164_v57  ;;  %2740 = vmatpush3.msra.mxu1 %v2257_v58 }
 0x2a8   :  { %2706 = vmatprep.subr.mxu0 %v3085_v53  ;;  %2741 = vmatprep.subr.mxu1 %v3085_v53 }
 0x2a9   :  { %2707 = vmatpush3.msra.mxu0 %v2163_v59  ;;  %2708 = vmatprep.mubr.msk.f32.mxu0 %vm3086_vm0, %v3085_v53 }
 0x2aa   :  { %2742 = vmatpush3.msra.mxu1 %v2256_v60  ;;  %2743 = vmatprep.mubr.msk.f32.mxu1 %vm3086_vm0, %v3085_v53 }
 0x2c4   :  { %v2394_v61 = vpop.f32.mrf.mxu0  ;;  %v2429_v62 = vpop.f32.mrf.mxu1 }
 0x2c6   :  { %v2395_v63 = vpop.f32.mrf.mxu0  ;;  %v2430_v0 = vpop.f32.mrf.mxu1 }
 0x2c7   :  { %v2396_v35 = vadd.f32 %v2395_v63, %v2394_v61  ;;  %v2431_v30 = vadd.f32 %v2430_v0, %v2429_v62 }
 0x2c9   :  { %v1534_v33 = vadd.f32 %v2396_v35, %v2360_v34 }
 0x2cb   :  { %v1604_v24 = vadd.f32 %v2431_v30, %v1534_v33 }
 0x306   :  { %v2464_v1 = vpop.f32.mrf.mxu0  ;;  %v2499_v2 = vpop.f32.mrf.mxu1 }
 0x308   :  { %v2465_v17 = vpop.f32.mrf.mxu0  ;;  %v2500_v38 = vpop.f32.mrf.mxu1 }
 0x309   :  { %v2466_v7 = vadd.f32 %v2465_v17, %v2464_v1  ;;  %v2501_v15 = vadd.f32 %v2500_v38, %v2499_v2 }
 0x30b   :  { %v1674_v48 = vadd.f32 %v2466_v7, %v1604_v24 }
 0x30d   :  { %v1744_v42 = vadd.f32 %v2501_v15, %v1674_v48 }
 0x327   :  { %v2534_v3 = vpop.f32.mrf.mxu0  ;;  %v2569_v4 = vpop.f32.mrf.mxu1 }
 0x329   :  { %v2535_v5 = vpop.f32.mrf.mxu0  ;;  %v2570_v6 = vpop.f32.mrf.mxu1 }
 0x32a   :  { %v2536_v8 = vadd.f32 %v2535_v5, %v2534_v3  ;;  %v2571_v18 = vadd.f32 %v2570_v6, %v2569_v4 }
 0x32c   :  { %v2012_v13 = vadd.f32 %v2571_v18, %v2536_v8 }
 0x349   :  { %v2604_v16 = vpop.f32.mrf.mxu0  ;;  %v2639_v37 = vpop.f32.mrf.mxu1 }
 0x34b   :  { %v2605_v39 = vpop.f32.mrf.mxu0  ;;  %v2640_v47 = vpop.f32.mrf.mxu1 }
 0x34c   :  { %v2606_v36 = vadd.f32 %v2605_v39, %v2604_v16  ;;  %v2641_v50 = vadd.f32 %v2640_v47, %v2639_v37 }
 0x34e   :  { %v2082_v49 = vadd.f32 %v2606_v36, %v2012_v13 }
 0x350   :  { %v2152_v51 = vadd.f32 %v2641_v50, %v2082_v49 }
 0x352   :  { %v2155_v52 = vsub.f32 %v1744_v42, %v2152_v51  ;;  %v2157_v19 = vadd.f32 %v2152_v51, %v1744_v42 }
 0x354   :  { %v2156_v53 = vmax.f32 %v2155_v52, 0.0  ;;  %v2158_v41 = vmax.f32 %v2157_v19, 0.0 }
 0x356   :  { %v2159_v14 = vadd.f32 %v2158_v41, %v2156_v53  ;;  %v2161_v25 = vsub.f32 %v2158_v41, %v2156_v53 }
 0x358   :  { %v2160_v29 = vmul.f32 0.5, %v2159_v14  ;;  %v2162_v26 = vmul.f32 0.5, %v2161_v25 }
 0x35a   :  { %2709 = vmatmul.mubr.f32.vlgmr.msra.gmra.mxu0 %v2160_v29  ;;  %2744 = vmatmul.mubr.f32.vlgmr.msra.gmra.mxu1 %v2162_v26 }
 0x41a   :  { %v2252_v27 = vpop.f32.mrf.mxu0  ;;  %v2338_v32 = vpop.f32.mrf.mxu1 }
 0x41b   :  { %v2253_v31 = vadd.f32 %v2361_v23, %v2252_v27 }
 0x41c   :  { %v2710_v43 = vpop.f32.mrf.mxu0  ;;  %v2745_v20 = vpop.f32.mrf.mxu1 }
 0x41d   :  { %v2342_v44 = vsub.f32 %v2253_v31, %v2338_v32  ;;  %v2344_v54 = vadd.f32 %v2338_v32, %v2253_v31 }
 0x41f   :  { %2343 = vst [vmem:[%s3820_s8] sm:$0xff] %v2342_v44  ;;  %2345 = vst [vmem:[%s3821_s9] sm:$0xff] %v2344_v54 }
 0x420   :  { %2354 = vsyncpa [#allocation4], 1 }
 0x421   :  { %2355 = vsyncpa [#allocation6], 1 }

</bundles_post_ra>
